<compile_context>
chip_gen: v5e
topology: v5e:2x2
jax: 0.10.0
libtpu: 0.0.40
codegen_flags: <defaults>
</compile_context>

<pallas_src>
import functools

import jax
import jax.numpy as jnp
from jax.experimental import pallas as pl
from jax.experimental.pallas import tpu as pltpu

LANE = 128
SUBLANE = 8
VMEM_LIMIT = 64 * 1024 * 1024
# NatureCNN architecture constants from the PyTorch spec: (out_ch, kernel, stride)
_CONV_DEFS = ((32, 8, 4), (64, 4, 2), (64, 3, 1))


def _round_up(x, m):
    return (x + m - 1) // m * m


# ----------------------------------------------------------------------------
# Pallas kernel 1: fused  out = relu?(x @ w + b)   (M-tiled grid, lane-dense N)
# ----------------------------------------------------------------------------
def _linear_kernel(x_ref, w_ref, b_ref, o_ref, *, relu):
    acc = jnp.dot(x_ref[...], w_ref[...], preferred_element_type=jnp.float32)
    acc = acc + b_ref[...]                      # b is (1, N), broadcasts over rows
    if relu:
        acc = jnp.maximum(acc, 0.0)
    o_ref[...] = acc.astype(o_ref.dtype)


def linear(x, w, b, *, relu=False, block_m=512):
    """x: (M, K) f32, w: (K, N) f32 (N multiple of 128), b: (1, N) -> (M, N)."""
    M, K = x.shape
    K2, N = w.shape
    assert K == K2 and b.shape == (1, N), (x.shape, w.shape, b.shape)

    if M <= block_m:
        bm, Mp = M, M                           # single full-array block
    else:
        bm = block_m                            # tile rows; parallel over TCs
        Mp = _round_up(M, bm)
        if Mp != M:
            x = jnp.pad(x, ((0, Mp - M), (0, 0)))

    out = pl.pallas_call(
        functools.partial(_linear_kernel, relu=relu),
        out_shape=jax.ShapeDtypeStruct((Mp, N), jnp.float32),
        grid=(Mp // bm,),
        in_specs=[
            pl.BlockSpec((bm, K), lambda i: (i, 0)),
            pl.BlockSpec((K, N), lambda i: (0, 0)),    # weights resident
            pl.BlockSpec((1, N), lambda i: (0, 0)),
        ],
        out_specs=pl.BlockSpec((bm, N), lambda i: (i, 0)),
        compiler_params=pltpu.CompilerParams(
            dimension_semantics=("parallel",),
            vmem_limit_bytes=VMEM_LIMIT),
    )(x, w, b)
    return out if Mp == M else out[:M]


# ----------------------------------------------------------------------------
# Pallas kernel 2: fused tail, batch-tiled.
#   conv3(+bias+ReLU) as one big matmul over (bt*P) rows, torch-NCHW-flatten
#   folded into the pre-permuted l1_wa, concat folded away by splitting l1_w,
#   then l1(+ReLU) + l2 and the linear_stack branch.  Everything stays in VMEM.
# ----------------------------------------------------------------------------
def _tail_kernel(p3_ref, data_ref, c3w_ref, c3b_ref, ls1w_ref, ls1b_ref,
                 ls2w_ref, ls2b_ref, l1wa_ref, l1wb_ref, l1b_ref,
                 l2w_ref, l2b_ref, o_ref, *, bt, num_patches, c3_out):
    f32 = jnp.float32

    # linear_stack branch: Linear(23,512) -> ReLU -> Linear(512,512)
    x2 = jnp.dot(data_ref[...], ls1w_ref[...], preferred_element_type=f32)
    x2 = jnp.maximum(x2 + ls1b_ref[...], 0.0)
    x2 = jnp.dot(x2, ls2w_ref[...], preferred_element_type=f32) + ls2b_ref[...]

    # conv3 (+bias+ReLU) as ONE matmul over all (batch, patch) rows.
    y3 = jnp.dot(p3_ref[...], c3w_ref[...], preferred_element_type=f32)
    y3 = jnp.maximum(y3 + c3b_ref[...], 0.0)            # (bt*P, 64)

    # Rows of y3 are b-major (row = b*P + p), so this is a pure row-major
    # regroup; the torch (c, ho, wo) flatten order lives in l1_wa's row
    # permutation, making flatten + concat + l1 ONE matmul with K = P*64.
    x1 = y3.reshape(bt, num_patches * c3_out)            # (bt, P*64)

    h = (jnp.dot(x1, l1wa_ref[...], preferred_element_type=f32)
         + jnp.dot(x2, l1wb_ref[...], preferred_element_type=f32)
         + l1b_ref[...])
    h = jnp.maximum(h, 0.0)
    out = jnp.dot(h, l2w_ref[...], preferred_element_type=f32) + l2b_ref[...]
    o_ref[...] = out.astype(o_ref.dtype)


def _choose_tail_tile(num_patches, k3):
    """Batch-tile rows for the tail: multiple of 8, p3 tile kept ~<= 4 MB."""
    budget = 4 * 1024 * 1024
    bt = budget // (num_patches * k3 * 4)
    bt = max(SUBLANE, (bt // SUBLANE) * SUBLANE)
    return min(bt, 128)


def fused_tail(p3, data, pp, *, num_patches):
    """p3: (Bp*P, K3) f32 with b-major rows, data: (Bp, 23) -> (Bp, 128)."""
    Bp = data.shape[0]
    K3 = p3.shape[1]
    Npad = pp["l2_w"].shape[1]
    c3_out = pp["c3_w"].shape[1]
    assert p3.shape[0] == Bp * num_patches

    bt = min(_choose_tail_tile(num_patches, K3), Bp)
    Bp2 = _round_up(Bp, bt)
    if Bp2 != Bp:
        p3 = jnp.pad(p3, ((0, (Bp2 - Bp) * num_patches), (0, 0)))
        data = jnp.pad(data, ((0, Bp2 - Bp), (0, 0)))

    w_names = ["c3_w", "c3_b", "ls1_w", "ls1_b", "ls2_w", "ls2_b",
               "l1_wa", "l1_wb", "l1_b", "l2_w", "l2_b"]
    w_inputs = [pp[n] for n in w_names]

    in_specs = ([pl.BlockSpec((bt * num_patches, K3), lambda i: (i, 0)),
                 pl.BlockSpec((bt, data.shape[1]), lambda i: (i, 0))]
                + [pl.BlockSpec(w.shape, lambda i: (0, 0)) for w in w_inputs])

    out = pl.pallas_call(
        functools.partial(_tail_kernel, bt=bt, num_patches=num_patches,
                          c3_out=c3_out),
        out_shape=jax.ShapeDtypeStruct((Bp2, Npad), jnp.float32),
        grid=(Bp2 // bt,),
        in_specs=in_specs,
        out_specs=pl.BlockSpec((bt, Npad), lambda i: (i, 0)),
        compiler_params=pltpu.CompilerParams(
            dimension_semantics=("parallel",),
            vmem_limit_bytes=VMEM_LIMIT),
    )(p3, data, *w_inputs)
    return out[:Bp]


# ----------------------------------------------------------------------------
# JAX glue: im2col in NHWC, feature order (kh, kw, C) with C minor.
# TODO(synk): fold this window extraction into the kernels (in-kernel strided
#   slices) to reach a single pallas_call per forward.
# ----------------------------------------------------------------------------
def _im2col_nhwc(x, k, stride):
    B, H, W, C = x.shape
    Ho = (H - k) // stride + 1
    Wo = (W - k) // stride + 1
    taps = [x[:, i:i + stride * Ho:stride, j:j + stride * Wo:stride, :]
            for i in range(k) for j in range(k)]
    p = jnp.stack(taps, axis=3)                         # (B, Ho, Wo, k*k, C)
    return p.reshape(B * Ho * Wo, k * k * C), Ho, Wo


# ----------------------------------------------------------------------------
# Params: init in PyTorch layout, then one-time prep into kernel layout
# ----------------------------------------------------------------------------
def init_params(key, in_channels, n_flatten, output_dim):
    ks = jax.random.split(key, 14)
    s = 0.05

    def w(k, shape):
        return jax.random.normal(k, shape, jnp.float32) * s

    return {
        # cnn (torch layout: (O, C, kh, kw))
        "c1_w": w(ks[0], (32, in_channels, 8, 8)), "c1_b": w(ks[1], (32,)),
        "c2_w": w(ks[2], (64, 32, 4, 4)),          "c2_b": w(ks[3], (64,)),
        "c3_w": w(ks[4], (64, 64, 3, 3)),          "c3_b": w(ks[5], (64,)),
        # linear_stack: Linear(23, 512) -> ReLU -> Linear(512, 512)   ((in,out))
        "ls1_w": w(ks[6], (23, 512)),   "ls1_b": w(ks[7], (512,)),
        "ls2_w": w(ks[8], (512, 512)),  "ls2_b": w(ks[9], (512,)),
        # linear: Linear(n_flatten + 512, 512) -> ReLU -> Linear(512, output_dim)
        "l1_w": w(ks[10], (n_flatten + 512, 512)), "l1_b": w(ks[11], (512,)),
        "l2_w": w(ks[12], (512, output_dim)),      "l2_b": w(ks[13], (output_dim,)),
    }


def prepare_params(params):
    """One-time layout prep:
       - conv1/conv2 weights -> (kh*kw*Cin_pad, 128) matrices (lane-dense out,
         zero rows for the padded input channels of the previous layer),
       - conv3 weight -> (kh*kw*128, 64), UN-padded output (stays in VMEM),
       - l1 split into (P*64, 512) permuted part (torch flatten folded in) and
         (512, 512) part (concat folded away),
       - l2 padded lane-dense to 128 output lanes."""
    def prep_conv(w, b, cin_pad, opad):
        O, Cin, kh, kw = w.shape
        wm = jnp.transpose(w, (2, 3, 1, 0))                       # (kh,kw,Cin,O)
        wm = jnp.pad(wm, ((0, 0), (0, 0), (0, cin_pad - Cin), (0, 0)))
        wm = wm.reshape(kh * kw * cin_pad, O)
        wm = jnp.pad(wm, ((0, 0), (0, opad - O)))
        bm = jnp.pad(b, (0, opad - O)).reshape(1, opad)
        return wm, bm

    in_ch = params["c1_w"].shape[1]
    c1_w, c1_b = prep_conv(params["c1_w"], params["c1_b"], in_ch, LANE)
    c2_w, c2_b = prep_conv(params["c2_w"], params["c2_b"], LANE, LANE)
    # conv3: padded input channels (conv2 output is 128-wide), UN-padded output
    c3_out = params["c3_w"].shape[0]                              # 64
    c3_w, c3_b = prep_conv(params["c3_w"], params["c3_b"], LANE, c3_out)

    n_flatten = params["l1_w"].shape[0] - 512
    P = n_flatten // c3_out                                       # Ho3 * Wo3

    # torch flatten order is (c, ho, wo): l1 row index = c*P + p.  Permute so
    # the fused kernel consumes conv3's (b-major, p, c-minor) rows directly.
    l1_wa = params["l1_w"][:n_flatten]
    l1_wb = params["l1_w"][n_flatten:]
    l1_wa = jnp.transpose(l1_wa.reshape(c3_out, P, 512), (1, 0, 2))  # (P,64,512)
    l1_wa = l1_wa.reshape(P * c3_out, 512)                           # row = p*64+c

    out_dim = params["l2_w"].shape[1]
    Np = _round_up(out_dim, LANE)
    l2_w = jnp.pad(params["l2_w"], ((0, 0), (0, Np - out_dim)))
    l2_b = jnp.pad(params["l2_b"], (0, Np - out_dim)).reshape(1, Np)

    return {
        "c1_w": c1_w, "c1_b": c1_b,
        "c2_w": c2_w, "c2_b": c2_b,
        "c3_w": c3_w, "c3_b": c3_b,
        "ls1_w": params["ls1_w"], "ls1_b": params["ls1_b"].reshape(1, -1),
        "ls2_w": params["ls2_w"], "ls2_b": params["ls2_b"].reshape(1, -1),
        "l1_wa": l1_wa, "l1_wb": l1_wb, "l1_b": params["l1_b"].reshape(1, -1),
        "l2_w": l2_w, "l2_b": l2_b,
    }


# ----------------------------------------------------------------------------
# Forward
# ----------------------------------------------------------------------------
def nature_cnn_forward(pp, observations, data, *, output_dim):
    B = observations.shape[0]
    Bp = _round_up(B, SUBLANE)                 # sublane-pad batch once
    if Bp != B:
        observations = jnp.pad(observations,
                               ((0, Bp - B), (0, 0), (0, 0), (0, 0)))
        data = jnp.pad(data, ((0, Bp - B), (0, 0)))

    x = jnp.transpose(observations, (0, 2, 3, 1))      # NCHW -> NHWC, once

    (_, c1k, c1s), (_, c2k, c2s), (c3o, c3k, c3s) = _CONV_DEFS
    c1_opad = pp["c1_b"].shape[1]                      # 128 (lane-dense)
    c2_opad = pp["c2_b"].shape[1]                      # 128 (lane-dense)

    # conv1: keep the 128-wide channel-padded output (padded channels are 0)
    p, Ho, Wo = _im2col_nhwc(x, c1k, c1s)
    a = linear(p, pp["c1_w"], pp["c1_b"], relu=True)
    a = a.reshape(Bp, Ho, Wo, c1_opad)
    # conv2: zero K-rows for the padded input channels are baked into c2_w
    p, Ho, Wo = _im2col_nhwc(a, c2k, c2s)
    a = linear(p, pp["c2_w"], pp["c2_b"], relu=True)
    a = a.reshape(Bp, Ho, Wo, c2_opad)
    # conv3 patches feed the fused tail kernel directly (b-major rows)
    p3, Ho, Wo = _im2col_nhwc(a, c3k, c3s)             # (Bp*P, 9*128)
    P = Ho * Wo
    assert P * c3o == pp["l1_wa"].shape[0], \
        "spatial size inconsistent with l1 weight"

    out = fused_tail(p3, data, pp, num_patches=P)      # (Bp, 128) lane-dense
    return out[:B, :output_dim]


# ----------------------------------------------------------------------------
# Pure-JAX reference (matches the PyTorch module) for a correctness check
# ----------------------------------------------------------------------------
def reference_forward(params, observations, data):
    def conv(x, w, b, s):
        y = jax.lax.conv_general_dilated(
            x, w, window_strides=(s, s), padding="VALID",
            dimension_numbers=("NCHW", "OIHW", "NCHW"))
        return jax.nn.relu(y + b.reshape(1, -1, 1, 1))

    x = conv(observations, params["c1_w"], params["c1_b"], 4)
    x = conv(x, params["c2_w"], params["c2_b"], 2)
    x = conv(x, params["c3_w"], params["c3_b"], 1)
    x1 = x.reshape(x.shape[0], -1)
    x2 = jax.nn.relu(data @ params["ls1_w"] + params["ls1_b"])
    x2 = x2 @ params["ls2_w"] + params["ls2_b"]
    xc = jnp.concatenate([x1, x2], axis=1)
    y = jax.nn.relu(xc @ params["l1_w"] + params["l1_b"])
    return y @ params["l2_w"] + params["l2_b"]


if __name__ == "__main__":
    # 36x36 is the minimal spatial size surviving the three no-padding convs
    # (36 -> 8 -> 3 -> 1), giving n_flatten = 64.
    B, C, H, W = 2, 4, 36, 36
    OUTPUT_DIM = 8
    N_FLATTEN = 64 * 1 * 1

    key = jax.random.PRNGKey(0)
    k_obs, k_data, k_params = jax.random.split(key, 3)
    observations = jax.random.normal(k_obs, (B, C, H, W), jnp.float32)
    data = jax.random.normal(k_data, (B, 23), jnp.float32)
    params = init_params(k_params, C, N_FLATTEN, OUTPUT_DIM)

    pp = prepare_params(params)   # one-time layout prep, outside the step
    fwd = jax.jit(functools.partial(nature_cnn_forward, output_dim=OUTPUT_DIM))

    out = fwd(pp, observations, data)
    jax.block_until_ready(out)
    assert out.shape == (B, OUTPUT_DIM), out.shape

    ref = jax.jit(reference_forward)(params, observations, data)
    jax.block_until_ready(ref)
    # Tightened vs. the previous 5e-2 (review), with margin for the MXU's
    # default-precision f32 matmuls in both the kernel and XLA reference.
    rel_err = float(jnp.max(jnp.abs(out - ref)) / (jnp.max(jnp.abs(ref)) + 1e-6))
    assert rel_err < 2e-2, f"mismatch vs pure-JAX reference: rel_err={rel_err}"

    print("KERNEL_OK")
</pallas_src>

<mosaic_0001>
module attributes {stable_mosaic.version = 11 : i64} {
  func.func @_linear_kernel(%arg0: i32, %arg1: memref<512x256xf32, #tpu.memory_space<vmem>>, %arg2: memref<256x128xf32, #tpu.memory_space<vmem>>, %arg3: memref<1x128xf32, #tpu.memory_space<vmem>>, %arg4: memref<512x128xf32, #tpu.memory_space<vmem>>) attributes {dimension_semantics = [#tpu.dimension_semantics<parallel>], iteration_bounds = array<i64: 1>, scalar_prefetch = 0 : i64, scratch_operands = 0 : i64, tpu.core_type = #tpu.core_type<tc>, window_params = [{transform_indices = @transform_0, window_bounds = array<i64: 512, 256>}, {pipeline_mode = #tpu.pipeline_mode<synchronous>, transform_indices = @transform_1, window_bounds = array<i64: 256, 128>}, {pipeline_mode = #tpu.pipeline_mode<synchronous>, transform_indices = @transform_2, window_bounds = array<i64: 1, 128>}, {transform_indices = @transform_3, window_bounds = array<i64: 512, 128>}]} {
    %c0 = arith.constant 0 : index
    %c0_0 = arith.constant 0 : index
    %0 = vector.load %arg1[%c0, %c0_0] : memref<512x256xf32, #tpu.memory_space<vmem>>, vector<512x256xf32>
    %c0_1 = arith.constant 0 : index
    %c0_2 = arith.constant 0 : index
    %1 = vector.load %arg2[%c0_1, %c0_2] : memref<256x128xf32, #tpu.memory_space<vmem>>, vector<256x128xf32>
    %cst = arith.constant dense<0.000000e+00> : vector<512x128xf32>
    %2 = tpu.matmul %0, %1, %cst {dimension_numbers = #tpu.dot_dimension_numbers<[1], [0], [0], [1], [0, 0, 1, 1], [], []>} : vector<512x256xf32>, vector<256x128xf32>, vector<512x128xf32> -> vector<512x128xf32>
    %c0_3 = arith.constant 0 : index
    %c0_4 = arith.constant 0 : index
    %3 = vector.load %arg3[%c0_3, %c0_4] : memref<1x128xf32, #tpu.memory_space<vmem>>, vector<1x128xf32>
    %4 = vector.broadcast %3 : vector<1x128xf32> to vector<512x128xf32>
    %5 = arith.addf %2, %4 : vector<512x128xf32>
    %cst_5 = arith.constant 0.000000e+00 : f32
    %6 = vector.broadcast %cst_5 : f32 to vector<512x128xf32>
    %7 = arith.maximumf %5, %6 : vector<512x128xf32>
    %c0_6 = arith.constant 0 : index
    %c0_7 = arith.constant 0 : index
    %8 = vector.load %arg4[%c0_6, %c0_7] : memref<512x128xf32, #tpu.memory_space<vmem>>, vector<512x128xf32>
    tpu.vector_store %arg4[%c0_6, %c0_7], %7 {strides = array<i32>} : memref<512x128xf32, #tpu.memory_space<vmem>>, vector<512x128xf32>,
    return
  }
  func.func @transform_0(%arg0: i32) -> (i32, i32) {
    %c0_i32 = arith.constant 0 : i32
    %c0_i32_0 = arith.constant 0 : i32
    return %arg0, %c0_i32 : i32, i32
  }
  func.func @transform_1(%arg0: i32) -> (i32, i32) {
    %c0_i32 = arith.constant 0 : i32
    %c0_i32_0 = arith.constant 0 : i32
    %c0_i32_1 = arith.constant 0 : i32
    return %c0_i32, %c0_i32_0 : i32, i32
  }
  func.func @transform_2(%arg0: i32) -> (i32, i32) {
    %c0_i32 = arith.constant 0 : i32
    %c0_i32_0 = arith.constant 0 : i32
    %c0_i32_1 = arith.constant 0 : i32
    return %c0_i32, %c0_i32_0 : i32, i32
  }
  func.func @transform_3(%arg0: i32) -> (i32, i32) {
    %c0_i32 = arith.constant 0 : i32
    %c0_i32_0 = arith.constant 0 : i32
    return %arg0, %c0_i32 : i32, i32
  }
}

module attributes {stable_mosaic.version = 11 : i64} {
  func.func @_linear_kernel(%arg0: i32, %arg1: memref<72x2048xf32, #tpu.memory_space<vmem>>, %arg2: memref<2048x128xf32, #tpu.memory_space<vmem>>, %arg3: memref<1x128xf32, #tpu.memory_space<vmem>>, %arg4: memref<72x128xf32, #tpu.memory_space<vmem>>) attributes {dimension_semantics = [#tpu.dimension_semantics<parallel>], iteration_bounds = array<i64: 1>, scalar_prefetch = 0 : i64, scratch_operands = 0 : i64, tpu.core_type = #tpu.core_type<tc>, window_params = [{transform_indices = @transform_0, window_bounds = array<i64: 72, 2048>}, {pipeline_mode = #tpu.pipeline_mode<synchronous>, transform_indices = @transform_1, window_bounds = array<i64: 2048, 128>}, {pipeline_mode = #tpu.pipeline_mode<synchronous>, transform_indices = @transform_2, window_bounds = array<i64: 1, 128>}, {transform_indices = @transform_3, window_bounds = array<i64: 72, 128>}]} {
    %c0 = arith.constant 0 : index
    %c0_0 = arith.constant 0 : index
    %0 = vector.load %arg1[%c0, %c0_0] : memref<72x2048xf32, #tpu.memory_space<vmem>>, vector<72x2048xf32>
    %c0_1 = arith.constant 0 : index
    %c0_2 = arith.constant 0 : index
    %1 = vector.load %arg2[%c0_1, %c0_2] : memref<2048x128xf32, #tpu.memory_space<vmem>>, vector<2048x128xf32>
    %cst = arith.constant dense<0.000000e+00> : vector<72x128xf32>
    %2 = tpu.matmul %0, %1, %cst {dimension_numbers = #tpu.dot_dimension_numbers<[1], [0], [0], [1], [0, 0, 1, 1], [], []>} : vector<72x2048xf32>, vector<2048x128xf32>, vector<72x128xf32> -> vector<72x128xf32>
    %c0_3 = arith.constant 0 : index
    %c0_4 = arith.constant 0 : index
    %3 = vector.load %arg3[%c0_3, %c0_4] : memref<1x128xf32, #tpu.memory_space<vmem>>, vector<1x128xf32>
    %4 = vector.broadcast %3 : vector<1x128xf32> to vector<72x128xf32>
    %5 = arith.addf %2, %4 : vector<72x128xf32>
    %cst_5 = arith.constant 0.000000e+00 : f32
    %6 = vector.broadcast %cst_5 : f32 to vector<72x128xf32>
    %7 = arith.maximumf %5, %6 : vector<72x128xf32>
    %c0_6 = arith.constant 0 : index
    %c0_7 = arith.constant 0 : index
    %8 = vector.load %arg4[%c0_6, %c0_7] : memref<72x128xf32, #tpu.memory_space<vmem>>, vector<72x128xf32>
    tpu.vector_store %arg4[%c0_6, %c0_7], %7 {strides = array<i32>} : memref<72x128xf32, #tpu.memory_space<vmem>>, vector<72x128xf32>,
    return
  }
  func.func @transform_0(%arg0: i32) -> (i32, i32) {
    %c0_i32 = arith.constant 0 : i32
    %c0_i32_0 = arith.constant 0 : i32
    return %arg0, %c0_i32 : i32, i32
  }
  func.func @transform_1(%arg0: i32) -> (i32, i32) {
    %c0_i32 = arith.constant 0 : i32
    %c0_i32_0 = arith.constant 0 : i32
    %c0_i32_1 = arith.constant 0 : i32
    return %c0_i32, %c0_i32_0 : i32, i32
  }
  func.func @transform_2(%arg0: i32) -> (i32, i32) {
    %c0_i32 = arith.constant 0 : i32
    %c0_i32_0 = arith.constant 0 : i32
    %c0_i32_1 = arith.constant 0 : i32
    return %c0_i32, %c0_i32_0 : i32, i32
  }
  func.func @transform_3(%arg0: i32) -> (i32, i32) {
    %c0_i32 = arith.constant 0 : i32
    %c0_i32_0 = arith.constant 0 : i32
    return %arg0, %c0_i32 : i32, i32
  }
}

module attributes {stable_mosaic.version = 11 : i64} {
  func.func @_tail_kernel(%arg0: i32, %arg1: memref<8x1152xf32, #tpu.memory_space<vmem>>, %arg2: memref<8x23xf32, #tpu.memory_space<vmem>>, %arg3: memref<1152x64xf32, #tpu.memory_space<vmem>>, %arg4: memref<1x64xf32, #tpu.memory_space<vmem>>, %arg5: memref<23x512xf32, #tpu.memory_space<vmem>>, %arg6: memref<1x512xf32, #tpu.memory_space<vmem>>, %arg7: memref<512x512xf32, #tpu.memory_space<vmem>>, %arg8: memref<1x512xf32, #tpu.memory_space<vmem>>, %arg9: memref<64x512xf32, #tpu.memory_space<vmem>>, %arg10: memref<512x512xf32, #tpu.memory_space<vmem>>, %arg11: memref<1x512xf32, #tpu.memory_space<vmem>>, %arg12: memref<512x128xf32, #tpu.memory_space<vmem>>, %arg13: memref<1x128xf32, #tpu.memory_space<vmem>>, %arg14: memref<8x128xf32, #tpu.memory_space<vmem>>) attributes {dimension_semantics = [#tpu.dimension_semantics<parallel>], iteration_bounds = array<i64: 1>, scalar_prefetch = 0 : i64, scratch_operands = 0 : i64, tpu.core_type = #tpu.core_type<tc>, window_params = [{transform_indices = @transform_0, window_bounds = array<i64: 8, 1152>}, {transform_indices = @transform_1, window_bounds = array<i64: 8, 23>}, {pipeline_mode = #tpu.pipeline_mode<synchronous>, transform_indices = @transform_2, window_bounds = array<i64: 1152, 64>}, {pipeline_mode = #tpu.pipeline_mode<synchronous>, transform_indices = @transform_3, window_bounds = array<i64: 1, 64>}, {pipeline_mode = #tpu.pipeline_mode<synchronous>, transform_indices = @transform_4, window_bounds = array<i64: 23, 512>}, {pipeline_mode = #tpu.pipeline_mode<synchronous>, transform_indices = @transform_5, window_bounds = array<i64: 1, 512>}, {pipeline_mode = #tpu.pipeline_mode<synchronous>, transform_indices = @transform_6, window_bounds = array<i64: 512, 512>}, {pipeline_mode = #tpu.pipeline_mode<synchronous>, transform_indices = @transform_7, window_bounds = array<i64: 1, 512>}, {pipeline_mode = #tpu.pipeline_mode<synchronous>, transform_indices = @transform_8, window_bounds = array<i64: 64, 512>}, {pipeline_mode = #tpu.pipeline_mode<synchronous>, transform_indices = @transform_9, window_bounds = array<i64: 512, 512>}, {pipeline_mode = #tpu.pipeline_mode<synchronous>, transform_indices = @transform_10, window_bounds = array<i64: 1, 512>}, {pipeline_mode = #tpu.pipeline_mode<synchronous>, transform_indices = @transform_11, window_bounds = array<i64: 512, 128>}, {pipeline_mode = #tpu.pipeline_mode<synchronous>, transform_indices = @transform_12, window_bounds = array<i64: 1, 128>}, {transform_indices = @transform_13, window_bounds = array<i64: 8, 128>}]} {
    %c0 = arith.constant 0 : index
    %c0_0 = arith.constant 0 : index
    %0 = vector.load %arg2[%c0, %c0_0] : memref<8x23xf32, #tpu.memory_space<vmem>>, vector<8x23xf32>
    %c0_1 = arith.constant 0 : index
    %c0_2 = arith.constant 0 : index
    %1 = vector.load %arg5[%c0_1, %c0_2] : memref<23x512xf32, #tpu.memory_space<vmem>>, vector<23x512xf32>
    %cst = arith.constant dense<0.000000e+00> : vector<8x512xf32>
    %2 = tpu.matmul %0, %1, %cst {dimension_numbers = #tpu.dot_dimension_numbers<[1], [0], [0], [1], [0, 0, 1, 1], [], []>} : vector<8x23xf32>, vector<23x512xf32>, vector<8x512xf32> -> vector<8x512xf32>
    %c0_3 = arith.constant 0 : index
    %c0_4 = arith.constant 0 : index
    %3 = vector.load %arg6[%c0_3, %c0_4] : memref<1x512xf32, #tpu.memory_space<vmem>>, vector<1x512xf32>
    %4 = vector.broadcast %3 : vector<1x512xf32> to vector<8x512xf32>
    %5 = arith.addf %2, %4 : vector<8x512xf32>
    %cst_5 = arith.constant 0.000000e+00 : f32
    %6 = vector.broadcast %cst_5 : f32 to vector<8x512xf32>
    %7 = arith.maximumf %5, %6 : vector<8x512xf32>
    %c0_6 = arith.constant 0 : index
    %c0_7 = arith.constant 0 : index
    %8 = vector.load %arg7[%c0_6, %c0_7] : memref<512x512xf32, #tpu.memory_space<vmem>>, vector<512x512xf32>
    %cst_8 = arith.constant dense<0.000000e+00> : vector<8x512xf32>
    %9 = tpu.matmul %7, %8, %cst_8 {dimension_numbers = #tpu.dot_dimension_numbers<[1], [0], [0], [1], [0, 0, 1, 1], [], []>} : vector<8x512xf32>, vector<512x512xf32>, vector<8x512xf32> -> vector<8x512xf32>
    %c0_9 = arith.constant 0 : index
    %c0_10 = arith.constant 0 : index
    %10 = vector.load %arg8[%c0_9, %c0_10] : memref<1x512xf32, #tpu.memory_space<vmem>>, vector<1x512xf32>
    %11 = vector.broadcast %10 : vector<1x512xf32> to vector<8x512xf32>
    %12 = arith.addf %9, %11 : vector<8x512xf32>
    %c0_11 = arith.constant 0 : index
    %c0_12 = arith.constant 0 : index
    %13 = vector.load %arg1[%c0_11, %c0_12] : memref<8x1152xf32, #tpu.memory_space<vmem>>, vector<8x1152xf32>
    %c0_13 = arith.constant 0 : index
    %c0_14 = arith.constant 0 : index
    %14 = vector.load %arg3[%c0_13, %c0_14] : memref<1152x64xf32, #tpu.memory_space<vmem>>, vector<1152x64xf32>
    %cst_15 = arith.constant dense<0.000000e+00> : vector<8x64xf32>
    %15 = tpu.matmul %13, %14, %cst_15 {dimension_numbers = #tpu.dot_dimension_numbers<[1], [0], [0], [1], [0, 0, 1, 1], [], []>} : vector<8x1152xf32>, vector<1152x64xf32>, vector<8x64xf32> -> vector<8x64xf32>
    %c0_16 = arith.constant 0 : index
    %c0_17 = arith.constant 0 : index
    %16 = vector.load %arg4[%c0_16, %c0_17] : memref<1x64xf32, #tpu.memory_space<vmem>>, vector<1x64xf32>
    %17 = vector.broadcast %16 : vector<1x64xf32> to vector<8x64xf32>
    %18 = arith.addf %15, %17 : vector<8x64xf32>
    %cst_18 = arith.constant 0.000000e+00 : f32
    %19 = vector.broadcast %cst_18 : f32 to vector<8x64xf32>
    %20 = arith.maximumf %18, %19 : vector<8x64xf32>
    %c0_19 = arith.constant 0 : index
    %c0_20 = arith.constant 0 : index
    %21 = vector.load %arg9[%c0_19, %c0_20] : memref<64x512xf32, #tpu.memory_space<vmem>>, vector<64x512xf32>
    %cst_21 = arith.constant dense<0.000000e+00> : vector<8x512xf32>
    %22 = tpu.matmul %20, %21, %cst_21 {dimension_numbers = #tpu.dot_dimension_numbers<[1], [0], [0], [1], [0, 0, 1, 1], [], []>} : vector<8x64xf32>, vector<64x512xf32>, vector<8x512xf32> -> vector<8x512xf32>
    %c0_22 = arith.constant 0 : index
    %c0_23 = arith.constant 0 : index
    %23 = vector.load %arg10[%c0_22, %c0_23] : memref<512x512xf32, #tpu.memory_space<vmem>>, vector<512x512xf32>
    %cst_24 = arith.constant dense<0.000000e+00> : vector<8x512xf32>
    %24 = tpu.matmul %12, %23, %cst_24 {dimension_numbers = #tpu.dot_dimension_numbers<[1], [0], [0], [1], [0, 0, 1, 1], [], []>} : vector<8x512xf32>, vector<512x512xf32>, vector<8x512xf32> -> vector<8x512xf32>
    %25 = arith.addf %22, %24 : vector<8x512xf32>
    %c0_25 = arith.constant 0 : index
    %c0_26 = arith.constant 0 : index
    %26 = vector.load %arg11[%c0_25, %c0_26] : memref<1x512xf32, #tpu.memory_space<vmem>>, vector<1x512xf32>
    %27 = vector.broadcast %26 : vector<1x512xf32> to vector<8x512xf32>
    %28 = arith.addf %25, %27 : vector<8x512xf32>
    %cst_27 = arith.constant 0.000000e+00 : f32
    %29 = vector.broadcast %cst_27 : f32 to vector<8x512xf32>
    %30 = arith.maximumf %28, %29 : vector<8x512xf32>
    %c0_28 = arith.constant 0 : index
    %c0_29 = arith.constant 0 : index
    %31 = vector.load %arg12[%c0_28, %c0_29] : memref<512x128xf32, #tpu.memory_space<vmem>>, vector<512x128xf32>
    %cst_30 = arith.constant dense<0.000000e+00> : vector<8x128xf32>
    %32 = tpu.matmul %30, %31, %cst_30 {dimension_numbers = #tpu.dot_dimension_numbers<[1], [0], [0], [1], [0, 0, 1, 1], [], []>} : vector<8x512xf32>, vector<512x128xf32>, vector<8x128xf32> -> vector<8x128xf32>
    %c0_31 = arith.constant 0 : index
    %c0_32 = arith.constant 0 : index
    %33 = vector.load %arg13[%c0_31, %c0_32] : memref<1x128xf32, #tpu.memory_space<vmem>>, vector<1x128xf32>
    %34 = vector.broadcast %33 : vector<1x128xf32> to vector<8x128xf32>
    %35 = arith.addf %32, %34 : vector<8x128xf32>
    %c0_33 = arith.constant 0 : index
    %c0_34 = arith.constant 0 : index
    %36 = vector.load %arg14[%c0_33, %c0_34] : memref<8x128xf32, #tpu.memory_space<vmem>>, vector<8x128xf32>
    tpu.vector_store %arg14[%c0_33, %c0_34], %35 {strides = array<i32>} : memref<8x128xf32, #tpu.memory_space<vmem>>, vector<8x128xf32>,
    return
  }
  func.func @transform_0(%arg0: i32) -> (i32, i32) {
    %c0_i32 = arith.constant 0 : i32
    %c0_i32_0 = arith.constant 0 : i32
    return %arg0, %c0_i32 : i32, i32
  }
  func.func @transform_1(%arg0: i32) -> (i32, i32) {
    %c0_i32 = arith.constant 0 : i32
    %c0_i32_0 = arith.constant 0 : i32
    return %arg0, %c0_i32 : i32, i32
  }
  func.func @transform_2(%arg0: i32) -> (i32, i32) {
    %c0_i32 = arith.constant 0 : i32
    %c0_i32_0 = arith.constant 0 : i32
    %c0_i32_1 = arith.constant 0 : i32
    return %c0_i32, %c0_i32_0 : i32, i32
  }
  func.func @transform_3(%arg0: i32) -> (i32, i32) {
    %c0_i32 = arith.constant 0 : i32
    %c0_i32_0 = arith.constant 0 : i32
    %c0_i32_1 = arith.constant 0 : i32
    return %c0_i32, %c0_i32_0 : i32, i32
  }
  func.func @transform_4(%arg0: i32) -> (i32, i32) {
    %c0_i32 = arith.constant 0 : i32
    %c0_i32_0 = arith.constant 0 : i32
    %c0_i32_1 = arith.constant 0 : i32
    return %c0_i32, %c0_i32_0 : i32, i32
  }
  func.func @transform_5(%arg0: i32) -> (i32, i32) {
    %c0_i32 = arith.constant 0 : i32
    %c0_i32_0 = arith.constant 0 : i32
    %c0_i32_1 = arith.constant 0 : i32
    return %c0_i32, %c0_i32_0 : i32, i32
  }
  func.func @transform_6(%arg0: i32) -> (i32, i32) {
    %c0_i32 = arith.constant 0 : i32
    %c0_i32_0 = arith.constant 0 : i32
    %c0_i32_1 = arith.constant 0 : i32
    return %c0_i32, %c0_i32_0 : i32, i32
  }
  func.func @transform_7(%arg0: i32) -> (i32, i32) {
    %c0_i32 = arith.constant 0 : i32
    %c0_i32_0 = arith.constant 0 : i32
    %c0_i32_1 = arith.constant 0 : i32
    return %c0_i32, %c0_i32_0 : i32, i32
  }
  func.func @transform_8(%arg0: i32) -> (i32, i32) {
    %c0_i32 = arith.constant 0 : i32
    %c0_i32_0 = arith.constant 0 : i32
    %c0_i32_1 = arith.constant 0 : i32
    return %c0_i32, %c0_i32_0 : i32, i32
  }
  func.func @transform_9(%arg0: i32) -> (i32, i32) {
    %c0_i32 = arith.constant 0 : i32
    %c0_i32_0 = arith.constant 0 : i32
    %c0_i32_1 = arith.constant 0 : i32
    return %c0_i32, %c0_i32_0 : i32, i32
  }
  func.func @transform_10(%arg0: i32) -> (i32, i32) {
    %c0_i32 = arith.constant 0 : i32
    %c0_i32_0 = arith.constant 0 : i32
    %c0_i32_1 = arith.constant 0 : i32
    return %c0_i32, %c0_i32_0 : i32, i32
  }
  func.func @transform_11(%arg0: i32) -> (i32, i32) {
    %c0_i32 = arith.constant 0 : i32
    %c0_i32_0 = arith.constant 0 : i32
    %c0_i32_1 = arith.constant 0 : i32
    return %c0_i32, %c0_i32_0 : i32, i32
  }
  func.func @transform_12(%arg0: i32) -> (i32, i32) {
    %c0_i32 = arith.constant 0 : i32
    %c0_i32_0 = arith.constant 0 : i32
    %c0_i32_1 = arith.constant 0 : i32
    return %c0_i32, %c0_i32_0 : i32, i32
  }
  func.func @transform_13(%arg0: i32) -> (i32, i32) {
    %c0_i32 = arith.constant 0 : i32
    %c0_i32_0 = arith.constant 0 : i32
    return %arg0, %c0_i32 : i32, i32
  }
}

</mosaic_0001>

<bundles_post_ra>
// kernel: nature_cnn_forward.3
= control target key start
LH: loop header
LB: loop body
LE: loop exit
PB: predicated region body
PF: predicated region fallthrough
CT: control target
= control target key end

     0   :  { %s1522_s1 = inlined_call_operand.vmem [shape: f32[256,128], index: 1, kind: input, shape index: {}]   ;;  %s1523_s0 = inlined_call_operand.vmem [shape: f32[512,256], index: 0, kind: input, shape index: {}]   ;;  %s1524_s2 = inlined_call_operand.vmem [shape: f32[1,128], index: 2, kind: input, shape index: {}]   ;;  %s1525_s3 = inlined_call_operand.vmem [shape: f32[512,128], index: 3, kind: output, shape index: {}]  }
   0x1   :  { %v157_v0 = vld [vmem:[%s1522_s1 + $0x78] sm:$0xff]  ;;  %v156_v1 = vld [vmem:[%s1522_s1 + $0x70] sm:$0xff]  ;;  %v155_v4 = vld [vmem:[%s1522_s1 + $0x68] sm:$0xff] }
   0x2   :  { %v173_v2 = vld [vmem:[%s1522_s1 + $0xf8] sm:$0xff]  ;;  %728 = vmatpush.msra.mxu2 %v157_v0  ;;  %v172_v3 = vld [vmem:[%s1522_s1 + $0xf0] sm:$0xff]  ;;  %178 = vmatpush.msra.mxu0 %v157_v0  ;;  %v171_v5 = vld [vmem:[%s1522_s1 + $0xe8] sm:$0xff] }
   0x3   :  { %744 = vmatpush.msra.mxu3 %v173_v2  ;;  %387 = vmatpush.msra.mxu1 %v173_v2  ;;  %v154_v6 = vld [vmem:[%s1522_s1 + $0x60] sm:$0xff]  ;;  %v153_v8 = vld [vmem:[%s1522_s1 + $0x58] sm:$0xff]  ;;  %v152_v10 = vld [vmem:[%s1522_s1 + $0x50] sm:$0xff] }
   0x4   :  { %729 = vmatpush.msra.mxu2 %v156_v1  ;;  %179 = vmatpush.msra.mxu0 %v156_v1  ;;  %v170_v7 = vld [vmem:[%s1522_s1 + $0xe0] sm:$0xff]  ;;  %v169_v9 = vld [vmem:[%s1522_s1 + $0xd8] sm:$0xff]  ;;  %v168_v11 = vld [vmem:[%s1522_s1 + $0xd0] sm:$0xff] }
   0x5   :  { %745 = vmatpush.msra.mxu3 %v172_v3  ;;  %388 = vmatpush.msra.mxu1 %v172_v3  ;;  %v151_v12 = vld [vmem:[%s1522_s1 + $0x48] sm:$0xff]  ;;  %v150_v14 = vld [vmem:[%s1522_s1 + $0x40] sm:$0xff]  ;;  %v149_v16 = vld [vmem:[%s1522_s1 + $0x38] sm:$0xff] }
   0x6   :  { %730 = vmatpush.msra.mxu2 %v155_v4  ;;  %180 = vmatpush.msra.mxu0 %v155_v4  ;;  %v167_v13 = vld [vmem:[%s1522_s1 + $0xc8] sm:$0xff]  ;;  %v166_v15 = vld [vmem:[%s1522_s1 + $0xc0] sm:$0xff]  ;;  %v165_v17 = vld [vmem:[%s1522_s1 + $0xb8] sm:$0xff] }
   0x7   :  { %746 = vmatpush.msra.mxu3 %v171_v5  ;;  %389 = vmatpush.msra.mxu1 %v171_v5  ;;  %v148_v18 = vld [vmem:[%s1522_s1 + $0x30] sm:$0xff]  ;;  %v147_v20 = vld [vmem:[%s1522_s1 + $0x28] sm:$0xff]  ;;  %v146_v22 = vld [vmem:[%s1522_s1 + $0x20] sm:$0xff] }
   0x8   :  { %731 = vmatpush.msra.mxu2 %v154_v6  ;;  %181 = vmatpush.msra.mxu0 %v154_v6  ;;  %v164_v19 = vld [vmem:[%s1522_s1 + $0xb0] sm:$0xff]  ;;  %v163_v21 = vld [vmem:[%s1522_s1 + $0xa8] sm:$0xff]  ;;  %v162_v23 = vld [vmem:[%s1522_s1 + $0xa0] sm:$0xff] }
   0x9   :  { %747 = vmatpush.msra.mxu3 %v170_v7  ;;  %390 = vmatpush.msra.mxu1 %v170_v7  ;;  %v145_v24 = vld [vmem:[%s1522_s1 + $0x18] sm:$0xff]  ;;  %v144_v26 = vld [vmem:[%s1522_s1 + $0x10] sm:$0xff]  ;;  %v143_v28 = vld [vmem:[%s1522_s1 + $0x8] sm:$0xff] }
   0xa   :  { %732 = vmatpush.msra.mxu2 %v153_v8  ;;  %182 = vmatpush.msra.mxu0 %v153_v8  ;;  %v161_v25 = vld [vmem:[%s1522_s1 + $0x98] sm:$0xff]  ;;  %v160_v27 = vld [vmem:[%s1522_s1 + $0x90] sm:$0xff]  ;;  %v159_v29 = vld [vmem:[%s1522_s1 + $0x88] sm:$0xff] }
   0xb   :  { %748 = vmatpush.msra.mxu3 %v169_v9  ;;  %391 = vmatpush.msra.mxu1 %v169_v9  ;;  %v142_v30 = vld [vmem:[%s1522_s1] sm:$0xff]  ;;  %v79_v33 = vld [vmem:[%s1523_s0 + $0x208] sm:$0xff]  ;;  %v80_v36 = vld [vmem:[%s1523_s0 + $0x210] sm:$0xff] }
   0xc   :  { %733 = vmatpush.msra.mxu2 %v152_v10  ;;  %183 = vmatpush.msra.mxu0 %v152_v10  ;;  %v158_v31 = vld [vmem:[%s1522_s1 + $0x80] sm:$0xff]  ;;  %v15_v35 = vld [vmem:[%s1523_s0 + $0x8] sm:$0xff]  ;;  %v81_v37 = vld [vmem:[%s1523_s0 + $0x218] sm:$0xff] }
   0xd   :  { %749 = vmatpush.msra.mxu3 %v168_v11  ;;  %392 = vmatpush.msra.mxu1 %v168_v11  ;;  %v78_v32 = vld [vmem:[%s1523_s0 + $0x200] sm:$0xff]  ;;  %v16_v38 = vld [vmem:[%s1523_s0 + $0x10] sm:$0xff]  ;;  %v17_v39 = vld [vmem:[%s1523_s0 + $0x18] sm:$0xff] }
   0xe   :  { %734 = vmatpush.msra.mxu2 %v151_v12  ;;  %184 = vmatpush.msra.mxu0 %v151_v12  ;;  %v14_v34 = vld [vmem:[%s1523_s0] sm:$0xff]  ;;  %v83_v41 = vld [vmem:[%s1523_s0 + $0x228] sm:$0xff]  ;;  %v84_v44 = vld [vmem:[%s1523_s0 + $0x230] sm:$0xff] }
   0xf   :  { %750 = vmatpush.msra.mxu3 %v167_v13  ;;  %393 = vmatpush.msra.mxu1 %v167_v13  ;;  %v82_v40 = vld [vmem:[%s1523_s0 + $0x220] sm:$0xff]  ;;  %v19_v43 = vld [vmem:[%s1523_s0 + $0x28] sm:$0xff]  ;;  %v85_v45 = vld [vmem:[%s1523_s0 + $0x238] sm:$0xff] }
  0x10   :  { %735 = vmatpush.msra.mxu2 %v150_v14  ;;  %185 = vmatpush.msra.mxu0 %v150_v14  ;;  %v18_v42 = vld [vmem:[%s1523_s0 + $0x20] sm:$0xff]  ;;  %v20_v46 = vld [vmem:[%s1523_s0 + $0x30] sm:$0xff]  ;;  %v21_v47 = vld [vmem:[%s1523_s0 + $0x38] sm:$0xff] }
  0x11   :  { %751 = vmatpush.msra.mxu3 %v166_v15  ;;  %394 = vmatpush.msra.mxu1 %v166_v15  ;;  %v86_v48 = vld [vmem:[%s1523_s0 + $0x240] sm:$0xff]  ;;  %v87_v49 = vld [vmem:[%s1523_s0 + $0x248] sm:$0xff]  ;;  %v88_v52 = vld [vmem:[%s1523_s0 + $0x250] sm:$0xff] }
  0x12   :  { %736 = vmatpush.msra.mxu2 %v149_v16  ;;  %186 = vmatpush.msra.mxu0 %v149_v16  ;;  %v22_v50 = vld [vmem:[%s1523_s0 + $0x40] sm:$0xff]  ;;  %v23_v51 = vld [vmem:[%s1523_s0 + $0x48] sm:$0xff]  ;;  %v89_v53 = vld [vmem:[%s1523_s0 + $0x258] sm:$0xff] }
  0x13   :  { %752 = vmatpush.msra.mxu3 %v165_v17  ;;  %395 = vmatpush.msra.mxu1 %v165_v17  ;;  %v24_v54 = vld [vmem:[%s1523_s0 + $0x50] sm:$0xff]  ;;  %v25_v55 = vld [vmem:[%s1523_s0 + $0x58] sm:$0xff]  ;;  %v90_v56 = vld [vmem:[%s1523_s0 + $0x260] sm:$0xff] }
  0x14   :  { %737 = vmatpush.msra.mxu2 %v148_v18  ;;  %187 = vmatpush.msra.mxu0 %v148_v18  ;;  %v91_v57 = vld [vmem:[%s1523_s0 + $0x268] sm:$0xff]  ;;  %v26_v58 = vld [vmem:[%s1523_s0 + $0x60] sm:$0xff]  ;;  %v92_v60 = vld [vmem:[%s1523_s0 + $0x270] sm:$0xff] }
  0x15   :  { %753 = vmatpush.msra.mxu3 %v164_v19  ;;  %396 = vmatpush.msra.mxu1 %v164_v19  ;;  %v27_v59 = vld [vmem:[%s1523_s0 + $0x68] sm:$0xff]  ;;  %v93_v61 = vld [vmem:[%s1523_s0 + $0x278] sm:$0xff]  ;;  %v28_v62 = vld [vmem:[%s1523_s0 + $0x70] sm:$0xff] }
  0x16   :  { %738 = vmatpush.msra.mxu2 %v147_v20  ;;  %188 = vmatpush.msra.mxu0 %v147_v20  ;;  %v29_v63 = vld [vmem:[%s1523_s0 + $0x78] sm:$0xff]  ;;  %v94_v0 = vld [vmem:[%s1523_s0 + $0x280] sm:$0xff]  ;;  %v95_v1 = vld [vmem:[%s1523_s0 + $0x288] sm:$0xff] }
  0x17   :  { %754 = vmatpush.msra.mxu3 %v163_v21  ;;  %397 = vmatpush.msra.mxu1 %v163_v21  ;;  %v30_v2 = vld [vmem:[%s1523_s0 + $0x80] sm:$0xff]  ;;  %v31_v3 = vld [vmem:[%s1523_s0 + $0x88] sm:$0xff]  ;;  %v96_v4 = vld [vmem:[%s1523_s0 + $0x290] sm:$0xff] }
  0x18   :  { %739 = vmatpush.msra.mxu2 %v146_v22  ;;  %189 = vmatpush.msra.mxu0 %v146_v22  ;;  %v97_v5 = vld [vmem:[%s1523_s0 + $0x298] sm:$0xff]  ;;  %v32_v6 = vld [vmem:[%s1523_s0 + $0x90] sm:$0xff]  ;;  %v98_v8 = vld [vmem:[%s1523_s0 + $0x2a0] sm:$0xff] }
  0x19   :  { %755 = vmatpush.msra.mxu3 %v162_v23  ;;  %398 = vmatpush.msra.mxu1 %v162_v23  ;;  %v33_v7 = vld [vmem:[%s1523_s0 + $0x98] sm:$0xff]  ;;  %v99_v9 = vld [vmem:[%s1523_s0 + $0x2a8] sm:$0xff]  ;;  %v34_v10 = vld [vmem:[%s1523_s0 + $0xa0] sm:$0xff] }
  0x1a   :  { %740 = vmatpush.msra.mxu2 %v145_v24  ;;  %190 = vmatpush.msra.mxu0 %v145_v24  ;;  %v35_v11 = vld [vmem:[%s1523_s0 + $0xa8] sm:$0xff]  ;;  %v100_v12 = vld [vmem:[%s1523_s0 + $0x2b0] sm:$0xff]  ;;  %v101_v13 = vld [vmem:[%s1523_s0 + $0x2b8] sm:$0xff] }
  0x1b   :  { %756 = vmatpush.msra.mxu3 %v161_v25  ;;  %399 = vmatpush.msra.mxu1 %v161_v25  ;;  %v36_v14 = vld [vmem:[%s1523_s0 + $0xb0] sm:$0xff]  ;;  %v37_v15 = vld [vmem:[%s1523_s0 + $0xb8] sm:$0xff]  ;;  %v102_v16 = vld [vmem:[%s1523_s0 + $0x2c0] sm:$0xff] }
  0x1c   :  { %741 = vmatpush.msra.mxu2 %v144_v26  ;;  %191 = vmatpush.msra.mxu0 %v144_v26  ;;  %v103_v17 = vld [vmem:[%s1523_s0 + $0x2c8] sm:$0xff]  ;;  %v38_v18 = vld [vmem:[%s1523_s0 + $0xc0] sm:$0xff]  ;;  %v104_v20 = vld [vmem:[%s1523_s0 + $0x2d0] sm:$0xff] }
  0x1d   :  { %757 = vmatpush.msra.mxu3 %v160_v27  ;;  %400 = vmatpush.msra.mxu1 %v160_v27  ;;  %v39_v19 = vld [vmem:[%s1523_s0 + $0xc8] sm:$0xff]  ;;  %v105_v21 = vld [vmem:[%s1523_s0 + $0x2d8] sm:$0xff]  ;;  %v40_v22 = vld [vmem:[%s1523_s0 + $0xd0] sm:$0xff] }
  0x1e   :  { %742 = vmatpush.msra.mxu2 %v143_v28  ;;  %192 = vmatpush.msra.mxu0 %v143_v28  ;;  %v41_v23 = vld [vmem:[%s1523_s0 + $0xd8] sm:$0xff]  ;;  %v106_v24 = vld [vmem:[%s1523_s0 + $0x2e0] sm:$0xff]  ;;  %v107_v25 = vld [vmem:[%s1523_s0 + $0x2e8] sm:$0xff] }
  0x1f   :  { %758 = vmatpush.msra.mxu3 %v159_v29  ;;  %401 = vmatpush.msra.mxu1 %v159_v29  ;;  %v42_v26 = vld [vmem:[%s1523_s0 + $0xe0] sm:$0xff]  ;;  %v43_v27 = vld [vmem:[%s1523_s0 + $0xe8] sm:$0xff]  ;;  %v108_v28 = vld [vmem:[%s1523_s0 + $0x2f0] sm:$0xff] }
  0x20   :  { %743 = vmatpush.msra.mxu2 %v142_v30  ;;  %193 = vmatpush.msra.mxu0 %v142_v30  ;;  %v109_v29 = vld [vmem:[%s1523_s0 + $0x2f8] sm:$0xff]  ;;  %v44_v30 = vld [vmem:[%s1523_s0 + $0xf0] sm:$0xff] }
  0x21   :  { %759 = vmatpush.msra.mxu3 %v158_v31  ;;  %290 = vmatmul.f32.vlgmr.msra.gmra.mxu2 %v78_v32  ;;  %v1072_v32 = vld [vmem:[%s1524_s2] ss:$0 sm:$0xff] }
  0x22   :  { %499 = vmatmul.f32.vlgmr.msra.gmra.mxu3 %v79_v33  ;;  %402 = vmatpush.msra.mxu1 %v158_v31  ;;  %v45_v31 = vld [vmem:[%s1523_s0 + $0xf8] sm:$0xff]  ;;  %v110_v33 = vld [vmem:[%s1523_s0 + $0x300] sm:$0xff] }
  0x23   :  { %194 = vmatmul.f32.vlgmr.msra.gmra.mxu0 %v14_v34  ;;  %403 = vmatmul.f32.vlgmr.msra.gmra.mxu1 %v15_v35  ;;  %v111_v34 = vld [vmem:[%s1523_s0 + $0x308] sm:$0xff] }
  0x29   :  { %293 = vmatmul.f32.gmra.mxu2 %v80_v36 }
  0x2a   :  { %502 = vmatmul.f32.gmra.mxu3 %v81_v37  ;;  %v46_v37 = vld [vmem:[%s1523_s0 + $0x100] sm:$0xff] }
  0x2b   :  { %197 = vmatmul.f32.gmra.mxu0 %v16_v38  ;;  %406 = vmatmul.f32.gmra.mxu1 %v17_v39  ;;  %v47_v38 = vld [vmem:[%s1523_s0 + $0x108] sm:$0xff] }
  0x31   :  { %296 = vmatmul.f32.gmra.mxu2 %v82_v40 }
  0x32   :  { %505 = vmatmul.f32.gmra.mxu3 %v83_v41 }
  0x33   :  { %200 = vmatmul.f32.gmra.mxu0 %v18_v42  ;;  %409 = vmatmul.f32.gmra.mxu1 %v19_v43 }
  0x39   :  { %299 = vmatmul.f32.gmra.mxu2 %v84_v44 }
  0x3a   :  { %508 = vmatmul.f32.gmra.mxu3 %v85_v45  ;;  %v112_v45 = vld [vmem:[%s1523_s0 + $0x310] sm:$0xff] }
  0x3b   :  { %203 = vmatmul.f32.gmra.mxu0 %v20_v46  ;;  %412 = vmatmul.f32.gmra.mxu1 %v21_v47  ;;  %v113_v46 = vld [vmem:[%s1523_s0 + $0x318] sm:$0xff] }
  0x41   :  { %302 = vmatmul.f32.gmra.mxu2 %v86_v48 }
  0x42   :  { %511 = vmatmul.f32.gmra.mxu3 %v87_v49 }
  0x43   :  { %206 = vmatmul.f32.gmra.mxu0 %v22_v50  ;;  %415 = vmatmul.f32.gmra.mxu1 %v23_v51  ;;  %v48_v50 = vld [vmem:[%s1523_s0 + $0x110] sm:$0xff]  ;;  %v49_v51 = vld [vmem:[%s1523_s0 + $0x118] sm:$0xff] }
  0x49   :  { %305 = vmatmul.f32.gmra.mxu2 %v88_v52 }
  0x4a   :  { %514 = vmatmul.f32.gmra.mxu3 %v89_v53 }
  0x4b   :  { %209 = vmatmul.f32.gmra.mxu0 %v24_v54  ;;  %418 = vmatmul.f32.gmra.mxu1 %v25_v55 }
  0x51   :  { %308 = vmatmul.f32.gmra.mxu2 %v90_v56 }
  0x52   :  { %517 = vmatmul.f32.gmra.mxu3 %v91_v57 }
  0x53   :  { %212 = vmatmul.f32.gmra.mxu0 %v26_v58  ;;  %421 = vmatmul.f32.gmra.mxu1 %v27_v59  ;;  %v114_v59 = vld [vmem:[%s1523_s0 + $0x320] sm:$0xff] }
  0x59   :  { %311 = vmatmul.f32.gmra.mxu2 %v92_v60  ;;  %v115_v60 = vld [vmem:[%s1523_s0 + $0x328] sm:$0xff] }
  0x5a   :  { %520 = vmatmul.f32.gmra.mxu3 %v93_v61 }
  0x5b   :  { %215 = vmatmul.f32.gmra.mxu0 %v28_v62  ;;  %424 = vmatmul.f32.gmra.mxu1 %v29_v63 }
  0x61   :  { %314 = vmatmul.f32.gmra.mxu2 %v94_v0  ;;  %v50_v0 = vld [vmem:[%s1523_s0 + $0x120] sm:$0xff] }
  0x62   :  { %523 = vmatmul.f32.gmra.mxu3 %v95_v1  ;;  %v51_v1 = vld [vmem:[%s1523_s0 + $0x128] sm:$0xff] }
  0x63   :  { %218 = vmatmul.f32.gmra.mxu0 %v30_v2  ;;  %427 = vmatmul.f32.gmra.mxu1 %v31_v3 }
  0x69   :  { %317 = vmatmul.f32.gmra.mxu2 %v96_v4 }
  0x6a   :  { %526 = vmatmul.f32.gmra.mxu3 %v97_v5 }
  0x6b   :  { %221 = vmatmul.f32.gmra.mxu0 %v32_v6  ;;  %430 = vmatmul.f32.gmra.mxu1 %v33_v7 }
  0x71   :  { %320 = vmatmul.f32.gmra.mxu2 %v98_v8 }
  0x72   :  { %529 = vmatmul.f32.gmra.mxu3 %v99_v9  ;;  %v116_v9 = vld [vmem:[%s1523_s0 + $0x330] sm:$0xff] }
  0x73   :  { %224 = vmatmul.f32.gmra.mxu0 %v34_v10  ;;  %433 = vmatmul.f32.gmra.mxu1 %v35_v11  ;;  %v117_v10 = vld [vmem:[%s1523_s0 + $0x338] sm:$0xff] }
  0x79   :  { %323 = vmatmul.f32.gmra.mxu2 %v100_v12 }
  0x7a   :  { %532 = vmatmul.f32.gmra.mxu3 %v101_v13 }
  0x7b   :  { %227 = vmatmul.f32.gmra.mxu0 %v36_v14  ;;  %436 = vmatmul.f32.gmra.mxu1 %v37_v15  ;;  %v52_v14 = vld [vmem:[%s1523_s0 + $0x130] sm:$0xff]  ;;  %v53_v15 = vld [vmem:[%s1523_s0 + $0x138] sm:$0xff] }
  0x81   :  { %326 = vmatmul.f32.gmra.mxu2 %v102_v16 }
  0x82   :  { %535 = vmatmul.f32.gmra.mxu3 %v103_v17 }
  0x83   :  { %230 = vmatmul.f32.gmra.mxu0 %v38_v18  ;;  %439 = vmatmul.f32.gmra.mxu1 %v39_v19 }
  0x89   :  { %329 = vmatmul.f32.gmra.mxu2 %v104_v20 }
  0x8a   :  { %538 = vmatmul.f32.gmra.mxu3 %v105_v21 }
  0x8b   :  { %233 = vmatmul.f32.gmra.mxu0 %v40_v22  ;;  %442 = vmatmul.f32.gmra.mxu1 %v41_v23  ;;  %v118_v23 = vld [vmem:[%s1523_s0 + $0x340] sm:$0xff] }
  0x91   :  { %332 = vmatmul.f32.gmra.mxu2 %v106_v24  ;;  %v119_v24 = vld [vmem:[%s1523_s0 + $0x348] sm:$0xff] }
  0x92   :  { %541 = vmatmul.f32.gmra.mxu3 %v107_v25 }
  0x93   :  { %236 = vmatmul.f32.gmra.mxu0 %v42_v26  ;;  %445 = vmatmul.f32.gmra.mxu1 %v43_v27 }
  0x99   :  { %335 = vmatmul.f32.gmra.mxu2 %v108_v28  ;;  %v54_v28 = vld [vmem:[%s1523_s0 + $0x140] sm:$0xff] }
  0x9a   :  { %544 = vmatmul.f32.gmra.mxu3 %v109_v29  ;;  %v55_v29 = vld [vmem:[%s1523_s0 + $0x148] sm:$0xff] }
  0x9b   :  { %239 = vmatmul.f32.gmra.mxu0 %v44_v30  ;;  %448 = vmatmul.f32.gmra.mxu1 %v45_v31 }
  0xa0   :  { %v195_v35 = vpop.f32.mrf.mxu0  ;;  %v404_v36 = vpop.f32.mrf.mxu1 }
  0xa1   :  { %338 = vmatmul.f32.gmra.mxu2 %v110_v33  ;;  %v196_v39 = vadd.f32 %v1072_v32, %v195_v35 }
  0xa2   :  { %547 = vmatmul.f32.gmra.mxu3 %v111_v34 }
  0xa3   :  { %v405_v40 = vadd.f32 %v404_v36, %v196_v39  ;;  %242 = vmatmul.f32.gmra.mxu0 %v46_v37  ;;  %451 = vmatmul.f32.gmra.mxu1 %v47_v38  ;;  %v120_v38 = vld [vmem:[%s1523_s0 + $0x350] sm:$0xff]  ;;  %v121_v39 = vld [vmem:[%s1523_s0 + $0x358] sm:$0xff] }
  0xa4   :  { %v291_v41 = vpop.f32.mrf.mxu2 }
  0xa5   :  { %v500_v42 = vpop.f32.mrf.mxu3  ;;  %v292_v43 = vadd.f32 %v1072_v32, %v291_v41  ;;  %v596_v44 = vmax.f32 %v405_v40, 0.0 }
  0xa7   :  { %660 = vst [vmem:[%s1525_s3] sm:$0xff] %v596_v44  ;;  %v501_v47 = vadd.f32 %v500_v42, %v292_v43  ;;  %v56_v43 = vld [vmem:[%s1523_s0 + $0x150] sm:$0xff]  ;;  %v57_v44 = vld [vmem:[%s1523_s0 + $0x158] sm:$0xff] }
  0xa8   :  { %v198_v48 = vpop.f32.mrf.mxu0  ;;  %v407_v49 = vpop.f32.mrf.mxu1 }
  0xa9   :  { %v628_v52 = vmax.f32 %v501_v47, 0.0  ;;  %341 = vmatmul.f32.gmra.mxu2 %v112_v45  ;;  %v199_v53 = vadd.f32 %v1072_v32, %v198_v48 }
  0xaa   :  { %550 = vmatmul.f32.gmra.mxu3 %v113_v46 }
  0xab   :  { %692 = vst [vmem:[%s1525_s3 + $0x100] sm:$0xff] %v628_v52  ;;  %v408_v54 = vadd.f32 %v407_v49, %v199_v53  ;;  %245 = vmatmul.f32.gmra.mxu0 %v48_v50  ;;  %454 = vmatmul.f32.gmra.mxu1 %v49_v51  ;;  %v122_v52 = vld [vmem:[%s1523_s0 + $0x360] sm:$0xff]  ;;  %v123_v53 = vld [vmem:[%s1523_s0 + $0x368] sm:$0xff] }
  0xac   :  { %v294_v55 = vpop.f32.mrf.mxu2 }
  0xad   :  { %v503_v56 = vpop.f32.mrf.mxu3  ;;  %v295_v57 = vadd.f32 %v1072_v32, %v294_v55  ;;  %v597_v58 = vmax.f32 %v408_v54, 0.0 }
  0xaf   :  { %661 = vst [vmem:[%s1525_s3 + $0x8] sm:$0xff] %v597_v58  ;;  %v504_v61 = vadd.f32 %v503_v56, %v295_v57  ;;  %v58_v57 = vld [vmem:[%s1523_s0 + $0x160] sm:$0xff]  ;;  %v59_v58 = vld [vmem:[%s1523_s0 + $0x168] sm:$0xff] }
  0xb0   :  { %v201_v62 = vpop.f32.mrf.mxu0  ;;  %v410_v63 = vpop.f32.mrf.mxu1 }
  0xb1   :  { %v629_v2 = vmax.f32 %v504_v61, 0.0  ;;  %344 = vmatmul.f32.gmra.mxu2 %v114_v59  ;;  %v202_v3 = vadd.f32 %v1072_v32, %v201_v62 }
  0xb2   :  { %553 = vmatmul.f32.gmra.mxu3 %v115_v60 }
  0xb3   :  { %693 = vst [vmem:[%s1525_s3 + $0x108] sm:$0xff] %v629_v2  ;;  %v411_v4 = vadd.f32 %v410_v63, %v202_v3  ;;  %248 = vmatmul.f32.gmra.mxu0 %v50_v0  ;;  %457 = vmatmul.f32.gmra.mxu1 %v51_v1  ;;  %v124_v2 = vld [vmem:[%s1523_s0 + $0x370] sm:$0xff]  ;;  %v125_v3 = vld [vmem:[%s1523_s0 + $0x378] sm:$0xff] }
  0xb4   :  { %v297_v5 = vpop.f32.mrf.mxu2 }
  0xb5   :  { %v506_v6 = vpop.f32.mrf.mxu3  ;;  %v298_v7 = vadd.f32 %v1072_v32, %v297_v5  ;;  %v598_v8 = vmax.f32 %v411_v4, 0.0 }
  0xb7   :  { %662 = vst [vmem:[%s1525_s3 + $0x10] sm:$0xff] %v598_v8  ;;  %v507_v11 = vadd.f32 %v506_v6, %v298_v7  ;;  %v60_v7 = vld [vmem:[%s1523_s0 + $0x170] sm:$0xff]  ;;  %v61_v8 = vld [vmem:[%s1523_s0 + $0x178] sm:$0xff] }
  0xb8   :  { %v204_v12 = vpop.f32.mrf.mxu0  ;;  %v413_v13 = vpop.f32.mrf.mxu1 }
  0xb9   :  { %v630_v16 = vmax.f32 %v507_v11, 0.0  ;;  %347 = vmatmul.f32.gmra.mxu2 %v116_v9  ;;  %v205_v17 = vadd.f32 %v1072_v32, %v204_v12 }
  0xba   :  { %556 = vmatmul.f32.gmra.mxu3 %v117_v10 }
  0xbb   :  { %694 = vst [vmem:[%s1525_s3 + $0x110] sm:$0xff] %v630_v16  ;;  %v414_v18 = vadd.f32 %v413_v13, %v205_v17  ;;  %251 = vmatmul.f32.gmra.mxu0 %v52_v14  ;;  %460 = vmatmul.f32.gmra.mxu1 %v53_v15  ;;  %v126_v16 = vld [vmem:[%s1523_s0 + $0x380] sm:$0xff]  ;;  %v127_v17 = vld [vmem:[%s1523_s0 + $0x388] sm:$0xff] }
  0xbc   :  { %v300_v19 = vpop.f32.mrf.mxu2 }
  0xbd   :  { %v509_v20 = vpop.f32.mrf.mxu3  ;;  %v301_v21 = vadd.f32 %v1072_v32, %v300_v19  ;;  %v599_v22 = vmax.f32 %v414_v18, 0.0 }
  0xbf   :  { %663 = vst [vmem:[%s1525_s3 + $0x18] sm:$0xff] %v599_v22  ;;  %v510_v25 = vadd.f32 %v509_v20, %v301_v21  ;;  %v62_v21 = vld [vmem:[%s1523_s0 + $0x180] sm:$0xff]  ;;  %v63_v22 = vld [vmem:[%s1523_s0 + $0x188] sm:$0xff] }
  0xc0   :  { %v207_v26 = vpop.f32.mrf.mxu0  ;;  %v416_v27 = vpop.f32.mrf.mxu1 }
  0xc1   :  { %v631_v30 = vmax.f32 %v510_v25, 0.0  ;;  %350 = vmatmul.f32.gmra.mxu2 %v118_v23  ;;  %v208_v31 = vadd.f32 %v1072_v32, %v207_v26 }
  0xc2   :  { %559 = vmatmul.f32.gmra.mxu3 %v119_v24 }
  0xc3   :  { %695 = vst [vmem:[%s1525_s3 + $0x118] sm:$0xff] %v631_v30  ;;  %v417_v33 = vadd.f32 %v416_v27, %v208_v31  ;;  %254 = vmatmul.f32.gmra.mxu0 %v54_v28  ;;  %463 = vmatmul.f32.gmra.mxu1 %v55_v29  ;;  %v128_v30 = vld [vmem:[%s1523_s0 + $0x390] sm:$0xff]  ;;  %v129_v31 = vld [vmem:[%s1523_s0 + $0x398] sm:$0xff] }
  0xc4   :  { %v303_v34 = vpop.f32.mrf.mxu2 }
  0xc5   :  { %v512_v35 = vpop.f32.mrf.mxu3  ;;  %v304_v36 = vadd.f32 %v1072_v32, %v303_v34  ;;  %v600_v37 = vmax.f32 %v417_v33, 0.0 }
  0xc7   :  { %664 = vst [vmem:[%s1525_s3 + $0x20] sm:$0xff] %v600_v37  ;;  %v513_v40 = vadd.f32 %v512_v35, %v304_v36  ;;  %v64_v36 = vld [vmem:[%s1523_s0 + $0x190] sm:$0xff]  ;;  %v65_v37 = vld [vmem:[%s1523_s0 + $0x198] sm:$0xff] }
  0xc8   :  { %v210_v41 = vpop.f32.mrf.mxu0  ;;  %v419_v42 = vpop.f32.mrf.mxu1 }
  0xc9   :  { %v632_v45 = vmax.f32 %v513_v40, 0.0  ;;  %353 = vmatmul.f32.gmra.mxu2 %v120_v38  ;;  %v211_v46 = vadd.f32 %v1072_v32, %v210_v41 }
  0xca   :  { %562 = vmatmul.f32.gmra.mxu3 %v121_v39 }
  0xcb   :  { %696 = vst [vmem:[%s1525_s3 + $0x120] sm:$0xff] %v632_v45  ;;  %v420_v47 = vadd.f32 %v419_v42, %v211_v46  ;;  %257 = vmatmul.f32.gmra.mxu0 %v56_v43  ;;  %466 = vmatmul.f32.gmra.mxu1 %v57_v44  ;;  %v130_v45 = vld [vmem:[%s1523_s0 + $0x3a0] sm:$0xff]  ;;  %v131_v46 = vld [vmem:[%s1523_s0 + $0x3a8] sm:$0xff] }
  0xcc   :  { %v306_v48 = vpop.f32.mrf.mxu2 }
  0xcd   :  { %v515_v49 = vpop.f32.mrf.mxu3  ;;  %v307_v50 = vadd.f32 %v1072_v32, %v306_v48  ;;  %v601_v51 = vmax.f32 %v420_v47, 0.0 }
  0xcf   :  { %665 = vst [vmem:[%s1525_s3 + $0x28] sm:$0xff] %v601_v51  ;;  %v516_v54 = vadd.f32 %v515_v49, %v307_v50  ;;  %v66_v50 = vld [vmem:[%s1523_s0 + $0x1a0] sm:$0xff]  ;;  %v67_v51 = vld [vmem:[%s1523_s0 + $0x1a8] sm:$0xff] }
  0xd0   :  { %v213_v55 = vpop.f32.mrf.mxu0  ;;  %v422_v56 = vpop.f32.mrf.mxu1 }
  0xd1   :  { %v633_v59 = vmax.f32 %v516_v54, 0.0  ;;  %356 = vmatmul.f32.gmra.mxu2 %v122_v52  ;;  %v214_v60 = vadd.f32 %v1072_v32, %v213_v55 }
  0xd2   :  { %565 = vmatmul.f32.gmra.mxu3 %v123_v53 }
  0xd3   :  { %697 = vst [vmem:[%s1525_s3 + $0x128] sm:$0xff] %v633_v59  ;;  %v423_v61 = vadd.f32 %v422_v56, %v214_v60  ;;  %260 = vmatmul.f32.gmra.mxu0 %v58_v57  ;;  %469 = vmatmul.f32.gmra.mxu1 %v59_v58  ;;  %v132_v59 = vld [vmem:[%s1523_s0 + $0x3b0] sm:$0xff]  ;;  %v133_v60 = vld [vmem:[%s1523_s0 + $0x3b8] sm:$0xff] }
  0xd4   :  { %v309_v62 = vpop.f32.mrf.mxu2 }
  0xd5   :  { %v518_v63 = vpop.f32.mrf.mxu3  ;;  %v310_v0 = vadd.f32 %v1072_v32, %v309_v62  ;;  %v602_v1 = vmax.f32 %v423_v61, 0.0 }
  0xd7   :  { %666 = vst [vmem:[%s1525_s3 + $0x30] sm:$0xff] %v602_v1  ;;  %v519_v4 = vadd.f32 %v518_v63, %v310_v0  ;;  %v68_v0 = vld [vmem:[%s1523_s0 + $0x1b0] sm:$0xff]  ;;  %v69_v1 = vld [vmem:[%s1523_s0 + $0x1b8] sm:$0xff] }
  0xd8   :  { %v216_v5 = vpop.f32.mrf.mxu0  ;;  %v425_v6 = vpop.f32.mrf.mxu1 }
  0xd9   :  { %v634_v9 = vmax.f32 %v519_v4, 0.0  ;;  %359 = vmatmul.f32.gmra.mxu2 %v124_v2  ;;  %v217_v10 = vadd.f32 %v1072_v32, %v216_v5 }
  0xda   :  { %568 = vmatmul.f32.gmra.mxu3 %v125_v3 }
  0xdb   :  { %698 = vst [vmem:[%s1525_s3 + $0x130] sm:$0xff] %v634_v9  ;;  %v426_v11 = vadd.f32 %v425_v6, %v217_v10  ;;  %263 = vmatmul.f32.gmra.mxu0 %v60_v7  ;;  %472 = vmatmul.f32.gmra.mxu1 %v61_v8  ;;  %v134_v9 = vld [vmem:[%s1523_s0 + $0x3c0] sm:$0xff]  ;;  %v135_v10 = vld [vmem:[%s1523_s0 + $0x3c8] sm:$0xff] }
  0xdc   :  { %v312_v12 = vpop.f32.mrf.mxu2 }
  0xdd   :  { %v521_v13 = vpop.f32.mrf.mxu3  ;;  %v313_v14 = vadd.f32 %v1072_v32, %v312_v12  ;;  %v603_v15 = vmax.f32 %v426_v11, 0.0 }
  0xdf   :  { %667 = vst [vmem:[%s1525_s3 + $0x38] sm:$0xff] %v603_v15  ;;  %v522_v18 = vadd.f32 %v521_v13, %v313_v14  ;;  %v70_v14 = vld [vmem:[%s1523_s0 + $0x1c0] sm:$0xff]  ;;  %v71_v15 = vld [vmem:[%s1523_s0 + $0x1c8] sm:$0xff] }
  0xe0   :  { %v219_v19 = vpop.f32.mrf.mxu0  ;;  %v428_v20 = vpop.f32.mrf.mxu1 }
  0xe1   :  { %v635_v23 = vmax.f32 %v522_v18, 0.0  ;;  %362 = vmatmul.f32.gmra.mxu2 %v126_v16  ;;  %v220_v24 = vadd.f32 %v1072_v32, %v219_v19 }
  0xe2   :  { %571 = vmatmul.f32.gmra.mxu3 %v127_v17 }
  0xe3   :  { %699 = vst [vmem:[%s1525_s3 + $0x138] sm:$0xff] %v635_v23  ;;  %v429_v25 = vadd.f32 %v428_v20, %v220_v24  ;;  %266 = vmatmul.f32.gmra.mxu0 %v62_v21  ;;  %475 = vmatmul.f32.gmra.mxu1 %v63_v22  ;;  %v136_v23 = vld [vmem:[%s1523_s0 + $0x3d0] sm:$0xff]  ;;  %v137_v24 = vld [vmem:[%s1523_s0 + $0x3d8] sm:$0xff] }
  0xe4   :  { %v315_v26 = vpop.f32.mrf.mxu2 }
  0xe5   :  { %v524_v27 = vpop.f32.mrf.mxu3  ;;  %v316_v28 = vadd.f32 %v1072_v32, %v315_v26  ;;  %v604_v29 = vmax.f32 %v429_v25, 0.0 }
  0xe7   :  { %668 = vst [vmem:[%s1525_s3 + $0x40] sm:$0xff] %v604_v29  ;;  %v525_v33 = vadd.f32 %v524_v27, %v316_v28  ;;  %v72_v28 = vld [vmem:[%s1523_s0 + $0x1d0] sm:$0xff]  ;;  %v73_v29 = vld [vmem:[%s1523_s0 + $0x1d8] sm:$0xff] }
  0xe8   :  { %v222_v34 = vpop.f32.mrf.mxu0  ;;  %v431_v35 = vpop.f32.mrf.mxu1 }
  0xe9   :  { %v636_v38 = vmax.f32 %v525_v33, 0.0  ;;  %365 = vmatmul.f32.gmra.mxu2 %v128_v30  ;;  %v223_v39 = vadd.f32 %v1072_v32, %v222_v34 }
  0xea   :  { %574 = vmatmul.f32.gmra.mxu3 %v129_v31 }
  0xeb   :  { %700 = vst [vmem:[%s1525_s3 + $0x140] sm:$0xff] %v636_v38  ;;  %v432_v40 = vadd.f32 %v431_v35, %v223_v39  ;;  %269 = vmatmul.f32.gmra.mxu0 %v64_v36  ;;  %478 = vmatmul.f32.gmra.mxu1 %v65_v37  ;;  %v138_v38 = vld [vmem:[%s1523_s0 + $0x3e0] sm:$0xff]  ;;  %v139_v39 = vld [vmem:[%s1523_s0 + $0x3e8] sm:$0xff] }
  0xec   :  { %v318_v41 = vpop.f32.mrf.mxu2 }
  0xed   :  { %v527_v42 = vpop.f32.mrf.mxu3  ;;  %v319_v43 = vadd.f32 %v1072_v32, %v318_v41  ;;  %v605_v44 = vmax.f32 %v432_v40, 0.0 }
  0xef   :  { %669 = vst [vmem:[%s1525_s3 + $0x48] sm:$0xff] %v605_v44  ;;  %v528_v47 = vadd.f32 %v527_v42, %v319_v43  ;;  %v74_v43 = vld [vmem:[%s1523_s0 + $0x1e0] sm:$0xff]  ;;  %v75_v44 = vld [vmem:[%s1523_s0 + $0x1e8] sm:$0xff] }
  0xf0   :  { %v225_v48 = vpop.f32.mrf.mxu0  ;;  %v434_v49 = vpop.f32.mrf.mxu1 }
  0xf1   :  { %v637_v52 = vmax.f32 %v528_v47, 0.0  ;;  %368 = vmatmul.f32.gmra.mxu2 %v130_v45  ;;  %v226_v53 = vadd.f32 %v1072_v32, %v225_v48 }
  0xf2   :  { %577 = vmatmul.f32.gmra.mxu3 %v131_v46 }
  0xf3   :  { %701 = vst [vmem:[%s1525_s3 + $0x148] sm:$0xff] %v637_v52  ;;  %v435_v54 = vadd.f32 %v434_v49, %v226_v53  ;;  %272 = vmatmul.f32.gmra.mxu0 %v66_v50  ;;  %481 = vmatmul.f32.gmra.mxu1 %v67_v51  ;;  %v140_v52 = vld [vmem:[%s1523_s0 + $0x3f0] sm:$0xff]  ;;  %v141_v53 = vld [vmem:[%s1523_s0 + $0x3f8] sm:$0xff] }
  0xf4   :  { %v321_v55 = vpop.f32.mrf.mxu2 }
  0xf5   :  { %v530_v56 = vpop.f32.mrf.mxu3  ;;  %v322_v57 = vadd.f32 %v1072_v32, %v321_v55  ;;  %v606_v58 = vmax.f32 %v435_v54, 0.0 }
  0xf7   :  { %670 = vst [vmem:[%s1525_s3 + $0x50] sm:$0xff] %v606_v58  ;;  %v531_v61 = vadd.f32 %v530_v56, %v322_v57  ;;  %v76_v57 = vld [vmem:[%s1523_s0 + $0x1f0] sm:$0xff]  ;;  %v77_v58 = vld [vmem:[%s1523_s0 + $0x1f8] sm:$0xff] }
  0xf8   :  { %v228_v62 = vpop.f32.mrf.mxu0  ;;  %v437_v63 = vpop.f32.mrf.mxu1 }
  0xf9   :  { %v638_v2 = vmax.f32 %v531_v61, 0.0  ;;  %371 = vmatmul.f32.gmra.mxu2 %v132_v59  ;;  %v229_v3 = vadd.f32 %v1072_v32, %v228_v62 }
  0xfa   :  { %580 = vmatmul.f32.gmra.mxu3 %v133_v60 }
  0xfb   :  { %702 = vst [vmem:[%s1525_s3 + $0x150] sm:$0xff] %v638_v2  ;;  %v438_v4 = vadd.f32 %v437_v63, %v229_v3  ;;  %275 = vmatmul.f32.gmra.mxu0 %v68_v0  ;;  %484 = vmatmul.f32.gmra.mxu1 %v69_v1 }
  0xfc   :  { %v324_v5 = vpop.f32.mrf.mxu2 }
  0xfd   :  { %v533_v6 = vpop.f32.mrf.mxu3  ;;  %v325_v7 = vadd.f32 %v1072_v32, %v324_v5  ;;  %v607_v8 = vmax.f32 %v438_v4, 0.0 }
  0xff   :  { %671 = vst [vmem:[%s1525_s3 + $0x58] sm:$0xff] %v607_v8  ;;  %v534_v11 = vadd.f32 %v533_v6, %v325_v7 }
 0x100   :  { %v231_v12 = vpop.f32.mrf.mxu0  ;;  %v440_v13 = vpop.f32.mrf.mxu1 }
 0x101   :  { %v639_v16 = vmax.f32 %v534_v11, 0.0  ;;  %374 = vmatmul.f32.gmra.mxu2 %v134_v9  ;;  %v232_v17 = vadd.f32 %v1072_v32, %v231_v12 }
 0x102   :  { %583 = vmatmul.f32.gmra.mxu3 %v135_v10 }
 0x103   :  { %703 = vst [vmem:[%s1525_s3 + $0x158] sm:$0xff] %v639_v16  ;;  %v441_v18 = vadd.f32 %v440_v13, %v232_v17  ;;  %278 = vmatmul.f32.gmra.mxu0 %v70_v14  ;;  %487 = vmatmul.f32.gmra.mxu1 %v71_v15 }
 0x104   :  { %v327_v19 = vpop.f32.mrf.mxu2 }
 0x105   :  { %v536_v20 = vpop.f32.mrf.mxu3  ;;  %v328_v21 = vadd.f32 %v1072_v32, %v327_v19  ;;  %v608_v22 = vmax.f32 %v441_v18, 0.0 }
 0x107   :  { %672 = vst [vmem:[%s1525_s3 + $0x60] sm:$0xff] %v608_v22  ;;  %v537_v25 = vadd.f32 %v536_v20, %v328_v21 }
 0x108   :  { %v234_v26 = vpop.f32.mrf.mxu0  ;;  %v443_v27 = vpop.f32.mrf.mxu1 }
 0x109   :  { %v640_v30 = vmax.f32 %v537_v25, 0.0  ;;  %377 = vmatmul.f32.gmra.mxu2 %v136_v23  ;;  %v235_v31 = vadd.f32 %v1072_v32, %v234_v26 }
 0x10a   :  { %586 = vmatmul.f32.gmra.mxu3 %v137_v24 }
 0x10b   :  { %704 = vst [vmem:[%s1525_s3 + $0x160] sm:$0xff] %v640_v30  ;;  %v444_v33 = vadd.f32 %v443_v27, %v235_v31  ;;  %281 = vmatmul.f32.gmra.mxu0 %v72_v28  ;;  %490 = vmatmul.f32.gmra.mxu1 %v73_v29 }
 0x10c   :  { %v330_v34 = vpop.f32.mrf.mxu2 }
 0x10d   :  { %v539_v35 = vpop.f32.mrf.mxu3  ;;  %v331_v36 = vadd.f32 %v1072_v32, %v330_v34  ;;  %v609_v37 = vmax.f32 %v444_v33, 0.0 }
 0x10f   :  { %673 = vst [vmem:[%s1525_s3 + $0x68] sm:$0xff] %v609_v37  ;;  %v540_v40 = vadd.f32 %v539_v35, %v331_v36 }
 0x110   :  { %v237_v41 = vpop.f32.mrf.mxu0  ;;  %v446_v42 = vpop.f32.mrf.mxu1 }
 0x111   :  { %v641_v45 = vmax.f32 %v540_v40, 0.0  ;;  %380 = vmatmul.f32.gmra.mxu2 %v138_v38  ;;  %v238_v46 = vadd.f32 %v1072_v32, %v237_v41 }
 0x112   :  { %589 = vmatmul.f32.gmra.mxu3 %v139_v39 }
 0x113   :  { %705 = vst [vmem:[%s1525_s3 + $0x168] sm:$0xff] %v641_v45  ;;  %v447_v47 = vadd.f32 %v446_v42, %v238_v46  ;;  %284 = vmatmul.f32.gmra.mxu0 %v74_v43  ;;  %493 = vmatmul.f32.gmra.mxu1 %v75_v44 }
 0x114   :  { %v333_v48 = vpop.f32.mrf.mxu2 }
 0x115   :  { %v542_v49 = vpop.f32.mrf.mxu3  ;;  %v334_v50 = vadd.f32 %v1072_v32, %v333_v48  ;;  %v610_v51 = vmax.f32 %v447_v47, 0.0 }
 0x117   :  { %674 = vst [vmem:[%s1525_s3 + $0x70] sm:$0xff] %v610_v51  ;;  %v543_v54 = vadd.f32 %v542_v49, %v334_v50 }
 0x118   :  { %v240_v55 = vpop.f32.mrf.mxu0  ;;  %v449_v56 = vpop.f32.mrf.mxu1 }
 0x119   :  { %v642_v59 = vmax.f32 %v543_v54, 0.0  ;;  %383 = vmatmul.f32.gmra.mxu2 %v140_v52  ;;  %v241_v60 = vadd.f32 %v1072_v32, %v240_v55 }
 0x11a   :  { %592 = vmatmul.f32.gmra.mxu3 %v141_v53 }
 0x11b   :  { %706 = vst [vmem:[%s1525_s3 + $0x170] sm:$0xff] %v642_v59  ;;  %v450_v61 = vadd.f32 %v449_v56, %v241_v60  ;;  %287 = vmatmul.f32.gmra.mxu0 %v76_v57  ;;  %496 = vmatmul.f32.gmra.mxu1 %v77_v58 }
 0x11c   :  { %v336_v62 = vpop.f32.mrf.mxu2 }
 0x11d   :  { %v545_v63 = vpop.f32.mrf.mxu3  ;;  %v337_v0 = vadd.f32 %v1072_v32, %v336_v62  ;;  %v611_v1 = vmax.f32 %v450_v61, 0.0 }
 0x11f   :  { %675 = vst [vmem:[%s1525_s3 + $0x78] sm:$0xff] %v611_v1  ;;  %v546_v2 = vadd.f32 %v545_v63, %v337_v0 }
 0x120   :  { %v243_v3 = vpop.f32.mrf.mxu0  ;;  %v452_v4 = vpop.f32.mrf.mxu1 }
 0x121   :  { %v643_v5 = vmax.f32 %v546_v2, 0.0  ;;  %v244_v6 = vadd.f32 %v1072_v32, %v243_v3 }
 0x123   :  { %707 = vst [vmem:[%s1525_s3 + $0x178] sm:$0xff] %v643_v5  ;;  %v453_v7 = vadd.f32 %v452_v4, %v244_v6 }
 0x124   :  { %v339_v8 = vpop.f32.mrf.mxu2 }
 0x125   :  { %v548_v9 = vpop.f32.mrf.mxu3  ;;  %v340_v10 = vadd.f32 %v1072_v32, %v339_v8  ;;  %v612_v11 = vmax.f32 %v453_v7, 0.0 }
 0x127   :  { %676 = vst [vmem:[%s1525_s3 + $0x80] sm:$0xff] %v612_v11  ;;  %v549_v12 = vadd.f32 %v548_v9, %v340_v10 }
 0x128   :  { %v246_v13 = vpop.f32.mrf.mxu0  ;;  %v455_v14 = vpop.f32.mrf.mxu1 }
 0x129   :  { %v644_v15 = vmax.f32 %v549_v12, 0.0  ;;  %v247_v16 = vadd.f32 %v1072_v32, %v246_v13 }
 0x12b   :  { %708 = vst [vmem:[%s1525_s3 + $0x180] sm:$0xff] %v644_v15  ;;  %v456_v17 = vadd.f32 %v455_v14, %v247_v16 }
 0x12c   :  { %v342_v18 = vpop.f32.mrf.mxu2 }
 0x12d   :  { %v551_v19 = vpop.f32.mrf.mxu3  ;;  %v343_v20 = vadd.f32 %v1072_v32, %v342_v18  ;;  %v613_v21 = vmax.f32 %v456_v17, 0.0 }
 0x12f   :  { %677 = vst [vmem:[%s1525_s3 + $0x88] sm:$0xff] %v613_v21  ;;  %v552_v22 = vadd.f32 %v551_v19, %v343_v20 }
 0x130   :  { %v249_v23 = vpop.f32.mrf.mxu0  ;;  %v458_v24 = vpop.f32.mrf.mxu1 }
 0x131   :  { %v645_v25 = vmax.f32 %v552_v22, 0.0  ;;  %v250_v26 = vadd.f32 %v1072_v32, %v249_v23 }
 0x133   :  { %709 = vst [vmem:[%s1525_s3 + $0x188] sm:$0xff] %v645_v25  ;;  %v459_v27 = vadd.f32 %v458_v24, %v250_v26 }
 0x134   :  { %v345_v28 = vpop.f32.mrf.mxu2 }
 0x135   :  { %v554_v29 = vpop.f32.mrf.mxu3  ;;  %v346_v30 = vadd.f32 %v1072_v32, %v345_v28  ;;  %v614_v31 = vmax.f32 %v459_v27, 0.0 }
 0x137   :  { %678 = vst [vmem:[%s1525_s3 + $0x90] sm:$0xff] %v614_v31  ;;  %v555_v33 = vadd.f32 %v554_v29, %v346_v30 }
 0x138   :  { %v252_v34 = vpop.f32.mrf.mxu0  ;;  %v461_v35 = vpop.f32.mrf.mxu1 }
 0x139   :  { %v646_v36 = vmax.f32 %v555_v33, 0.0  ;;  %v253_v37 = vadd.f32 %v1072_v32, %v252_v34 }
 0x13b   :  { %710 = vst [vmem:[%s1525_s3 + $0x190] sm:$0xff] %v646_v36  ;;  %v462_v38 = vadd.f32 %v461_v35, %v253_v37 }
 0x13c   :  { %v348_v39 = vpop.f32.mrf.mxu2 }
 0x13d   :  { %v557_v40 = vpop.f32.mrf.mxu3  ;;  %v349_v41 = vadd.f32 %v1072_v32, %v348_v39  ;;  %v615_v42 = vmax.f32 %v462_v38, 0.0 }
 0x13f   :  { %679 = vst [vmem:[%s1525_s3 + $0x98] sm:$0xff] %v615_v42  ;;  %v558_v43 = vadd.f32 %v557_v40, %v349_v41 }
 0x140   :  { %v255_v44 = vpop.f32.mrf.mxu0  ;;  %v464_v45 = vpop.f32.mrf.mxu1 }
 0x141   :  { %v647_v46 = vmax.f32 %v558_v43, 0.0  ;;  %v256_v47 = vadd.f32 %v1072_v32, %v255_v44 }
 0x143   :  { %711 = vst [vmem:[%s1525_s3 + $0x198] sm:$0xff] %v647_v46  ;;  %v465_v48 = vadd.f32 %v464_v45, %v256_v47 }
 0x144   :  { %v351_v49 = vpop.f32.mrf.mxu2 }
 0x145   :  { %v560_v50 = vpop.f32.mrf.mxu3  ;;  %v352_v51 = vadd.f32 %v1072_v32, %v351_v49  ;;  %v616_v52 = vmax.f32 %v465_v48, 0.0 }
 0x147   :  { %680 = vst [vmem:[%s1525_s3 + $0xa0] sm:$0xff] %v616_v52  ;;  %v561_v53 = vadd.f32 %v560_v50, %v352_v51 }
 0x148   :  { %v258_v54 = vpop.f32.mrf.mxu0  ;;  %v467_v55 = vpop.f32.mrf.mxu1 }
 0x149   :  { %v648_v56 = vmax.f32 %v561_v53, 0.0  ;;  %v259_v57 = vadd.f32 %v1072_v32, %v258_v54 }
 0x14b   :  { %712 = vst [vmem:[%s1525_s3 + $0x1a0] sm:$0xff] %v648_v56  ;;  %v468_v58 = vadd.f32 %v467_v55, %v259_v57 }
 0x14c   :  { %v354_v59 = vpop.f32.mrf.mxu2 }
 0x14d   :  { %v563_v60 = vpop.f32.mrf.mxu3  ;;  %v355_v61 = vadd.f32 %v1072_v32, %v354_v59  ;;  %v617_v62 = vmax.f32 %v468_v58, 0.0 }
 0x14f   :  { %681 = vst [vmem:[%s1525_s3 + $0xa8] sm:$0xff] %v617_v62  ;;  %v564_v63 = vadd.f32 %v563_v60, %v355_v61 }
 0x150   :  { %v261_v0 = vpop.f32.mrf.mxu0  ;;  %v470_v1 = vpop.f32.mrf.mxu1 }
 0x151   :  { %v649_v2 = vmax.f32 %v564_v63, 0.0  ;;  %v262_v3 = vadd.f32 %v1072_v32, %v261_v0 }
 0x153   :  { %713 = vst [vmem:[%s1525_s3 + $0x1a8] sm:$0xff] %v649_v2  ;;  %v471_v4 = vadd.f32 %v470_v1, %v262_v3 }
 0x154   :  { %v357_v5 = vpop.f32.mrf.mxu2 }
 0x155   :  { %v566_v6 = vpop.f32.mrf.mxu3  ;;  %v358_v7 = vadd.f32 %v1072_v32, %v357_v5  ;;  %v618_v8 = vmax.f32 %v471_v4, 0.0 }
 0x157   :  { %682 = vst [vmem:[%s1525_s3 + $0xb0] sm:$0xff] %v618_v8  ;;  %v567_v9 = vadd.f32 %v566_v6, %v358_v7 }
 0x158   :  { %v264_v10 = vpop.f32.mrf.mxu0  ;;  %v473_v11 = vpop.f32.mrf.mxu1 }
 0x159   :  { %v650_v12 = vmax.f32 %v567_v9, 0.0  ;;  %v265_v13 = vadd.f32 %v1072_v32, %v264_v10 }
 0x15b   :  { %714 = vst [vmem:[%s1525_s3 + $0x1b0] sm:$0xff] %v650_v12  ;;  %v474_v14 = vadd.f32 %v473_v11, %v265_v13 }
 0x15c   :  { %v360_v15 = vpop.f32.mrf.mxu2 }
 0x15d   :  { %v569_v16 = vpop.f32.mrf.mxu3  ;;  %v361_v17 = vadd.f32 %v1072_v32, %v360_v15  ;;  %v619_v18 = vmax.f32 %v474_v14, 0.0 }
 0x15f   :  { %683 = vst [vmem:[%s1525_s3 + $0xb8] sm:$0xff] %v619_v18  ;;  %v570_v19 = vadd.f32 %v569_v16, %v361_v17 }
 0x160   :  { %v267_v20 = vpop.f32.mrf.mxu0  ;;  %v476_v21 = vpop.f32.mrf.mxu1 }
 0x161   :  { %v651_v22 = vmax.f32 %v570_v19, 0.0  ;;  %v268_v23 = vadd.f32 %v1072_v32, %v267_v20 }
 0x163   :  { %715 = vst [vmem:[%s1525_s3 + $0x1b8] sm:$0xff] %v651_v22  ;;  %v477_v24 = vadd.f32 %v476_v21, %v268_v23 }
 0x164   :  { %v363_v25 = vpop.f32.mrf.mxu2 }
 0x165   :  { %v572_v26 = vpop.f32.mrf.mxu3  ;;  %v364_v27 = vadd.f32 %v1072_v32, %v363_v25  ;;  %v620_v28 = vmax.f32 %v477_v24, 0.0 }
 0x167   :  { %684 = vst [vmem:[%s1525_s3 + $0xc0] sm:$0xff] %v620_v28  ;;  %v573_v29 = vadd.f32 %v572_v26, %v364_v27 }
 0x168   :  { %v270_v30 = vpop.f32.mrf.mxu0  ;;  %v479_v31 = vpop.f32.mrf.mxu1 }
 0x169   :  { %v652_v33 = vmax.f32 %v573_v29, 0.0  ;;  %v271_v34 = vadd.f32 %v1072_v32, %v270_v30 }
 0x16b   :  { %716 = vst [vmem:[%s1525_s3 + $0x1c0] sm:$0xff] %v652_v33  ;;  %v480_v35 = vadd.f32 %v479_v31, %v271_v34 }
 0x16c   :  { %v366_v36 = vpop.f32.mrf.mxu2 }
 0x16d   :  { %v575_v37 = vpop.f32.mrf.mxu3  ;;  %v367_v38 = vadd.f32 %v1072_v32, %v366_v36  ;;  %v621_v39 = vmax.f32 %v480_v35, 0.0 }
 0x16f   :  { %685 = vst [vmem:[%s1525_s3 + $0xc8] sm:$0xff] %v621_v39  ;;  %v576_v40 = vadd.f32 %v575_v37, %v367_v38 }
 0x170   :  { %v273_v41 = vpop.f32.mrf.mxu0  ;;  %v482_v42 = vpop.f32.mrf.mxu1 }
 0x171   :  { %v653_v43 = vmax.f32 %v576_v40, 0.0  ;;  %v274_v44 = vadd.f32 %v1072_v32, %v273_v41 }
 0x173   :  { %717 = vst [vmem:[%s1525_s3 + $0x1c8] sm:$0xff] %v653_v43  ;;  %v483_v45 = vadd.f32 %v482_v42, %v274_v44 }
 0x174   :  { %v369_v46 = vpop.f32.mrf.mxu2 }
 0x175   :  { %v578_v47 = vpop.f32.mrf.mxu3  ;;  %v370_v48 = vadd.f32 %v1072_v32, %v369_v46  ;;  %v622_v49 = vmax.f32 %v483_v45, 0.0 }
 0x177   :  { %686 = vst [vmem:[%s1525_s3 + $0xd0] sm:$0xff] %v622_v49  ;;  %v579_v50 = vadd.f32 %v578_v47, %v370_v48 }
 0x178   :  { %v276_v51 = vpop.f32.mrf.mxu0  ;;  %v485_v52 = vpop.f32.mrf.mxu1 }
 0x179   :  { %v654_v53 = vmax.f32 %v579_v50, 0.0  ;;  %v277_v54 = vadd.f32 %v1072_v32, %v276_v51 }
 0x17b   :  { %718 = vst [vmem:[%s1525_s3 + $0x1d0] sm:$0xff] %v654_v53  ;;  %v486_v55 = vadd.f32 %v485_v52, %v277_v54 }
 0x17c   :  { %v372_v56 = vpop.f32.mrf.mxu2 }
 0x17d   :  { %v581_v57 = vpop.f32.mrf.mxu3  ;;  %v373_v58 = vadd.f32 %v1072_v32, %v372_v56  ;;  %v623_v59 = vmax.f32 %v486_v55, 0.0 }
 0x17f   :  { %687 = vst [vmem:[%s1525_s3 + $0xd8] sm:$0xff] %v623_v59  ;;  %v582_v60 = vadd.f32 %v581_v57, %v373_v58 }
 0x180   :  { %v279_v61 = vpop.f32.mrf.mxu0  ;;  %v488_v62 = vpop.f32.mrf.mxu1 }
 0x181   :  { %v655_v63 = vmax.f32 %v582_v60, 0.0  ;;  %v280_v0 = vadd.f32 %v1072_v32, %v279_v61 }
 0x183   :  { %719 = vst [vmem:[%s1525_s3 + $0x1d8] sm:$0xff] %v655_v63  ;;  %v489_v1 = vadd.f32 %v488_v62, %v280_v0 }
 0x184   :  { %v375_v2 = vpop.f32.mrf.mxu2 }
 0x185   :  { %v584_v3 = vpop.f32.mrf.mxu3  ;;  %v376_v4 = vadd.f32 %v1072_v32, %v375_v2  ;;  %v624_v5 = vmax.f32 %v489_v1, 0.0 }
 0x187   :  { %688 = vst [vmem:[%s1525_s3 + $0xe0] sm:$0xff] %v624_v5  ;;  %v585_v6 = vadd.f32 %v584_v3, %v376_v4 }
 0x188   :  { %v282_v7 = vpop.f32.mrf.mxu0  ;;  %v491_v8 = vpop.f32.mrf.mxu1 }
 0x189   :  { %v656_v9 = vmax.f32 %v585_v6, 0.0  ;;  %v283_v10 = vadd.f32 %v1072_v32, %v282_v7 }
 0x18b   :  { %720 = vst [vmem:[%s1525_s3 + $0x1e0] sm:$0xff] %v656_v9  ;;  %v492_v11 = vadd.f32 %v491_v8, %v283_v10 }
 0x18c   :  { %v378_v12 = vpop.f32.mrf.mxu2 }
 0x18d   :  { %v587_v13 = vpop.f32.mrf.mxu3  ;;  %v379_v14 = vadd.f32 %v1072_v32, %v378_v12  ;;  %v625_v15 = vmax.f32 %v492_v11, 0.0 }
 0x18f   :  { %689 = vst [vmem:[%s1525_s3 + $0xe8] sm:$0xff] %v625_v15  ;;  %v588_v16 = vadd.f32 %v587_v13, %v379_v14 }
 0x190   :  { %v285_v17 = vpop.f32.mrf.mxu0  ;;  %v494_v18 = vpop.f32.mrf.mxu1 }
 0x191   :  { %v657_v19 = vmax.f32 %v588_v16, 0.0  ;;  %v286_v20 = vadd.f32 %v1072_v32, %v285_v17 }
 0x193   :  { %721 = vst [vmem:[%s1525_s3 + $0x1e8] sm:$0xff] %v657_v19  ;;  %v495_v21 = vadd.f32 %v494_v18, %v286_v20 }
 0x194   :  { %v381_v22 = vpop.f32.mrf.mxu2 }
 0x195   :  { %v590_v23 = vpop.f32.mrf.mxu3  ;;  %v382_v24 = vadd.f32 %v1072_v32, %v381_v22  ;;  %v626_v25 = vmax.f32 %v495_v21, 0.0 }
 0x197   :  { %690 = vst [vmem:[%s1525_s3 + $0xf0] sm:$0xff] %v626_v25  ;;  %v591_v26 = vadd.f32 %v590_v23, %v382_v24 }
 0x198   :  { %v288_v27 = vpop.f32.mrf.mxu0  ;;  %v497_v28 = vpop.f32.mrf.mxu1 }
 0x199   :  { %v658_v29 = vmax.f32 %v591_v26, 0.0  ;;  %v289_v30 = vadd.f32 %v1072_v32, %v288_v27 }
 0x19b   :  { %722 = vst [vmem:[%s1525_s3 + $0x1f0] sm:$0xff] %v658_v29  ;;  %v498_v31 = vadd.f32 %v497_v28, %v289_v30 }
 0x19c   :  { %v384_v33 = vpop.f32.mrf.mxu2 }
 0x19d   :  { %v593_v34 = vpop.f32.mrf.mxu3  ;;  %v385_v35 = vadd.f32 %v1072_v32, %v384_v33  ;;  %v627_v36 = vmax.f32 %v498_v31, 0.0 }
 0x19f   :  { %691 = vst [vmem:[%s1525_s3 + $0xf8] sm:$0xff] %v627_v36  ;;  %v594_v37 = vadd.f32 %v593_v34, %v385_v35 }
 0x1a1   :  { %v659_v38 = vmax.f32 %v594_v37, 0.0 }
 0x1a3   :  { %723 = vst [vmem:[%s1525_s3 + $0x1f8] sm:$0xff] %v659_v38 }

// kernel: nature_cnn_forward.4
= control target key start
LH: loop header
LB: loop body
LE: loop exit
PB: predicated region body
PF: predicated region fallthrough
CT: control target
= control target key end

     0   :  { %s2484_s1 = inlined_call_operand.vmem [shape: f32[2048,128], index: 1, kind: input, shape index: {}]   ;;  %s2485_s0 = inlined_call_operand.vmem [shape: f32[72,2048], index: 0, kind: input, shape index: {}]   ;;  %s2486_s2 = inlined_call_operand.vmem [shape: f32[1,128], index: 2, kind: input, shape index: {}]   ;;  %s2487_s3 = inlined_call_operand.vmem [shape: f32[72,128], index: 3, kind: output, shape index: {}]  }
   0x1   :  { %v173_v0 = vld [vmem:[%s2484_s1 + $0x78] sm:$0xff]  ;;  %v172_v2 = vld [vmem:[%s2484_s1 + $0x70] sm:$0xff]  ;;  %v171_v6 = vld [vmem:[%s2484_s1 + $0x68] sm:$0xff] }
   0x2   :  { %v205_v1 = vld [vmem:[%s2484_s1 + $0x178] sm:$0xff]  ;;  %418 = vmatpush.msra.mxu0 %v173_v0  ;;  %v204_v4 = vld [vmem:[%s2484_s1 + $0x170] sm:$0xff]  ;;  %v203_v8 = vld [vmem:[%s2484_s1 + $0x168] sm:$0xff] }
   0x3   :  { %506 = vmatpush.msra.mxu2 %v205_v1  ;;  %v189_v3 = vld [vmem:[%s2484_s1 + $0xf8] sm:$0xff]  ;;  %v188_v7 = vld [vmem:[%s2484_s1 + $0xf0] sm:$0xff]  ;;  %v187_v10 = vld [vmem:[%s2484_s1 + $0xe8] sm:$0xff] }
   0x4   :  { %v221_v5 = vld [vmem:[%s2484_s1 + $0x1f8] sm:$0xff]  ;;  %462 = vmatpush.msra.mxu1 %v189_v3  ;;  %419 = vmatpush.msra.mxu0 %v172_v2  ;;  %v220_v9 = vld [vmem:[%s2484_s1 + $0x1f0] sm:$0xff]  ;;  %v170_v11 = vld [vmem:[%s2484_s1 + $0x60] sm:$0xff] }
   0x5   :  { %550 = vmatpush.msra.mxu3 %v221_v5  ;;  %507 = vmatpush.msra.mxu2 %v204_v4  ;;  %v202_v12 = vld [vmem:[%s2484_s1 + $0x160] sm:$0xff]  ;;  %v219_v13 = vld [vmem:[%s2484_s1 + $0x1e8] sm:$0xff]  ;;  %v169_v16 = vld [vmem:[%s2484_s1 + $0x58] sm:$0xff] }
   0x6   :  { %463 = vmatpush.msra.mxu1 %v188_v7  ;;  %420 = vmatpush.msra.mxu0 %v171_v6  ;;  %v186_v14 = vld [vmem:[%s2484_s1 + $0xe0] sm:$0xff]  ;;  %v201_v17 = vld [vmem:[%s2484_s1 + $0x158] sm:$0xff]  ;;  %v168_v20 = vld [vmem:[%s2484_s1 + $0x50] sm:$0xff] }
   0x7   :  { %551 = vmatpush.msra.mxu3 %v220_v9  ;;  %508 = vmatpush.msra.mxu2 %v203_v8  ;;  %v218_v15 = vld [vmem:[%s2484_s1 + $0x1e0] sm:$0xff]  ;;  %v185_v18 = vld [vmem:[%s2484_s1 + $0xd8] sm:$0xff]  ;;  %v200_v21 = vld [vmem:[%s2484_s1 + $0x150] sm:$0xff] }
   0x8   :  { %464 = vmatpush.msra.mxu1 %v187_v10  ;;  %421 = vmatpush.msra.mxu0 %v170_v11  ;;  %v217_v19 = vld [vmem:[%s2484_s1 + $0x1d8] sm:$0xff]  ;;  %v184_v22 = vld [vmem:[%s2484_s1 + $0xd0] sm:$0xff]  ;;  %v167_v24 = vld [vmem:[%s2484_s1 + $0x48] sm:$0xff] }
   0x9   :  { %552 = vmatpush.msra.mxu3 %v219_v13  ;;  %509 = vmatpush.msra.mxu2 %v202_v12  ;;  %v216_v23 = vld [vmem:[%s2484_s1 + $0x1d0] sm:$0xff]  ;;  %v199_v25 = vld [vmem:[%s2484_s1 + $0x148] sm:$0xff]  ;;  %v166_v28 = vld [vmem:[%s2484_s1 + $0x40] sm:$0xff] }
   0xa   :  { %465 = vmatpush.msra.mxu1 %v186_v14  ;;  %422 = vmatpush.msra.mxu0 %v169_v16  ;;  %v183_v26 = vld [vmem:[%s2484_s1 + $0xc8] sm:$0xff]  ;;  %v198_v29 = vld [vmem:[%s2484_s1 + $0x140] sm:$0xff]  ;;  %v165_v32 = vld [vmem:[%s2484_s1 + $0x38] sm:$0xff] }
   0xb   :  { %553 = vmatpush.msra.mxu3 %v218_v15  ;;  %510 = vmatpush.msra.mxu2 %v201_v17  ;;  %v215_v27 = vld [vmem:[%s2484_s1 + $0x1c8] sm:$0xff]  ;;  %v182_v30 = vld [vmem:[%s2484_s1 + $0xc0] sm:$0xff]  ;;  %v197_v33 = vld [vmem:[%s2484_s1 + $0x138] sm:$0xff] }
   0xc   :  { %466 = vmatpush.msra.mxu1 %v185_v18  ;;  %423 = vmatpush.msra.mxu0 %v168_v20  ;;  %v214_v31 = vld [vmem:[%s2484_s1 + $0x1c0] sm:$0xff]  ;;  %v181_v34 = vld [vmem:[%s2484_s1 + $0xb8] sm:$0xff]  ;;  %v164_v36 = vld [vmem:[%s2484_s1 + $0x30] sm:$0xff] }
   0xd   :  { %554 = vmatpush.msra.mxu3 %v217_v19  ;;  %511 = vmatpush.msra.mxu2 %v200_v21  ;;  %v213_v35 = vld [vmem:[%s2484_s1 + $0x1b8] sm:$0xff]  ;;  %v196_v37 = vld [vmem:[%s2484_s1 + $0x130] sm:$0xff]  ;;  %v163_v40 = vld [vmem:[%s2484_s1 + $0x28] sm:$0xff] }
   0xe   :  { %467 = vmatpush.msra.mxu1 %v184_v22  ;;  %424 = vmatpush.msra.mxu0 %v167_v24  ;;  %v180_v38 = vld [vmem:[%s2484_s1 + $0xb0] sm:$0xff]  ;;  %v195_v41 = vld [vmem:[%s2484_s1 + $0x128] sm:$0xff]  ;;  %v162_v44 = vld [vmem:[%s2484_s1 + $0x20] sm:$0xff] }
   0xf   :  { %555 = vmatpush.msra.mxu3 %v216_v23  ;;  %512 = vmatpush.msra.mxu2 %v199_v25  ;;  %v212_v39 = vld [vmem:[%s2484_s1 + $0x1b0] sm:$0xff]  ;;  %v179_v42 = vld [vmem:[%s2484_s1 + $0xa8] sm:$0xff]  ;;  %v194_v45 = vld [vmem:[%s2484_s1 + $0x120] sm:$0xff] }
  0x10   :  { %468 = vmatpush.msra.mxu1 %v183_v26  ;;  %425 = vmatpush.msra.mxu0 %v166_v28  ;;  %v211_v43 = vld [vmem:[%s2484_s1 + $0x1a8] sm:$0xff]  ;;  %v178_v46 = vld [vmem:[%s2484_s1 + $0xa0] sm:$0xff]  ;;  %v161_v48 = vld [vmem:[%s2484_s1 + $0x18] sm:$0xff] }
  0x11   :  { %556 = vmatpush.msra.mxu3 %v215_v27  ;;  %513 = vmatpush.msra.mxu2 %v198_v29  ;;  %v210_v47 = vld [vmem:[%s2484_s1 + $0x1a0] sm:$0xff]  ;;  %v193_v49 = vld [vmem:[%s2484_s1 + $0x118] sm:$0xff]  ;;  %v160_v52 = vld [vmem:[%s2484_s1 + $0x10] sm:$0xff] }
  0x12   :  { %469 = vmatpush.msra.mxu1 %v182_v30  ;;  %426 = vmatpush.msra.mxu0 %v165_v32  ;;  %v177_v50 = vld [vmem:[%s2484_s1 + $0x98] sm:$0xff]  ;;  %v192_v53 = vld [vmem:[%s2484_s1 + $0x110] sm:$0xff]  ;;  %v159_v56 = vld [vmem:[%s2484_s1 + $0x8] sm:$0xff] }
  0x13   :  { %557 = vmatpush.msra.mxu3 %v214_v31  ;;  %514 = vmatpush.msra.mxu2 %v197_v33  ;;  %v209_v51 = vld [vmem:[%s2484_s1 + $0x198] sm:$0xff]  ;;  %v176_v54 = vld [vmem:[%s2484_s1 + $0x90] sm:$0xff]  ;;  %v191_v57 = vld [vmem:[%s2484_s1 + $0x108] sm:$0xff] }
  0x14   :  { %470 = vmatpush.msra.mxu1 %v181_v34  ;;  %427 = vmatpush.msra.mxu0 %v164_v36  ;;  %v208_v55 = vld [vmem:[%s2484_s1 + $0x190] sm:$0xff]  ;;  %v175_v58 = vld [vmem:[%s2484_s1 + $0x88] sm:$0xff]  ;;  %v158_v60 = vld [vmem:[%s2484_s1] sm:$0xff] }
  0x15   :  { %558 = vmatpush.msra.mxu3 %v213_v35  ;;  %515 = vmatpush.msra.mxu2 %v196_v37  ;;  %v207_v59 = vld [vmem:[%s2484_s1 + $0x188] sm:$0xff]  ;;  %v190_v61 = vld [vmem:[%s2484_s1 + $0x100] sm:$0xff]  ;;  %v16_v63 = vld [vmem:[%s2485_s0 + $0x10] sm:$0xff] }
  0x16   :  { %471 = vmatpush.msra.mxu1 %v180_v38  ;;  %428 = vmatpush.msra.mxu0 %v163_v40  ;;  %v14_v62 = vld [vmem:[%s2485_s0] sm:$0xff]  ;;  %v269_v0 = vld [vmem:[%s2484_s1 + $0x378] sm:$0xff]  ;;  %v15_v3 = vld [vmem:[%s2485_s0 + $0x8] sm:$0xff] }
  0x17   :  { %559 = vmatpush.msra.mxu3 %v212_v39  ;;  %516 = vmatpush.msra.mxu2 %v195_v41  ;;  %v174_v1 = vld [vmem:[%s2484_s1 + $0x80] sm:$0xff]  ;;  %v17_v4 = vld [vmem:[%s2485_s0 + $0x18] sm:$0xff]  ;;  %v268_v8 = vld [vmem:[%s2484_s1 + $0x370] sm:$0xff] }
  0x18   :  { %472 = vmatpush.msra.mxu1 %v179_v42  ;;  %429 = vmatpush.msra.mxu0 %v162_v44  ;;  %v206_v2 = vld [vmem:[%s2484_s1 + $0x180] sm:$0xff]  ;;  %v237_v5 = vld [vmem:[%s2484_s1 + $0x278] sm:$0xff]  ;;  %v236_v9 = vld [vmem:[%s2484_s1 + $0x270] sm:$0xff] }
  0x19   :  { %560 = vmatpush.msra.mxu3 %v211_v43  ;;  %517 = vmatpush.msra.mxu2 %v194_v45  ;;  %v285_v6 = vld [vmem:[%s2484_s1 + $0x3f8] sm:$0xff]  ;;  %v284_v10 = vld [vmem:[%s2484_s1 + $0x3f0] sm:$0xff]  ;;  %v267_v12 = vld [vmem:[%s2484_s1 + $0x368] sm:$0xff] }
  0x1a   :  { %473 = vmatpush.msra.mxu1 %v178_v46  ;;  %430 = vmatpush.msra.mxu0 %v161_v48  ;;  %v253_v7 = vld [vmem:[%s2484_s1 + $0x2f8] sm:$0xff]  ;;  %v252_v11 = vld [vmem:[%s2484_s1 + $0x2f0] sm:$0xff]  ;;  %v235_v13 = vld [vmem:[%s2484_s1 + $0x268] sm:$0xff] }
  0x1b   :  { %561 = vmatpush.msra.mxu3 %v210_v47  ;;  %518 = vmatpush.msra.mxu2 %v193_v49  ;;  %v30_v14 = vld [vmem:[%s2485_s0 + $0x80] sm:$0xff]  ;;  %v32_v15 = vld [vmem:[%s2485_s0 + $0x90] sm:$0xff]  ;;  %v283_v16 = vld [vmem:[%s2484_s1 + $0x3e8] sm:$0xff] }
  0x1c   :  { %474 = vmatpush.msra.mxu1 %v177_v50  ;;  %431 = vmatpush.msra.mxu0 %v160_v52  ;;  %v251_v17 = vld [vmem:[%s2484_s1 + $0x2e8] sm:$0xff]  ;;  %v266_v19 = vld [vmem:[%s2484_s1 + $0x360] sm:$0xff]  ;;  %v33_v20 = vld [vmem:[%s2485_s0 + $0x98] sm:$0xff] }
  0x1d   :  { %562 = vmatpush.msra.mxu3 %v209_v51  ;;  %519 = vmatpush.msra.mxu2 %v192_v53  ;;  %v31_v18 = vld [vmem:[%s2485_s0 + $0x88] sm:$0xff]  ;;  %v234_v21 = vld [vmem:[%s2484_s1 + $0x260] sm:$0xff]  ;;  %v265_v24 = vld [vmem:[%s2484_s1 + $0x358] sm:$0xff] }
  0x1e   :  { %475 = vmatpush.msra.mxu1 %v176_v54  ;;  %432 = vmatpush.msra.mxu0 %v159_v56  ;;  %v282_v22 = vld [vmem:[%s2484_s1 + $0x3e0] sm:$0xff]  ;;  %v233_v25 = vld [vmem:[%s2484_s1 + $0x258] sm:$0xff]  ;;  %v264_v28 = vld [vmem:[%s2484_s1 + $0x350] sm:$0xff] }
  0x1f   :  { %563 = vmatpush.msra.mxu3 %v208_v55  ;;  %520 = vmatpush.msra.mxu2 %v191_v57  ;;  %v250_v23 = vld [vmem:[%s2484_s1 + $0x2e0] sm:$0xff]  ;;  %v281_v26 = vld [vmem:[%s2484_s1 + $0x3d8] sm:$0xff]  ;;  %v232_v29 = vld [vmem:[%s2484_s1 + $0x250] sm:$0xff] }
  0x20   :  { %476 = vmatpush.msra.mxu1 %v175_v58  ;;  %433 = vmatpush.msra.mxu0 %v158_v60  ;;  %v249_v27 = vld [vmem:[%s2484_s1 + $0x2d8] sm:$0xff]  ;;  %v46_v30 = vld [vmem:[%s2485_s0 + $0x100] sm:$0xff]  ;;  %v48_v31 = vld [vmem:[%s2485_s0 + $0x110] sm:$0xff] }
  0x21   :  { %564 = vmatpush.msra.mxu3 %v207_v59  ;;  %521 = vmatpush.msra.mxu2 %v190_v61  ;;  %v280_v32 = vld [vmem:[%s2484_s1 + $0x3d0] sm:$0xff]  ;;  %v47_v34 = vld [vmem:[%s2485_s0 + $0x108] sm:$0xff]  ;;  %v49_v36 = vld [vmem:[%s2485_s0 + $0x118] sm:$0xff] }
  0x22   :  { %434 = vmatmul.f32.vlgmr.msra.gmra.mxu0 %v14_v62  ;;  %522 = vmatmul.f32.vlgmr.msra.gmra.mxu2 %v16_v63  ;;  %v248_v33 = vld [vmem:[%s2484_s1 + $0x2d0] sm:$0xff]  ;;  %v263_v35 = vld [vmem:[%s2484_s1 + $0x348] sm:$0xff]  ;;  %v262_v40 = vld [vmem:[%s2484_s1 + $0x340] sm:$0xff] }
  0x23   :  { %682 = vmatpush.msrb.mxu2 %v269_v0  ;;  %477 = vmatpush.msra.mxu1 %v174_v1  ;;  %v231_v37 = vld [vmem:[%s2484_s1 + $0x248] sm:$0xff]  ;;  %v230_v41 = vld [vmem:[%s2484_s1 + $0x240] sm:$0xff]  ;;  %v261_v44 = vld [vmem:[%s2484_s1 + $0x338] sm:$0xff] }
  0x24   :  { %565 = vmatpush.msra.mxu3 %v206_v2  ;;  %478 = vmatmul.f32.vlgmr.msra.gmra.mxu1 %v15_v3  ;;  %v279_v38 = vld [vmem:[%s2484_s1 + $0x3c8] sm:$0xff]  ;;  %v278_v42 = vld [vmem:[%s2484_s1 + $0x3c0] sm:$0xff]  ;;  %v229_v45 = vld [vmem:[%s2484_s1 + $0x238] sm:$0xff] }
  0x25   :  { %566 = vmatmul.f32.vlgmr.msra.gmra.mxu3 %v17_v4  ;;  %594 = vmatpush.msrb.mxu0 %v237_v5  ;;  %v247_v39 = vld [vmem:[%s2484_s1 + $0x2c8] sm:$0xff]  ;;  %v246_v43 = vld [vmem:[%s2484_s1 + $0x2c0] sm:$0xff]  ;;  %v64_v47 = vld [vmem:[%s2485_s0 + $0x190] sm:$0xff] }
  0x26   :  { %726 = vmatpush.msrb.mxu3 %v285_v6  ;;  %638 = vmatpush.msrb.mxu1 %v253_v7  ;;  %v62_v46 = vld [vmem:[%s2485_s0 + $0x180] sm:$0xff]  ;;  %v277_v48 = vld [vmem:[%s2484_s1 + $0x3b8] sm:$0xff]  ;;  %v63_v50 = vld [vmem:[%s2485_s0 + $0x188] sm:$0xff] }
  0x27   :  { %683 = vmatpush.msrb.mxu2 %v268_v8  ;;  %595 = vmatpush.msrb.mxu0 %v236_v9  ;;  %v245_v49 = vld [vmem:[%s2484_s1 + $0x2b8] sm:$0xff]  ;;  %v260_v51 = vld [vmem:[%s2484_s1 + $0x330] sm:$0xff]  ;;  %v259_v56 = vld [vmem:[%s2484_s1 + $0x328] sm:$0xff] }
  0x28   :  { %727 = vmatpush.msrb.mxu3 %v284_v10  ;;  %639 = vmatpush.msrb.mxu1 %v252_v11  ;;  %v65_v52 = vld [vmem:[%s2485_s0 + $0x198] sm:$0xff]  ;;  %v228_v53 = vld [vmem:[%s2484_s1 + $0x230] sm:$0xff]  ;;  %v227_v57 = vld [vmem:[%s2484_s1 + $0x228] sm:$0xff] }
  0x29   :  { %684 = vmatpush.msrb.mxu2 %v267_v12  ;;  %596 = vmatpush.msrb.mxu0 %v235_v13  ;;  %v276_v54 = vld [vmem:[%s2484_s1 + $0x3b0] sm:$0xff]  ;;  %v275_v58 = vld [vmem:[%s2484_s1 + $0x3a8] sm:$0xff]  ;;  %v258_v60 = vld [vmem:[%s2484_s1 + $0x320] sm:$0xff] }
  0x2a   :  { %437 = vmatmul.f32.gmra.mxu0 %v30_v14  ;;  %525 = vmatmul.f32.gmra.mxu2 %v32_v15  ;;  %v244_v55 = vld [vmem:[%s2484_s1 + $0x2b0] sm:$0xff]  ;;  %v243_v59 = vld [vmem:[%s2484_s1 + $0x2a8] sm:$0xff]  ;;  %v226_v61 = vld [vmem:[%s2484_s1 + $0x220] sm:$0xff] }
  0x2b   :  { %728 = vmatpush.msrb.mxu3 %v283_v16  ;;  %640 = vmatpush.msrb.mxu1 %v251_v17  ;;  %v78_v62 = vld [vmem:[%s2485_s0 + $0x200] sm:$0xff]  ;;  %v80_v63 = vld [vmem:[%s2485_s0 + $0x210] sm:$0xff]  ;;  %v79_v2 = vld [vmem:[%s2485_s0 + $0x208] sm:$0xff] }
  0x2c   :  { %481 = vmatmul.f32.gmra.mxu1 %v31_v18  ;;  %685 = vmatpush.msrb.mxu2 %v266_v19  ;;  %v274_v0 = vld [vmem:[%s2484_s1 + $0x3a0] sm:$0xff]  ;;  %v257_v3 = vld [vmem:[%s2484_s1 + $0x318] sm:$0xff]  ;;  %v256_v8 = vld [vmem:[%s2484_s1 + $0x310] sm:$0xff] }
  0x2d   :  { %569 = vmatmul.f32.gmra.mxu3 %v33_v20  ;;  %597 = vmatpush.msrb.mxu0 %v234_v21  ;;  %v242_v1 = vld [vmem:[%s2484_s1 + $0x2a0] sm:$0xff]  ;;  %v81_v4 = vld [vmem:[%s2485_s0 + $0x218] sm:$0xff]  ;;  %v224_v9 = vld [vmem:[%s2484_s1 + $0x210] sm:$0xff] }
  0x2e   :  { %729 = vmatpush.msrb.mxu3 %v282_v22  ;;  %641 = vmatpush.msrb.mxu1 %v250_v23  ;;  %v225_v5 = vld [vmem:[%s2484_s1 + $0x218] sm:$0xff]  ;;  %v272_v10 = vld [vmem:[%s2484_s1 + $0x390] sm:$0xff]  ;;  %v255_v12 = vld [vmem:[%s2484_s1 + $0x308] sm:$0xff] }
  0x2f   :  { %686 = vmatpush.msrb.mxu2 %v265_v24  ;;  %598 = vmatpush.msrb.mxu0 %v233_v25  ;;  %v273_v6 = vld [vmem:[%s2484_s1 + $0x398] sm:$0xff]  ;;  %v240_v11 = vld [vmem:[%s2484_s1 + $0x290] sm:$0xff]  ;;  %v223_v13 = vld [vmem:[%s2484_s1 + $0x208] sm:$0xff] }
  0x30   :  { %730 = vmatpush.msrb.mxu3 %v281_v26  ;;  %642 = vmatpush.msrb.mxu1 %v249_v27  ;;  %v241_v7 = vld [vmem:[%s2484_s1 + $0x298] sm:$0xff]  ;;  %v94_v14 = vld [vmem:[%s2485_s0 + $0x280] sm:$0xff]  ;;  %v96_v15 = vld [vmem:[%s2485_s0 + $0x290] sm:$0xff] }
  0x31   :  { %687 = vmatpush.msrb.mxu2 %v264_v28  ;;  %599 = vmatpush.msrb.mxu0 %v232_v29  ;;  %v271_v16 = vld [vmem:[%s2484_s1 + $0x388] sm:$0xff]  ;;  %v254_v19 = vld [vmem:[%s2484_s1 + $0x300] sm:$0xff]  ;;  %v97_v20 = vld [vmem:[%s2485_s0 + $0x298] sm:$0xff] }
  0x32   :  { %440 = vmatmul.f32.gmra.mxu0 %v46_v30  ;;  %528 = vmatmul.f32.gmra.mxu2 %v48_v31  ;;  %v239_v17 = vld [vmem:[%s2484_s1 + $0x288] sm:$0xff]  ;;  %v222_v21 = vld [vmem:[%s2484_s1 + $0x200] sm:$0xff]  ;;  %v333_v24 = vld [vmem:[%s2484_s1 + $0x578] sm:$0xff] }
  0x33   :  { %731 = vmatpush.msrb.mxu3 %v280_v32  ;;  %643 = vmatpush.msrb.mxu1 %v248_v33  ;;  %v95_v18 = vld [vmem:[%s2485_s0 + $0x288] sm:$0xff]  ;;  %v270_v22 = vld [vmem:[%s2484_s1 + $0x380] sm:$0xff]  ;;  %v301_v25 = vld [vmem:[%s2484_s1 + $0x478] sm:$0xff] }
  0x34   :  { %484 = vmatmul.f32.gmra.mxu1 %v47_v34  ;;  %688 = vmatpush.msrb.mxu2 %v263_v35  ;;  %v238_v23 = vld [vmem:[%s2484_s1 + $0x280] sm:$0xff]  ;;  %v349_v26 = vld [vmem:[%s2484_s1 + $0x5f8] sm:$0xff]  ;;  %v332_v28 = vld [vmem:[%s2484_s1 + $0x570] sm:$0xff] }
  0x35   :  { %572 = vmatmul.f32.gmra.mxu3 %v49_v36  ;;  %600 = vmatpush.msrb.mxu0 %v231_v37  ;;  %v317_v27 = vld [vmem:[%s2484_s1 + $0x4f8] sm:$0xff]  ;;  %v300_v29 = vld [vmem:[%s2484_s1 + $0x470] sm:$0xff]  ;;  %v110_v30 = vld [vmem:[%s2485_s0 + $0x300] sm:$0xff] }
  0x36   :  { %732 = vmatpush.msrb.mxu3 %v279_v38  ;;  %644 = vmatpush.msrb.mxu1 %v247_v39  ;;  %v112_v31 = vld [vmem:[%s2485_s0 + $0x310] sm:$0xff]  ;;  %v111_v33 = vld [vmem:[%s2485_s0 + $0x308] sm:$0xff]  ;;  %v113_v34 = vld [vmem:[%s2485_s0 + $0x318] sm:$0xff] }
  0x37   :  { %689 = vmatpush.msrb.mxu2 %v262_v40  ;;  %601 = vmatpush.msrb.mxu0 %v230_v41  ;;  %v348_v32 = vld [vmem:[%s2484_s1 + $0x5f0] sm:$0xff]  ;;  %v331_v36 = vld [vmem:[%s2484_s1 + $0x568] sm:$0xff]  ;;  %v330_v40 = vld [vmem:[%s2484_s1 + $0x560] sm:$0xff] }
  0x38   :  { %733 = vmatpush.msrb.mxu3 %v278_v42  ;;  %645 = vmatpush.msrb.mxu1 %v246_v43  ;;  %v316_v35 = vld [vmem:[%s2484_s1 + $0x4f0] sm:$0xff]  ;;  %v299_v37 = vld [vmem:[%s2484_s1 + $0x468] sm:$0xff]  ;;  %v126_v41 = vld [vmem:[%s2485_s0 + $0x380] sm:$0xff] }
  0x39   :  { %690 = vmatpush.msrb.mxu2 %v261_v44  ;;  %602 = vmatpush.msrb.mxu0 %v229_v45  ;;  %v347_v38 = vld [vmem:[%s2484_s1 + $0x5e8] sm:$0xff]  ;;  %v128_v42 = vld [vmem:[%s2485_s0 + $0x390] sm:$0xff]  ;;  %v129_v44 = vld [vmem:[%s2485_s0 + $0x398] sm:$0xff] }
  0x3a   :  { %443 = vmatmul.f32.gmra.mxu0 %v62_v46  ;;  %531 = vmatmul.f32.gmra.mxu2 %v64_v47  ;;  %v315_v39 = vld [vmem:[%s2484_s1 + $0x4e8] sm:$0xff]  ;;  %v298_v45 = vld [vmem:[%s2484_s1 + $0x460] sm:$0xff] }
  0x3b   :  { %734 = vmatpush.msrb.mxu3 %v277_v48  ;;  %646 = vmatpush.msrb.mxu1 %v245_v49  ;;  %v127_v43 = vld [vmem:[%s2485_s0 + $0x388] sm:$0xff]  ;;  %v346_v46 = vld [vmem:[%s2484_s1 + $0x5e0] sm:$0xff]  ;;  %v329_v48 = vld [vmem:[%s2484_s1 + $0x558] sm:$0xff] }
  0x3c   :  { %487 = vmatmul.f32.gmra.mxu1 %v63_v50  ;;  %691 = vmatpush.msrb.mxu2 %v260_v51  ;;  %v314_v47 = vld [vmem:[%s2484_s1 + $0x4e0] sm:$0xff]  ;;  %v297_v49 = vld [vmem:[%s2484_s1 + $0x458] sm:$0xff] }
  0x3d   :  { %575 = vmatmul.f32.gmra.mxu3 %v65_v52  ;;  %603 = vmatpush.msrb.mxu0 %v228_v53  ;;  %v345_v50 = vld [vmem:[%s2484_s1 + $0x5d8] sm:$0xff]  ;;  %v328_v52 = vld [vmem:[%s2484_s1 + $0x550] sm:$0xff]  ;;  %v142_v53 = vld [vmem:[%s2485_s0 + $0x400] sm:$0xff] }
  0x3e   :  { %735 = vmatpush.msrb.mxu3 %v276_v54  ;;  %647 = vmatpush.msrb.mxu1 %v244_v55  ;;  %v313_v51 = vld [vmem:[%s2484_s1 + $0x4d8] sm:$0xff]  ;;  %v144_v54 = vld [vmem:[%s2485_s0 + $0x410] sm:$0xff]  ;;  %v143_v55 = vld [vmem:[%s2485_s0 + $0x408] sm:$0xff] }
  0x3f   :  { %692 = vmatpush.msrb.mxu2 %v259_v56  ;;  %604 = vmatpush.msrb.mxu0 %v227_v57  ;;  %v145_v56 = vld [vmem:[%s2485_s0 + $0x418] sm:$0xff]  ;;  %v296_v57 = vld [vmem:[%s2484_s1 + $0x450] sm:$0xff] }
  0x40   :  { %736 = vmatpush.msrb.mxu3 %v275_v58  ;;  %648 = vmatpush.msrb.mxu1 %v243_v59  ;;  %v344_v58 = vld [vmem:[%s2484_s1 + $0x5d0] sm:$0xff] }
  0x41   :  { %693 = vmatpush.msrb.mxu2 %v258_v60  ;;  %605 = vmatpush.msrb.mxu0 %v226_v61  ;;  %v312_v59 = vld [vmem:[%s2484_s1 + $0x4d0] sm:$0xff]  ;;  %v327_v60 = vld [vmem:[%s2484_s1 + $0x548] sm:$0xff] }
  0x42   :  { %446 = vmatmul.f32.gmra.mxu0 %v78_v62  ;;  %534 = vmatmul.f32.gmra.mxu2 %v80_v63  ;;  %v295_v61 = vld [vmem:[%s2484_s1 + $0x448] sm:$0xff] }
  0x43   :  { %737 = vmatpush.msrb.mxu3 %v274_v0  ;;  %649 = vmatpush.msrb.mxu1 %v242_v1  ;;  %v343_v62 = vld [vmem:[%s2484_s1 + $0x5c8] sm:$0xff]  ;;  %v18_v0 = vld [vmem:[%s2485_s0 + $0x20] sm:$0xff]  ;;  %v20_v1 = vld [vmem:[%s2485_s0 + $0x30] sm:$0xff] }
  0x44   :  { %490 = vmatmul.f32.gmra.mxu1 %v79_v2  ;;  %694 = vmatpush.msrb.mxu2 %v257_v3  ;;  %v311_v63 = vld [vmem:[%s2484_s1 + $0x4c8] sm:$0xff]  ;;  %v21_v3 = vld [vmem:[%s2485_s0 + $0x38] sm:$0xff] }
  0x45   :  { %578 = vmatmul.f32.gmra.mxu3 %v81_v4  ;;  %606 = vmatpush.msrb.mxu0 %v225_v5  ;;  %v19_v2 = vld [vmem:[%s2485_s0 + $0x28] sm:$0xff]  ;;  %v326_v4 = vld [vmem:[%s2484_s1 + $0x540] sm:$0xff] }
  0x46   :  { %738 = vmatpush.msrb.mxu3 %v273_v6  ;;  %650 = vmatpush.msrb.mxu1 %v241_v7  ;;  %v294_v5 = vld [vmem:[%s2484_s1 + $0x440] sm:$0xff] }
  0x47   :  { %695 = vmatpush.msrb.mxu2 %v256_v8  ;;  %607 = vmatpush.msrb.mxu0 %v224_v9  ;;  %v342_v6 = vld [vmem:[%s2484_s1 + $0x5c0] sm:$0xff]  ;;  %v325_v8 = vld [vmem:[%s2484_s1 + $0x538] sm:$0xff] }
  0x48   :  { %739 = vmatpush.msrb.mxu3 %v272_v10  ;;  %651 = vmatpush.msrb.mxu1 %v240_v11  ;;  %v310_v7 = vld [vmem:[%s2484_s1 + $0x4c0] sm:$0xff]  ;;  %v293_v9 = vld [vmem:[%s2484_s1 + $0x438] sm:$0xff] }
  0x49   :  { %696 = vmatpush.msrb.mxu2 %v255_v12  ;;  %608 = vmatpush.msrb.mxu0 %v223_v13  ;;  %v341_v10 = vld [vmem:[%s2484_s1 + $0x5b8] sm:$0xff]  ;;  %v34_v11 = vld [vmem:[%s2485_s0 + $0xa0] sm:$0xff]  ;;  %v36_v12 = vld [vmem:[%s2485_s0 + $0xb0] sm:$0xff] }
  0x4a   :  { %449 = vmatmul.f32.gmra.mxu0 %v94_v14  ;;  %537 = vmatmul.f32.gmra.mxu2 %v96_v15  ;;  %v35_v13 = vld [vmem:[%s2485_s0 + $0xa8] sm:$0xff]  ;;  %v37_v14 = vld [vmem:[%s2485_s0 + $0xb8] sm:$0xff] }
  0x4b   :  { %740 = vmatpush.msrb.mxu3 %v271_v16  ;;  %652 = vmatpush.msrb.mxu1 %v239_v17  ;;  %v309_v15 = vld [vmem:[%s2484_s1 + $0x4b8] sm:$0xff]  ;;  %v324_v16 = vld [vmem:[%s2484_s1 + $0x530] sm:$0xff] }
  0x4c   :  { %493 = vmatmul.f32.gmra.mxu1 %v95_v18  ;;  %697 = vmatpush.msrb.mxu2 %v254_v19  ;;  %v292_v17 = vld [vmem:[%s2484_s1 + $0x430] sm:$0xff] }
  0x4d   :  { %581 = vmatmul.f32.gmra.mxu3 %v97_v20  ;;  %609 = vmatpush.msrb.mxu0 %v222_v21  ;;  %v340_v18 = vld [vmem:[%s2484_s1 + $0x5b0] sm:$0xff]  ;;  %v323_v20 = vld [vmem:[%s2484_s1 + $0x528] sm:$0xff] }
  0x4e   :  { %741 = vmatpush.msrb.mxu3 %v270_v22  ;;  %653 = vmatpush.msrb.mxu1 %v238_v23  ;;  %v308_v19 = vld [vmem:[%s2484_s1 + $0x4b0] sm:$0xff]  ;;  %v291_v21 = vld [vmem:[%s2484_s1 + $0x428] sm:$0xff]  ;;  %v50_v23 = vld [vmem:[%s2485_s0 + $0x120] sm:$0xff] }
  0x4f   :  { %858 = vmatpush.msra.mxu2 %v333_v24  ;;  %770 = vmatpush.msra.mxu0 %v301_v25  ;;  %v339_v22 = vld [vmem:[%s2484_s1 + $0x5a8] sm:$0xff]  ;;  %v52_v24 = vld [vmem:[%s2485_s0 + $0x130] sm:$0xff] }
  0x50   :  { %902 = vmatpush.msra.mxu3 %v349_v26  ;;  %814 = vmatpush.msra.mxu1 %v317_v27  ;;  %v51_v25 = vld [vmem:[%s2485_s0 + $0x128] sm:$0xff]  ;;  %v53_v26 = vld [vmem:[%s2485_s0 + $0x138] sm:$0xff] }
  0x51   :  { %859 = vmatpush.msra.mxu2 %v332_v28  ;;  %771 = vmatpush.msra.mxu0 %v300_v29  ;;  %v307_v27 = vld [vmem:[%s2484_s1 + $0x4a8] sm:$0xff]  ;;  %v322_v28 = vld [vmem:[%s2484_s1 + $0x520] sm:$0xff] }
  0x52   :  { %452 = vmatmul.f32.gmra.mxu0 %v110_v30  ;;  %540 = vmatmul.f32.gmra.mxu2 %v112_v31  ;;  %v290_v29 = vld [vmem:[%s2484_s1 + $0x420] sm:$0xff] }
  0x53   :  { %903 = vmatpush.msra.mxu3 %v348_v32  ;;  %815 = vmatpush.msra.mxu1 %v316_v35  ;;  %v338_v30 = vld [vmem:[%s2484_s1 + $0x5a0] sm:$0xff]  ;;  %v68_v32 = vld [vmem:[%s2485_s0 + $0x1b0] sm:$0xff]  ;;  %v67_v35 = vld [vmem:[%s2485_s0 + $0x1a8] sm:$0xff] }
  0x54   :  { %496 = vmatmul.f32.gmra.mxu1 %v111_v33  ;;  %860 = vmatpush.msra.mxu2 %v331_v36  ;;  %v66_v31 = vld [vmem:[%s2485_s0 + $0x1a0] sm:$0xff]  ;;  %v69_v36 = vld [vmem:[%s2485_s0 + $0x1b8] sm:$0xff] }
  0x55   :  { %584 = vmatmul.f32.gmra.mxu3 %v113_v34  ;;  %772 = vmatpush.msra.mxu0 %v299_v37  ;;  %v306_v33 = vld [vmem:[%s2484_s1 + $0x4a0] sm:$0xff]  ;;  %v321_v34 = vld [vmem:[%s2484_s1 + $0x518] sm:$0xff] }
  0x56   :  { %904 = vmatpush.msra.mxu3 %v347_v38  ;;  %816 = vmatpush.msra.mxu1 %v315_v39  ;;  %v289_v37 = vld [vmem:[%s2484_s1 + $0x418] sm:$0xff] }
  0x57   :  { %861 = vmatpush.msra.mxu2 %v330_v40  ;;  %773 = vmatpush.msra.mxu0 %v298_v45  ;;  %v337_v38 = vld [vmem:[%s2484_s1 + $0x598] sm:$0xff]  ;;  %v320_v40 = vld [vmem:[%s2484_s1 + $0x510] sm:$0xff] }
  0x58   :  { %905 = vmatpush.msra.mxu3 %v346_v46  ;;  %817 = vmatpush.msra.mxu1 %v314_v47  ;;  %v305_v39 = vld [vmem:[%s2484_s1 + $0x498] sm:$0xff]  ;;  %v336_v45 = vld [vmem:[%s2484_s1 + $0x590] sm:$0xff] }
  0x59   :  { %862 = vmatpush.msra.mxu2 %v329_v48  ;;  %774 = vmatpush.msra.mxu0 %v297_v49  ;;  %v85_v46 = vld [vmem:[%s2485_s0 + $0x238] sm:$0xff]  ;;  %v304_v47 = vld [vmem:[%s2484_s1 + $0x490] sm:$0xff]  ;;  %v319_v48 = vld [vmem:[%s2484_s1 + $0x508] sm:$0xff] }
  0x5a   :  { %455 = vmatmul.f32.gmra.mxu0 %v126_v41  ;;  %543 = vmatmul.f32.gmra.mxu2 %v128_v42  ;;  %v82_v41 = vld [vmem:[%s2485_s0 + $0x220] sm:$0xff]  ;;  %v84_v42 = vld [vmem:[%s2485_s0 + $0x230] sm:$0xff]  ;;  %v287_v49 = vld [vmem:[%s2484_s1 + $0x408] sm:$0xff] }
  0x5b   :  { %906 = vmatpush.msra.mxu3 %v345_v50  ;;  %818 = vmatpush.msra.mxu1 %v313_v51  ;;  %v335_v50 = vld [vmem:[%s2484_s1 + $0x588] sm:$0xff] }
  0x5c   :  { %499 = vmatmul.f32.gmra.mxu1 %v127_v43  ;;  %863 = vmatpush.msra.mxu2 %v328_v52  ;;  %v83_v43 = vld [vmem:[%s2485_s0 + $0x228] sm:$0xff]  ;;  %v318_v52 = vld [vmem:[%s2484_s1 + $0x500] sm:$0xff] }
  0x5d   :  { %587 = vmatmul.f32.gmra.mxu3 %v129_v44  ;;  %775 = vmatpush.msra.mxu0 %v296_v57  ;;  %v288_v44 = vld [vmem:[%s2484_s1 + $0x410] sm:$0xff]  ;;  %v303_v51 = vld [vmem:[%s2484_s1 + $0x488] sm:$0xff]  ;;  %v334_v57 = vld [vmem:[%s2484_s1 + $0x580] sm:$0xff] }
  0x5e   :  { %907 = vmatpush.msra.mxu3 %v344_v58  ;;  %819 = vmatpush.msra.mxu1 %v312_v59  ;;  %v101_v58 = vld [vmem:[%s2485_s0 + $0x2b8] sm:$0xff]  ;;  %v302_v59 = vld [vmem:[%s2484_s1 + $0x480] sm:$0xff] }
  0x5f   :  { %864 = vmatpush.msra.mxu2 %v327_v60  ;;  %776 = vmatpush.msra.mxu0 %v295_v61  ;;  %v397_v60 = vld [vmem:[%s2484_s1 + $0x778] sm:$0xff] }
  0x60   :  { %908 = vmatpush.msra.mxu3 %v343_v62  ;;  %820 = vmatpush.msra.mxu1 %v311_v63  ;;  %v365_v61 = vld [vmem:[%s2484_s1 + $0x678] sm:$0xff] }
  0x61   :  { %865 = vmatpush.msra.mxu2 %v326_v4  ;;  %777 = vmatpush.msra.mxu0 %v294_v5  ;;  %v413_v62 = vld [vmem:[%s2484_s1 + $0x7f8] sm:$0xff]  ;;  %v364_v5 = vld [vmem:[%s2484_s1 + $0x670] sm:$0xff] }
  0x62   :  { %458 = vmatmul.f32.gmra.mxu0 %v142_v53  ;;  %546 = vmatmul.f32.gmra.mxu2 %v144_v54  ;;  %v98_v53 = vld [vmem:[%s2485_s0 + $0x2a0] sm:$0xff]  ;;  %v100_v54 = vld [vmem:[%s2485_s0 + $0x2b0] sm:$0xff]  ;;  %v381_v63 = vld [vmem:[%s2484_s1 + $0x6f8] sm:$0xff] }
  0x63   :  { %909 = vmatpush.msra.mxu3 %v342_v6  ;;  %821 = vmatpush.msra.mxu1 %v310_v7  ;;  %v117_v4 = vld [vmem:[%s2485_s0 + $0x338] sm:$0xff]  ;;  %v412_v6 = vld [vmem:[%s2484_s1 + $0x7f0] sm:$0xff] }
  0x64   :  { %502 = vmatmul.f32.gmra.mxu1 %v143_v55  ;;  %866 = vmatpush.msra.mxu2 %v325_v8  ;;  %v99_v55 = vld [vmem:[%s2485_s0 + $0x2a8] sm:$0xff]  ;;  %v380_v7 = vld [vmem:[%s2484_s1 + $0x6f0] sm:$0xff] }
  0x65   :  { %590 = vmatmul.f32.gmra.mxu3 %v145_v56  ;;  %778 = vmatpush.msra.mxu0 %v293_v9  ;;  %v286_v56 = vld [vmem:[%s2484_s1 + $0x400] sm:$0xff]  ;;  %v395_v8 = vld [vmem:[%s2484_s1 + $0x768] sm:$0xff] }
  0x66   :  { %910 = vmatpush.msra.mxu3 %v341_v10  ;;  %822 = vmatpush.msra.mxu1 %v309_v15  ;;  %v1963_v9 = vld [vmem:[%s2486_s2] ss:$0 sm:$0xff]  ;;  %v363_v10 = vld [vmem:[%s2484_s1 + $0x668] sm:$0xff] }
  0x67   :  { %867 = vmatpush.msra.mxu2 %v324_v16  ;;  %779 = vmatpush.msra.mxu0 %v292_v17  ;;  %v131_v17 = vld [vmem:[%s2485_s0 + $0x3a8] sm:$0xff] }
  0x68   :  { %911 = vmatpush.msra.mxu3 %v340_v18  ;;  %823 = vmatpush.msra.mxu1 %v308_v19  ;;  %v379_v18 = vld [vmem:[%s2484_s1 + $0x6e8] sm:$0xff]  ;;  %v394_v19 = vld [vmem:[%s2484_s1 + $0x760] sm:$0xff] }
  0x69   :  { %868 = vmatpush.msra.mxu2 %v323_v20  ;;  %780 = vmatpush.msra.mxu0 %v291_v21  ;;  %v133_v21 = vld [vmem:[%s2485_s0 + $0x3b8] sm:$0xff] }
  0x6a   :  { %610 = vmatmul.f32.vlgmr.msrb.gmra.mxu0 %v18_v0  ;;  %698 = vmatmul.f32.vlgmr.msrb.gmra.mxu2 %v20_v1  ;;  %v114_v0 = vld [vmem:[%s2485_s0 + $0x320] sm:$0xff]  ;;  %v116_v1 = vld [vmem:[%s2485_s0 + $0x330] sm:$0xff] }
  0x6b   :  { %912 = vmatpush.msra.mxu3 %v339_v22  ;;  %824 = vmatpush.msra.mxu1 %v307_v27  ;;  %v362_v22 = vld [vmem:[%s2484_s1 + $0x660] sm:$0xff] }
  0x6c   :  { %654 = vmatmul.f32.vlgmr.msrb.gmra.mxu1 %v19_v2  ;;  %869 = vmatpush.msra.mxu2 %v322_v28  ;;  %v115_v2 = vld [vmem:[%s2485_s0 + $0x328] sm:$0xff]  ;;  %v361_v28 = vld [vmem:[%s2484_s1 + $0x658] sm:$0xff] }
  0x6d   :  { %742 = vmatmul.f32.vlgmr.msrb.gmra.mxu3 %v21_v3  ;;  %781 = vmatpush.msra.mxu0 %v290_v29  ;;  %v396_v3 = vld [vmem:[%s2484_s1 + $0x770] sm:$0xff]  ;;  %v409_v29 = vld [vmem:[%s2484_s1 + $0x7d8] sm:$0xff] }
  0x6e   :  { %913 = vmatpush.msra.mxu3 %v338_v30  ;;  %825 = vmatpush.msra.mxu1 %v306_v33 }
  0x6f   :  { %870 = vmatpush.msra.mxu2 %v321_v34  ;;  %782 = vmatpush.msra.mxu0 %v289_v37  ;;  %v147_v37 = vld [vmem:[%s2485_s0 + $0x428] sm:$0xff] }
  0x70   :  { %914 = vmatpush.msra.mxu3 %v337_v38  ;;  %826 = vmatpush.msra.mxu1 %v305_v39  ;;  %v377_v38 = vld [vmem:[%s2484_s1 + $0x6d8] sm:$0xff] }
  0x71   :  { %871 = vmatpush.msra.mxu2 %v320_v40  ;;  %783 = vmatpush.msra.mxu0 %v288_v44  ;;  %v149_v40 = vld [vmem:[%s2485_s0 + $0x438] sm:$0xff] }
  0x72   :  { %613 = vmatmul.f32.gmra.mxu0 %v34_v11  ;;  %701 = vmatmul.f32.gmra.mxu2 %v36_v12  ;;  %v411_v11 = vld [vmem:[%s2484_s1 + $0x7e8] sm:$0xff] }
  0x73   :  { %915 = vmatpush.msra.mxu3 %v336_v45  ;;  %872 = vmatpush.msra.mxu2 %v319_v48 }
  0x74   :  { %657 = vmatmul.f32.gmra.mxu1 %v35_v13  ;;  %784 = vmatpush.msra.mxu0 %v287_v49  ;;  %v130_v13 = vld [vmem:[%s2485_s0 + $0x3a0] sm:$0xff] }
  0x75   :  { %745 = vmatmul.f32.gmra.mxu3 %v37_v14  ;;  %827 = vmatpush.msra.mxu1 %v304_v47  ;;  %v132_v14 = vld [vmem:[%s2485_s0 + $0x3b0] sm:$0xff]  ;;  %v391_v47 = vld [vmem:[%s2484_s1 + $0x748] sm:$0xff]  ;;  %v22_v49 = vld [vmem:[%s2485_s0 + $0x40] sm:$0xff] }
  0x76   :  { %916 = vmatpush.msra.mxu3 %v335_v50  ;;  %873 = vmatpush.msra.mxu2 %v318_v52  ;;  %v24_v50 = vld [vmem:[%s2485_s0 + $0x50] sm:$0xff] }
  0x77   :  { %828 = vmatpush.msra.mxu1 %v303_v51  ;;  %785 = vmatpush.msra.mxu0 %v286_v56  ;;  %v359_v56 = vld [vmem:[%s2484_s1 + $0x648] sm:$0xff] }
  0x78   :  { %917 = vmatpush.msra.mxu3 %v334_v57  ;;  %1034 = vmatpush.msrb.mxu2 %v397_v60  ;;  %v407_v57 = vld [vmem:[%s2484_s1 + $0x7c8] sm:$0xff] }
  0x79   :  { %829 = vmatpush.msra.mxu1 %v302_v59  ;;  %946 = vmatpush.msrb.mxu0 %v365_v61  ;;  %v25_v59 = vld [vmem:[%s2485_s0 + $0x58] sm:$0xff]  ;;  %v375_v60 = vld [vmem:[%s2484_s1 + $0x6c8] sm:$0xff]  ;;  %v390_v61 = vld [vmem:[%s2484_s1 + $0x740] sm:$0xff] }
  0x7a   :  { %616 = vmatmul.f32.gmra.mxu0 %v50_v23  ;;  %704 = vmatmul.f32.gmra.mxu2 %v52_v24  ;;  %v410_v23 = vld [vmem:[%s2484_s1 + $0x7e0] sm:$0xff] }
  0x7b   :  { %1078 = vmatpush.msrb.mxu3 %v413_v62  ;;  %990 = vmatpush.msrb.mxu1 %v381_v63  ;;  %v358_v63 = vld [vmem:[%s2484_s1 + $0x640] sm:$0xff] }
  0x7c   :  { %660 = vmatmul.f32.gmra.mxu1 %v51_v25  ;;  %1035 = vmatpush.msrb.mxu2 %v396_v3  ;;  %v378_v25 = vld [vmem:[%s2484_s1 + $0x6e0] sm:$0xff]  ;;  %v389_v3 = vld [vmem:[%s2484_s1 + $0x738] sm:$0xff] }
  0x7d   :  { %748 = vmatmul.f32.gmra.mxu3 %v53_v26  ;;  %947 = vmatpush.msrb.mxu0 %v364_v5  ;;  %v393_v26 = vld [vmem:[%s2484_s1 + $0x758] sm:$0xff]  ;;  %v38_v5 = vld [vmem:[%s2485_s0 + $0xc0] sm:$0xff] }
  0x7e   :  { %1079 = vmatpush.msrb.mxu3 %v412_v6  ;;  %991 = vmatpush.msrb.mxu1 %v380_v7  ;;  %v40_v6 = vld [vmem:[%s2485_s0 + $0xd0] sm:$0xff] }
  0x7f   :  { %1036 = vmatpush.msrb.mxu2 %v395_v8  ;;  %948 = vmatpush.msrb.mxu0 %v363_v10 }
  0x80   :  { %1080 = vmatpush.msrb.mxu3 %v411_v11  ;;  %992 = vmatpush.msrb.mxu1 %v379_v18  ;;  %v388_v18 = vld [vmem:[%s2484_s1 + $0x730] sm:$0xff] }
  0x81   :  { %1037 = vmatpush.msrb.mxu2 %v394_v19  ;;  %949 = vmatpush.msrb.mxu0 %v362_v22  ;;  %v404_v22 = vld [vmem:[%s2484_s1 + $0x7b0] sm:$0xff] }
  0x82   :  { %619 = vmatmul.f32.gmra.mxu0 %v66_v31  ;;  %707 = vmatmul.f32.gmra.mxu2 %v68_v32  ;;  %v146_v31 = vld [vmem:[%s2485_s0 + $0x420] sm:$0xff]  ;;  %v148_v32 = vld [vmem:[%s2485_s0 + $0x430] sm:$0xff] }
  0x83   :  { %1081 = vmatpush.msrb.mxu3 %v410_v23  ;;  %993 = vmatpush.msrb.mxu1 %v378_v25  ;;  %v56_v25 = vld [vmem:[%s2485_s0 + $0x150] sm:$0xff] }
  0x84   :  { %663 = vmatmul.f32.gmra.mxu1 %v67_v35  ;;  %1038 = vmatpush.msrb.mxu2 %v393_v26 }
  0x85   :  { %751 = vmatmul.f32.gmra.mxu3 %v69_v36  ;;  %950 = vmatpush.msrb.mxu0 %v361_v28 }
  0x86   :  { %1082 = vmatpush.msrb.mxu3 %v409_v29  ;;  %994 = vmatpush.msrb.mxu1 %v377_v38  ;;  %v371_v38 = vld [vmem:[%s2484_s1 + $0x6a8] sm:$0xff] }
  0x8a   :  { %622 = vmatmul.f32.gmra.mxu0 %v82_v41  ;;  %710 = vmatmul.f32.gmra.mxu2 %v84_v42  ;;  %v392_v41 = vld [vmem:[%s2484_s1 + $0x750] sm:$0xff] }
  0x8b   :  { %1039 = vmatpush.msrb.mxu2 %v392_v41  ;;  %v360_v42 = vld [vmem:[%s2484_s1 + $0x650] sm:$0xff] }
  0x8c   :  { %666 = vmatmul.f32.gmra.mxu1 %v83_v43  ;;  %v408_v43 = vld [vmem:[%s2484_s1 + $0x7d0] sm:$0xff]  ;;  %951 = vmatpush.msrb.mxu0 %v360_v42  ;;  %v354_v42 = vld [vmem:[%s2484_s1 + $0x620] sm:$0xff] }
  0x8d   :  { %754 = vmatmul.f32.gmra.mxu3 %v85_v46  ;;  %v376_v46 = vld [vmem:[%s2484_s1 + $0x6d0] sm:$0xff]  ;;  %1040 = vmatpush.msrb.mxu2 %v391_v47 }
  0x8e   :  { %1083 = vmatpush.msrb.mxu3 %v408_v43  ;;  %995 = vmatpush.msrb.mxu1 %v376_v46  ;;  %v402_v43 = vld [vmem:[%s2484_s1 + $0x7a0] sm:$0xff]  ;;  %v72_v46 = vld [vmem:[%s2485_s0 + $0x1d0] sm:$0xff] }
  0x8f   :  { %952 = vmatpush.msrb.mxu0 %v359_v56  ;;  %1041 = vmatpush.msrb.mxu2 %v390_v61  ;;  %v73_v56 = vld [vmem:[%s2485_s0 + $0x1d8] sm:$0xff] }
  0x90   :  { %1084 = vmatpush.msrb.mxu3 %v407_v57  ;;  %996 = vmatpush.msrb.mxu1 %v375_v60  ;;  %v353_v57 = vld [vmem:[%s2484_s1 + $0x618] sm:$0xff] }
  0x91   :  { %953 = vmatpush.msrb.mxu0 %v358_v63  ;;  %1042 = vmatpush.msrb.mxu2 %v389_v3  ;;  %v369_v60 = vld [vmem:[%s2484_s1 + $0x698] sm:$0xff] }
  0x92   :  { %625 = vmatmul.f32.gmra.mxu0 %v98_v53  ;;  %713 = vmatmul.f32.gmra.mxu2 %v100_v54 }
  0x93   :  { %1043 = vmatpush.msrb.mxu2 %v388_v18 }
  0x94   :  { %669 = vmatmul.f32.gmra.mxu1 %v99_v55  ;;  %v23_v55 = vld [vmem:[%s2485_s0 + $0x48] sm:$0xff] }
  0x95   :  { %757 = vmatmul.f32.gmra.mxu3 %v101_v58 }
  0x9a   :  { %628 = vmatmul.f32.gmra.mxu0 %v114_v0  ;;  %716 = vmatmul.f32.gmra.mxu2 %v116_v1  ;;  %v406_v0 = vld [vmem:[%s2484_s1 + $0x7c0] sm:$0xff] }
  0x9b   :  { %1085 = vmatpush.msrb.mxu3 %v406_v0  ;;  %v86_v0 = vld [vmem:[%s2485_s0 + $0x240] sm:$0xff] }
  0x9c   :  { %672 = vmatmul.f32.gmra.mxu1 %v115_v2  ;;  %v374_v2 = vld [vmem:[%s2484_s1 + $0x6c0] sm:$0xff] }
  0x9d   :  { %760 = vmatmul.f32.gmra.mxu3 %v117_v4  ;;  %997 = vmatpush.msrb.mxu1 %v374_v2 }
  0x9f   :  { %v435_v12 = vpop.f32.mrf.mxu0 }
  0xa0   :  { %v436_v15 = vadd.f32 %v1963_v9, %v435_v12  ;;  %v39_v12 = vld [vmem:[%s2485_s0 + $0xc8] sm:$0xff] }
  0xa1   :  { %v479_v16 = vpop.f32.mrf.mxu1 }
  0xa2   :  { %v480_v20 = vadd.f32 %v479_v16, %v436_v15  ;;  %631 = vmatmul.f32.gmra.mxu0 %v130_v13  ;;  %719 = vmatmul.f32.gmra.mxu2 %v132_v14  ;;  %v357_v13 = vld [vmem:[%s2484_s1 + $0x638] sm:$0xff] }
  0xa3   :  { %v405_v14 = vld [vmem:[%s2484_s1 + $0x7b8] sm:$0xff]  ;;  %954 = vmatpush.msrb.mxu0 %v357_v13  ;;  %v368_v13 = vld [vmem:[%s2484_s1 + $0x690] sm:$0xff] }
  0xa4   :  { %675 = vmatmul.f32.gmra.mxu1 %v131_v17  ;;  %v41_v16 = vld [vmem:[%s2485_s0 + $0xd8] sm:$0xff]  ;;  %1086 = vmatpush.msrb.mxu3 %v405_v14  ;;  %v383_v14 = vld [vmem:[%s2484_s1 + $0x708] sm:$0xff] }
  0xa5   :  { %763 = vmatmul.f32.gmra.mxu3 %v133_v21  ;;  %v523_v24 = vpop.f32.mrf.mxu2  ;;  %v373_v17 = vld [vmem:[%s2484_s1 + $0x6b8] sm:$0xff]  ;;  %v356_v21 = vld [vmem:[%s2484_s1 + $0x630] sm:$0xff] }
  0xa6   :  { %v524_v27 = vadd.f32 %v523_v24, %v480_v20  ;;  %998 = vmatpush.msrb.mxu1 %v373_v17  ;;  %v54_v24 = vld [vmem:[%s2485_s0 + $0x140] sm:$0xff]  ;;  %955 = vmatpush.msrb.mxu0 %v356_v21 }
  0xa7   :  { %v438_v30 = vpop.f32.mrf.mxu0  ;;  %1087 = vmatpush.msrb.mxu3 %v404_v22  ;;  %v102_v22 = vld [vmem:[%s2485_s0 + $0x2c0] sm:$0xff] }
  0xa8   :  { %v439_v33 = vadd.f32 %v1963_v9, %v438_v30  ;;  %v567_v34 = vpop.f32.mrf.mxu3  ;;  %v55_v30 = vld [vmem:[%s2485_s0 + $0x148] sm:$0xff] }
  0xa9   :  { %v2015_v35 = vadd.f32 %v567_v34, %v524_v27  ;;  %v482_v36 = vpop.f32.mrf.mxu1  ;;  %v57_v34 = vld [vmem:[%s2485_s0 + $0x158] sm:$0xff] }
  0xaa   :  { %v483_v39 = vadd.f32 %v482_v36, %v439_v33  ;;  %634 = vmatmul.f32.gmra.mxu0 %v146_v31  ;;  %722 = vmatmul.f32.gmra.mxu2 %v148_v32  ;;  %v372_v31 = vld [vmem:[%s2484_s1 + $0x6b0] sm:$0xff]  ;;  %v387_v32 = vld [vmem:[%s2484_s1 + $0x728] sm:$0xff] }
  0xab   :  { %v355_v36 = vld [vmem:[%s2484_s1 + $0x628] sm:$0xff]  ;;  %999 = vmatpush.msrb.mxu1 %v372_v31  ;;  %1044 = vmatpush.msrb.mxu2 %v387_v32  ;;  %v398_v31 = vld [vmem:[%s2484_s1 + $0x780] sm:$0xff] }
  0xac   :  { %678 = vmatmul.f32.gmra.mxu1 %v147_v37  ;;  %v403_v37 = vld [vmem:[%s2484_s1 + $0x7a8] sm:$0xff]  ;;  %956 = vmatpush.msrb.mxu0 %v355_v36 }
  0xad   :  { %766 = vmatmul.f32.gmra.mxu3 %v149_v40  ;;  %v526_v44 = vpop.f32.mrf.mxu2  ;;  %1000 = vmatpush.msrb.mxu1 %v371_v38  ;;  %v386_v40 = vld [vmem:[%s2484_s1 + $0x720] sm:$0xff] }
  0xae   :  { %v527_v45 = vadd.f32 %v526_v44, %v483_v39  ;;  %1088 = vmatpush.msrb.mxu3 %v403_v37  ;;  %1045 = vmatpush.msrb.mxu2 %v386_v40  ;;  %v120_v40 = vld [vmem:[%s2485_s0 + $0x350] sm:$0xff] }
  0xaf   :  { %v441_v48 = vpop.f32.mrf.mxu0  ;;  %957 = vmatpush.msrb.mxu0 %v354_v42 }
  0xb0   :  { %v442_v51 = vadd.f32 %v1963_v9, %v441_v48  ;;  %v570_v52 = vpop.f32.mrf.mxu3  ;;  %1089 = vmatpush.msrb.mxu3 %v402_v43 }
  0xb1   :  { %v2048_v53 = vadd.f32 %v570_v52, %v527_v45  ;;  %v485_v54 = vpop.f32.mrf.mxu1  ;;  %v70_v45 = vld [vmem:[%s2485_s0 + $0x1c0] sm:$0xff]  ;;  %958 = vmatpush.msrb.mxu0 %v353_v57 }
  0xb2   :  { %v486_v58 = vadd.f32 %v485_v54, %v442_v51  ;;  %786 = vmatmul.f32.vlgmr.msra.gmra.mxu0 %v22_v49  ;;  %874 = vmatmul.f32.vlgmr.msra.gmra.mxu2 %v24_v50  ;;  %v71_v51 = vld [vmem:[%s2485_s0 + $0x1c8] sm:$0xff]  ;;  %v370_v52 = vld [vmem:[%s2484_s1 + $0x6a0] sm:$0xff]  ;;  %v385_v54 = vld [vmem:[%s2484_s1 + $0x718] sm:$0xff] }
  0xb3   :  { %1001 = vmatpush.msrb.mxu1 %v370_v52  ;;  %1046 = vmatpush.msrb.mxu2 %v385_v54  ;;  %v136_v52 = vld [vmem:[%s2485_s0 + $0x3d0] sm:$0xff] }
  0xb4   :  { %830 = vmatmul.f32.vlgmr.msra.gmra.mxu1 %v23_v55 }
  0xb5   :  { %918 = vmatmul.f32.vlgmr.msra.gmra.mxu3 %v25_v59  ;;  %v529_v62 = vpop.f32.mrf.mxu2  ;;  %1002 = vmatpush.msrb.mxu1 %v369_v60 }
  0xb6   :  { %v530_v1 = vadd.f32 %v529_v62, %v486_v58  ;;  %v401_v58 = vld [vmem:[%s2484_s1 + $0x798] sm:$0xff]  ;;  %v384_v62 = vld [vmem:[%s2484_s1 + $0x710] sm:$0xff] }
  0xb7   :  { %v444_v4 = vpop.f32.mrf.mxu0  ;;  %1090 = vmatpush.msrb.mxu3 %v401_v58  ;;  %1047 = vmatpush.msrb.mxu2 %v384_v62  ;;  %v135_v58 = vld [vmem:[%s2485_s0 + $0x3c8] sm:$0xff] }
  0xb8   :  { %v445_v7 = vadd.f32 %v1963_v9, %v444_v4  ;;  %v573_v8 = vpop.f32.mrf.mxu3  ;;  %1003 = vmatpush.msrb.mxu1 %v368_v13  ;;  %v26_v13 = vld [vmem:[%s2485_s0 + $0x60] sm:$0xff] }
  0xb9   :  { %v2087_v10 = vadd.f32 %v573_v8, %v530_v1  ;;  %v488_v11 = vpop.f32.mrf.mxu1  ;;  %v88_v1 = vld [vmem:[%s2485_s0 + $0x250] sm:$0xff]  ;;  %1048 = vmatpush.msrb.mxu2 %v383_v14 }
  0xba   :  { %v489_v15 = vadd.f32 %v488_v11, %v445_v7  ;;  %789 = vmatmul.f32.gmra.mxu0 %v38_v5  ;;  %877 = vmatmul.f32.gmra.mxu2 %v40_v6  ;;  %v87_v6 = vld [vmem:[%s2485_s0 + $0x248] sm:$0xff]  ;;  %v352_v7 = vld [vmem:[%s2484_s1 + $0x610] sm:$0xff] }
  0xbb   :  { %v400_v8 = vld [vmem:[%s2484_s1 + $0x790] sm:$0xff]  ;;  %959 = vmatpush.msrb.mxu0 %v352_v7  ;;  %v153_v7 = vld [vmem:[%s2485_s0 + $0x458] sm:$0xff] }
  0xbc   :  { %833 = vmatmul.f32.gmra.mxu1 %v39_v12  ;;  %v89_v12 = vld [vmem:[%s2485_s0 + $0x258] sm:$0xff]  ;;  %1091 = vmatpush.msrb.mxu3 %v400_v8  ;;  %v28_v14 = vld [vmem:[%s2485_s0 + $0x70] sm:$0xff] }
  0xbd   :  { %921 = vmatmul.f32.gmra.mxu3 %v41_v16  ;;  %v532_v19 = vpop.f32.mrf.mxu2  ;;  %v399_v16 = vld [vmem:[%s2484_s1 + $0x788] sm:$0xff] }
  0xbe   :  { %v533_v20 = vadd.f32 %v532_v19, %v489_v15  ;;  %v351_v15 = vld [vmem:[%s2484_s1 + $0x608] sm:$0xff]  ;;  %1092 = vmatpush.msrb.mxu3 %v399_v16 }
  0xbf   :  { %v447_v23 = vpop.f32.mrf.mxu0  ;;  %960 = vmatpush.msrb.mxu0 %v351_v15  ;;  %v367_v19 = vld [vmem:[%s2484_s1 + $0x688] sm:$0xff] }
  0xc0   :  { %v448_v26 = vadd.f32 %v1963_v9, %v447_v23  ;;  %v576_v27 = vpop.f32.mrf.mxu3  ;;  %v104_v23 = vld [vmem:[%s2485_s0 + $0x2d0] sm:$0xff]  ;;  %1004 = vmatpush.msrb.mxu1 %v367_v19  ;;  %1093 = vmatpush.msrb.mxu3 %v398_v31  ;;  %v27_v19 = vld [vmem:[%s2485_s0 + $0x68] sm:$0xff] }
  0xc1   :  { %v2120_v28 = vadd.f32 %v576_v27, %v533_v20  ;;  %v491_v29 = vpop.f32.mrf.mxu1  ;;  %v382_v20 = vld [vmem:[%s2484_s1 + $0x700] sm:$0xff] }
  0xc2   :  { %v492_v33 = vadd.f32 %v491_v29, %v448_v26  ;;  %792 = vmatmul.f32.gmra.mxu0 %v54_v24  ;;  %880 = vmatmul.f32.gmra.mxu2 %v56_v25  ;;  %v103_v29 = vld [vmem:[%s2485_s0 + $0x2c8] sm:$0xff] }
  0xc3   :  { %1049 = vmatpush.msrb.mxu2 %v382_v20  ;;  %v29_v20 = vld [vmem:[%s2485_s0 + $0x78] sm:$0xff] }
  0xc4   :  { %836 = vmatmul.f32.gmra.mxu1 %v55_v30  ;;  %v350_v30 = vld [vmem:[%s2484_s1 + $0x600] sm:$0xff] }
  0xc5   :  { %924 = vmatmul.f32.gmra.mxu3 %v57_v34  ;;  %v535_v39 = vpop.f32.mrf.mxu2  ;;  %v366_v34 = vld [vmem:[%s2484_s1 + $0x680] sm:$0xff]  ;;  %961 = vmatpush.msrb.mxu0 %v350_v30 }
  0xc6   :  { %v536_v41 = vadd.f32 %v535_v39, %v492_v33  ;;  %v105_v33 = vld [vmem:[%s2485_s0 + $0x2d8] sm:$0xff]  ;;  %1005 = vmatpush.msrb.mxu1 %v366_v34  ;;  %v118_v39 = vld [vmem:[%s2485_s0 + $0x340] sm:$0xff] }
  0xc7   :  { %v450_v44 = vpop.f32.mrf.mxu0  ;;  %v45_v34 = vld [vmem:[%s2485_s0 + $0xf8] sm:$0xff] }
  0xc8   :  { %v451_v47 = vadd.f32 %v1963_v9, %v450_v44  ;;  %v579_v48 = vpop.f32.mrf.mxu3 }
  0xc9   :  { %v2159_v49 = vadd.f32 %v579_v48, %v536_v41  ;;  %v494_v50 = vpop.f32.mrf.mxu1 }
  0xca   :  { %v495_v55 = vadd.f32 %v494_v50, %v451_v47  ;;  %795 = vmatmul.f32.gmra.mxu0 %v70_v45  ;;  %883 = vmatmul.f32.gmra.mxu2 %v72_v46  ;;  %v119_v45 = vld [vmem:[%s2485_s0 + $0x348] sm:$0xff]  ;;  %v121_v47 = vld [vmem:[%s2485_s0 + $0x358] sm:$0xff] }
  0xcc   :  { %839 = vmatmul.f32.gmra.mxu1 %v71_v51  ;;  %v134_v51 = vld [vmem:[%s2485_s0 + $0x3c0] sm:$0xff] }
  0xcd   :  { %927 = vmatmul.f32.gmra.mxu3 %v73_v56  ;;  %v538_v59 = vpop.f32.mrf.mxu2 }
  0xce   :  { %v539_v61 = vadd.f32 %v538_v59, %v495_v55  ;;  %v137_v59 = vld [vmem:[%s2485_s0 + $0x3d8] sm:$0xff] }
  0xcf   :  { %v453_v63 = vpop.f32.mrf.mxu0 }
  0xd0   :  { %v454_v2 = vadd.f32 %v1963_v9, %v453_v63  ;;  %v582_v3 = vpop.f32.mrf.mxu3 }
  0xd1   :  { %v2192_v4 = vadd.f32 %v582_v3, %v539_v61  ;;  %v497_v5 = vpop.f32.mrf.mxu1 }
  0xd2   :  { %v498_v11 = vadd.f32 %v497_v5, %v454_v2  ;;  %798 = vmatmul.f32.gmra.mxu0 %v86_v0  ;;  %886 = vmatmul.f32.gmra.mxu2 %v88_v1  ;;  %v152_v0 = vld [vmem:[%s2485_s0 + $0x450] sm:$0xff] }
  0xd4   :  { %842 = vmatmul.f32.gmra.mxu1 %v87_v6  ;;  %v151_v6 = vld [vmem:[%s2485_s0 + $0x448] sm:$0xff] }
  0xd5   :  { %930 = vmatmul.f32.gmra.mxu3 %v89_v12  ;;  %v541_v17 = vpop.f32.mrf.mxu2 }
  0xd6   :  { %v542_v18 = vadd.f32 %v541_v17, %v498_v11 }
  0xd7   :  { %v456_v21 = vpop.f32.mrf.mxu0 }
  0xd8   :  { %v457_v24 = vadd.f32 %v1963_v9, %v456_v21  ;;  %v585_v25 = vpop.f32.mrf.mxu3 }
  0xd9   :  { %v2231_v26 = vadd.f32 %v585_v25, %v542_v18  ;;  %v500_v27 = vpop.f32.mrf.mxu1  ;;  %v44_v25 = vld [vmem:[%s2485_s0 + $0xf0] sm:$0xff] }
  0xda   :  { %v501_v32 = vadd.f32 %v500_v27, %v457_v24  ;;  %801 = vmatmul.f32.gmra.mxu0 %v102_v22  ;;  %889 = vmatmul.f32.gmra.mxu2 %v104_v23  ;;  %v42_v24 = vld [vmem:[%s2485_s0 + $0xe0] sm:$0xff] }
  0xdc   :  { %845 = vmatmul.f32.gmra.mxu1 %v103_v29 }
  0xdd   :  { %933 = vmatmul.f32.gmra.mxu3 %v105_v33  ;;  %v544_v36 = vpop.f32.mrf.mxu2 }
  0xde   :  { %v545_v37 = vadd.f32 %v544_v36, %v501_v32  ;;  %v43_v32 = vld [vmem:[%s2485_s0 + $0xe8] sm:$0xff] }
  0xdf   :  { %v459_v38 = vpop.f32.mrf.mxu0 }
  0xe0   :  { %v460_v41 = vadd.f32 %v1963_v9, %v459_v38  ;;  %v588_v42 = vpop.f32.mrf.mxu3  ;;  %v58_v38 = vld [vmem:[%s2485_s0 + $0x160] sm:$0xff] }
  0xe1   :  { %v2255_v43 = vadd.f32 %v588_v42, %v545_v37  ;;  %v503_v44 = vpop.f32.mrf.mxu1 }
  0xe2   :  { %v504_v46 = vadd.f32 %v503_v44, %v460_v41  ;;  %804 = vmatmul.f32.gmra.mxu0 %v118_v39  ;;  %892 = vmatmul.f32.gmra.mxu2 %v120_v40  ;;  %v60_v39 = vld [vmem:[%s2485_s0 + $0x170] sm:$0xff] }
  0xe4   :  { %848 = vmatmul.f32.gmra.mxu1 %v119_v45  ;;  %v59_v45 = vld [vmem:[%s2485_s0 + $0x168] sm:$0xff] }
  0xe5   :  { %936 = vmatmul.f32.gmra.mxu3 %v121_v47  ;;  %v547_v48 = vpop.f32.mrf.mxu2  ;;  %v61_v47 = vld [vmem:[%s2485_s0 + $0x178] sm:$0xff] }
  0xe6   :  { %v548_v50 = vadd.f32 %v547_v48, %v504_v46 }
  0xe7   :  { %v611_v9 = vpop.f32.mrf.mxu0 }
  0xe8   :  { %v591_v54 = vpop.f32.mrf.mxu3  ;;  %v612_v55 = vadd.f32 %v611_v9, %v2015_v35  ;;  %v150_v35 = vld [vmem:[%s2485_s0 + $0x440] sm:$0xff] }
  0xe9   :  { %v2270_v56 = vadd.f32 %v591_v54, %v548_v50  ;;  %v655_v57 = vpop.f32.mrf.mxu1  ;;  %v74_v9 = vld [vmem:[%s2485_s0 + $0x1e0] sm:$0xff] }
  0xea   :  { %807 = vmatmul.f32.gmra.mxu0 %v134_v51  ;;  %895 = vmatmul.f32.gmra.mxu2 %v136_v52  ;;  %v656_v60 = vadd.f32 %v655_v57, %v612_v55  ;;  %v76_v51 = vld [vmem:[%s2485_s0 + $0x1f0] sm:$0xff] }
  0xec   :  { %851 = vmatmul.f32.gmra.mxu1 %v135_v58  ;;  %v75_v58 = vld [vmem:[%s2485_s0 + $0x1e8] sm:$0xff] }
  0xed   :  { %939 = vmatmul.f32.gmra.mxu3 %v137_v59  ;;  %v699_v61 = vpop.f32.mrf.mxu2 }
  0xee   :  { %v700_v62 = vadd.f32 %v699_v61, %v656_v60  ;;  %v77_v60 = vld [vmem:[%s2485_s0 + $0x1f8] sm:$0xff] }
  0xef   :  { %v614_v63 = vpop.f32.mrf.mxu0 }
  0xf0   :  { %v615_v1 = vadd.f32 %v614_v63, %v2048_v53  ;;  %v743_v2 = vpop.f32.mrf.mxu3  ;;  %v90_v63 = vld [vmem:[%s2485_s0 + $0x260] sm:$0xff] }
  0xf1   :  { %v2285_v3 = vadd.f32 %v743_v2, %v700_v62  ;;  %v658_v5 = vpop.f32.mrf.mxu1 }
  0xf2   :  { %810 = vmatmul.f32.gmra.mxu0 %v150_v35  ;;  %898 = vmatmul.f32.gmra.mxu2 %v152_v0  ;;  %v659_v8 = vadd.f32 %v658_v5, %v615_v1  ;;  %v92_v35 = vld [vmem:[%s2485_s0 + $0x270] sm:$0xff] }
  0xf4   :  { %854 = vmatmul.f32.gmra.mxu1 %v151_v6  ;;  %v91_v6 = vld [vmem:[%s2485_s0 + $0x268] sm:$0xff] }
  0xf5   :  { %942 = vmatmul.f32.gmra.mxu3 %v153_v7  ;;  %v702_v11 = vpop.f32.mrf.mxu2 }
  0xf6   :  { %v703_v12 = vadd.f32 %v702_v11, %v659_v8  ;;  %v93_v8 = vld [vmem:[%s2485_s0 + $0x278] sm:$0xff] }
  0xf7   :  { %v617_v53 = vpop.f32.mrf.mxu0 }
  0xf8   :  { %v618_v15 = vadd.f32 %v617_v53, %v2087_v10  ;;  %v746_v16 = vpop.f32.mrf.mxu3  ;;  %v106_v53 = vld [vmem:[%s2485_s0 + $0x2e0] sm:$0xff] }
  0xf9   :  { %v2300_v17 = vadd.f32 %v746_v16, %v703_v12  ;;  %v661_v18 = vpop.f32.mrf.mxu1 }
  0xfa   :  { %962 = vmatmul.f32.vlgmr.msrb.gmra.mxu0 %v26_v13  ;;  %1050 = vmatmul.f32.vlgmr.msrb.gmra.mxu2 %v28_v14  ;;  %v662_v21 = vadd.f32 %v661_v18, %v618_v15  ;;  %v108_v13 = vld [vmem:[%s2485_s0 + $0x2f0] sm:$0xff] }
  0xfc   :  { %1006 = vmatmul.f32.vlgmr.msrb.gmra.mxu1 %v27_v19  ;;  %v107_v19 = vld [vmem:[%s2485_s0 + $0x2e8] sm:$0xff] }
  0xfd   :  { %1094 = vmatmul.f32.vlgmr.msrb.gmra.mxu3 %v29_v20  ;;  %v705_v22 = vpop.f32.mrf.mxu2 }
  0xfe   :  { %v706_v23 = vadd.f32 %v705_v22, %v662_v21  ;;  %v109_v21 = vld [vmem:[%s2485_s0 + $0x2f8] sm:$0xff] }
  0xff   :  { %v620_v10 = vpop.f32.mrf.mxu0 }
 0x100   :  { %v621_v27 = vadd.f32 %v620_v10, %v2120_v28  ;;  %v749_v29 = vpop.f32.mrf.mxu3  ;;  %v122_v10 = vld [vmem:[%s2485_s0 + $0x360] sm:$0xff] }
 0x101   :  { %v2315_v30 = vadd.f32 %v749_v29, %v706_v23  ;;  %v664_v31 = vpop.f32.mrf.mxu1 }
 0x102   :  { %v665_v33 = vadd.f32 %v664_v31, %v621_v27  ;;  %965 = vmatmul.f32.gmra.mxu0 %v42_v24  ;;  %1053 = vmatmul.f32.gmra.mxu2 %v44_v25  ;;  %v124_v24 = vld [vmem:[%s2485_s0 + $0x370] sm:$0xff] }
 0x104   :  { %1009 = vmatmul.f32.gmra.mxu1 %v43_v32  ;;  %v123_v32 = vld [vmem:[%s2485_s0 + $0x368] sm:$0xff] }
 0x105   :  { %1097 = vmatmul.f32.gmra.mxu3 %v45_v34  ;;  %v708_v36 = vpop.f32.mrf.mxu2  ;;  %v125_v34 = vld [vmem:[%s2485_s0 + $0x378] sm:$0xff] }
 0x106   :  { %v709_v37 = vadd.f32 %v708_v36, %v665_v33 }
 0x107   :  { %v623_v28 = vpop.f32.mrf.mxu0 }
 0x108   :  { %v624_v40 = vadd.f32 %v623_v28, %v2159_v49  ;;  %v752_v41 = vpop.f32.mrf.mxu3  ;;  %v138_v28 = vld [vmem:[%s2485_s0 + $0x3e0] sm:$0xff] }
 0x109   :  { %v2330_v42 = vadd.f32 %v752_v41, %v709_v37  ;;  %v667_v44 = vpop.f32.mrf.mxu1 }
 0x10a   :  { %v668_v46 = vadd.f32 %v667_v44, %v624_v40  ;;  %968 = vmatmul.f32.gmra.mxu0 %v58_v38  ;;  %1056 = vmatmul.f32.gmra.mxu2 %v60_v39  ;;  %v140_v38 = vld [vmem:[%s2485_s0 + $0x3f0] sm:$0xff] }
 0x10c   :  { %1012 = vmatmul.f32.gmra.mxu1 %v59_v45  ;;  %v139_v45 = vld [vmem:[%s2485_s0 + $0x3e8] sm:$0xff] }
 0x10d   :  { %1100 = vmatmul.f32.gmra.mxu3 %v61_v47  ;;  %v711_v48 = vpop.f32.mrf.mxu2  ;;  %v141_v47 = vld [vmem:[%s2485_s0 + $0x3f8] sm:$0xff] }
 0x10e   :  { %v712_v50 = vadd.f32 %v711_v48, %v668_v46 }
 0x10f   :  { %v626_v49 = vpop.f32.mrf.mxu0 }
 0x110   :  { %v627_v52 = vadd.f32 %v626_v49, %v2192_v4  ;;  %v755_v54 = vpop.f32.mrf.mxu3 }
 0x111   :  { %v2345_v55 = vadd.f32 %v755_v54, %v712_v50  ;;  %v670_v57 = vpop.f32.mrf.mxu1 }
 0x112   :  { %v671_v59 = vadd.f32 %v670_v57, %v627_v52  ;;  %971 = vmatmul.f32.gmra.mxu0 %v74_v9  ;;  %1059 = vmatmul.f32.gmra.mxu2 %v76_v51  ;;  %v156_v9 = vld [vmem:[%s2485_s0 + $0x470] sm:$0xff] }
 0x114   :  { %1015 = vmatmul.f32.gmra.mxu1 %v75_v58  ;;  %v155_v58 = vld [vmem:[%s2485_s0 + $0x468] sm:$0xff] }
 0x115   :  { %1103 = vmatmul.f32.gmra.mxu3 %v77_v60  ;;  %v714_v61 = vpop.f32.mrf.mxu2  ;;  %v157_v60 = vld [vmem:[%s2485_s0 + $0x478] sm:$0xff] }
 0x116   :  { %v715_v62 = vadd.f32 %v714_v61, %v671_v59 }
 0x117   :  { %v629_v4 = vpop.f32.mrf.mxu0 }
 0x118   :  { %v630_v0 = vadd.f32 %v629_v4, %v2231_v26  ;;  %v758_v1 = vpop.f32.mrf.mxu3 }
 0x119   :  { %v2360_v2 = vadd.f32 %v758_v1, %v715_v62  ;;  %v673_v5 = vpop.f32.mrf.mxu1 }
 0x11a   :  { %v674_v7 = vadd.f32 %v673_v5, %v630_v0  ;;  %974 = vmatmul.f32.gmra.mxu0 %v90_v63  ;;  %1062 = vmatmul.f32.gmra.mxu2 %v92_v35 }
 0x11c   :  { %1018 = vmatmul.f32.gmra.mxu1 %v91_v6 }
 0x11d   :  { %1106 = vmatmul.f32.gmra.mxu3 %v93_v8  ;;  %v717_v11 = vpop.f32.mrf.mxu2 }
 0x11e   :  { %v718_v12 = vadd.f32 %v717_v11, %v674_v7 }
 0x11f   :  { %v632_v26 = vpop.f32.mrf.mxu0 }
 0x120   :  { %v633_v14 = vadd.f32 %v632_v26, %v2255_v43  ;;  %v761_v15 = vpop.f32.mrf.mxu3 }
 0x121   :  { %v2375_v16 = vadd.f32 %v761_v15, %v718_v12  ;;  %v676_v18 = vpop.f32.mrf.mxu1 }
 0x122   :  { %v677_v20 = vadd.f32 %v676_v18, %v633_v14  ;;  %977 = vmatmul.f32.gmra.mxu0 %v106_v53  ;;  %1065 = vmatmul.f32.gmra.mxu2 %v108_v13 }
 0x124   :  { %1021 = vmatmul.f32.gmra.mxu1 %v107_v19 }
 0x125   :  { %1109 = vmatmul.f32.gmra.mxu3 %v109_v21  ;;  %v720_v22 = vpop.f32.mrf.mxu2 }
 0x126   :  { %v721_v23 = vadd.f32 %v720_v22, %v677_v20 }
 0x127   :  { %v635_v43 = vpop.f32.mrf.mxu0 }
 0x128   :  { %v636_v25 = vadd.f32 %v635_v43, %v2270_v56  ;;  %v764_v27 = vpop.f32.mrf.mxu3 }
 0x129   :  { %v2390_v29 = vadd.f32 %v764_v27, %v721_v23  ;;  %v679_v31 = vpop.f32.mrf.mxu1 }
 0x12a   :  { %v680_v33 = vadd.f32 %v679_v31, %v636_v25  ;;  %980 = vmatmul.f32.gmra.mxu0 %v122_v10  ;;  %1068 = vmatmul.f32.gmra.mxu2 %v124_v24 }
 0x12c   :  { %1024 = vmatmul.f32.gmra.mxu1 %v123_v32 }
 0x12d   :  { %1112 = vmatmul.f32.gmra.mxu3 %v125_v34  ;;  %v723_v36 = vpop.f32.mrf.mxu2 }
 0x12e   :  { %v724_v37 = vadd.f32 %v723_v36, %v680_v33 }
 0x12f   :  { %v787_v56 = vpop.f32.mrf.mxu0 }
 0x130   :  { %v767_v39 = vpop.f32.mrf.mxu3  ;;  %v788_v40 = vadd.f32 %v787_v56, %v2285_v3  ;;  %v154_v3 = vld [vmem:[%s2485_s0 + $0x460] sm:$0xff] }
 0x131   :  { %v2405_v41 = vadd.f32 %v767_v39, %v724_v37  ;;  %v831_v44 = vpop.f32.mrf.mxu1 }
 0x132   :  { %v832_v46 = vadd.f32 %v831_v44, %v788_v40  ;;  %983 = vmatmul.f32.gmra.mxu0 %v138_v28  ;;  %1071 = vmatmul.f32.gmra.mxu2 %v140_v38 }
 0x134   :  { %1027 = vmatmul.f32.gmra.mxu1 %v139_v45 }
 0x135   :  { %1115 = vmatmul.f32.gmra.mxu3 %v141_v47  ;;  %v875_v48 = vpop.f32.mrf.mxu2 }
 0x136   :  { %v876_v50 = vadd.f32 %v875_v48, %v832_v46 }
 0x137   :  { %v790_v49 = vpop.f32.mrf.mxu0 }
 0x138   :  { %v791_v51 = vadd.f32 %v790_v49, %v2300_v17  ;;  %v919_v52 = vpop.f32.mrf.mxu3 }
 0x139   :  { %v2420_v54 = vadd.f32 %v919_v52, %v876_v50  ;;  %v834_v57 = vpop.f32.mrf.mxu1 }
 0x13a   :  { %v835_v59 = vadd.f32 %v834_v57, %v791_v51  ;;  %986 = vmatmul.f32.gmra.mxu0 %v154_v3  ;;  %1074 = vmatmul.f32.gmra.mxu2 %v156_v9 }
 0x13c   :  { %1030 = vmatmul.f32.gmra.mxu1 %v155_v58 }
 0x13d   :  { %1118 = vmatmul.f32.gmra.mxu3 %v157_v60  ;;  %v878_v61 = vpop.f32.mrf.mxu2 }
 0x13e   :  { %v879_v62 = vadd.f32 %v878_v61, %v835_v59 }
 0x13f   :  { %v793_v17 = vpop.f32.mrf.mxu0 }
 0x140   :  { %v794_v4 = vadd.f32 %v793_v17, %v2315_v30  ;;  %v922_v63 = vpop.f32.mrf.mxu3 }
 0x141   :  { %v923_v35 = vadd.f32 %v922_v63, %v879_v62  ;;  %v837_v0 = vpop.f32.mrf.mxu1 }
 0x142   :  { %v838_v1 = vadd.f32 %v837_v0, %v794_v4 }
 0x145   :  { %v881_v5 = vpop.f32.mrf.mxu2 }
 0x146   :  { %v882_v6 = vadd.f32 %v881_v5, %v838_v1 }
 0x147   :  { %v796_v7 = vpop.f32.mrf.mxu0 }
 0x148   :  { %v797_v8 = vadd.f32 %v796_v7, %v2330_v42  ;;  %v925_v11 = vpop.f32.mrf.mxu3 }
 0x149   :  { %v2430_v12 = vadd.f32 %v925_v11, %v882_v6  ;;  %v840_v26 = vpop.f32.mrf.mxu1 }
 0x14a   :  { %v841_v53 = vadd.f32 %v840_v26, %v797_v8 }
 0x14d   :  { %v884_v13 = vpop.f32.mrf.mxu2 }
 0x14e   :  { %v885_v14 = vadd.f32 %v884_v13, %v841_v53 }
 0x14f   :  { %v799_v15 = vpop.f32.mrf.mxu0 }
 0x150   :  { %v800_v18 = vadd.f32 %v799_v15, %v2345_v55  ;;  %v928_v30 = vpop.f32.mrf.mxu3 }
 0x151   :  { %v2433_v19 = vadd.f32 %v928_v30, %v885_v14  ;;  %v843_v20 = vpop.f32.mrf.mxu1 }
 0x152   :  { %v844_v21 = vadd.f32 %v843_v20, %v800_v18 }
 0x155   :  { %v887_v22 = vpop.f32.mrf.mxu2 }
 0x156   :  { %v888_v23 = vadd.f32 %v887_v22, %v844_v21 }
 0x157   :  { %v802_v43 = vpop.f32.mrf.mxu0 }
 0x158   :  { %v803_v42 = vadd.f32 %v802_v43, %v2360_v2  ;;  %v931_v10 = vpop.f32.mrf.mxu3 }
 0x159   :  { %v2436_v24 = vadd.f32 %v931_v10, %v888_v23  ;;  %v846_v25 = vpop.f32.mrf.mxu1 }
 0x15a   :  { %v847_v27 = vadd.f32 %v846_v25, %v803_v42 }
 0x15d   :  { %v890_v31 = vpop.f32.mrf.mxu2 }
 0x15e   :  { %v891_v32 = vadd.f32 %v890_v31, %v847_v27 }
 0x15f   :  { %v805_v33 = vpop.f32.mrf.mxu0 }
 0x160   :  { %v806_v55 = vadd.f32 %v805_v33, %v2375_v16  ;;  %v934_v34 = vpop.f32.mrf.mxu3 }
 0x161   :  { %v2439_v36 = vadd.f32 %v934_v34, %v891_v32  ;;  %v849_v37 = vpop.f32.mrf.mxu1 }
 0x162   :  { %v850_v56 = vadd.f32 %v849_v37, %v806_v55 }
 0x165   :  { %v893_v28 = vpop.f32.mrf.mxu2 }
 0x166   :  { %v894_v38 = vadd.f32 %v893_v28, %v850_v56 }
 0x167   :  { %v808_v39 = vpop.f32.mrf.mxu0 }
 0x168   :  { %v809_v2 = vadd.f32 %v808_v39, %v2390_v29  ;;  %v937_v40 = vpop.f32.mrf.mxu3 }
 0x169   :  { %v2442_v44 = vadd.f32 %v937_v40, %v894_v38  ;;  %v852_v45 = vpop.f32.mrf.mxu1 }
 0x16a   :  { %v853_v46 = vadd.f32 %v852_v45, %v809_v2 }
 0x16d   :  { %v896_v47 = vpop.f32.mrf.mxu2 }
 0x16e   :  { %v897_v48 = vadd.f32 %v896_v47, %v853_v46 }
 0x16f   :  { %v811_v50 = vpop.f32.mrf.mxu0 }
 0x170   :  { %v812_v16 = vadd.f32 %v811_v50, %v2405_v41  ;;  %v940_v49 = vpop.f32.mrf.mxu3 }
 0x171   :  { %v2445_v3 = vadd.f32 %v940_v49, %v897_v48  ;;  %v855_v9 = vpop.f32.mrf.mxu1 }
 0x172   :  { %v856_v51 = vadd.f32 %v855_v9, %v812_v16 }
 0x175   :  { %v899_v52 = vpop.f32.mrf.mxu2 }
 0x176   :  { %v900_v57 = vadd.f32 %v899_v52, %v856_v51 }
 0x177   :  { %v963_v58 = vpop.f32.mrf.mxu0 }
 0x178   :  { %v943_v59 = vpop.f32.mrf.mxu3  ;;  %v964_v29 = vadd.f32 %v963_v58, %v2420_v54 }
 0x179   :  { %v2448_v60 = vadd.f32 %v943_v59, %v900_v57  ;;  %v1007_v61 = vpop.f32.mrf.mxu1 }
 0x17a   :  { %v1008_v62 = vadd.f32 %v1007_v61, %v964_v29 }
 0x17d   :  { %v1051_v17 = vpop.f32.mrf.mxu2 }
 0x17e   :  { %v1052_v4 = vadd.f32 %v1051_v17, %v1008_v62 }
 0x17f   :  { %v966_v63 = vpop.f32.mrf.mxu0 }
 0x180   :  { %v967_v0 = vadd.f32 %v966_v63, %v923_v35  ;;  %v1095_v41 = vpop.f32.mrf.mxu3 }
 0x181   :  { %v1096_v1 = vadd.f32 %v1095_v41, %v1052_v4  ;;  %v1010_v5 = vpop.f32.mrf.mxu1 }
 0x182   :  { %v1011_v7 = vadd.f32 %v1010_v5, %v967_v0 }
 0x183   :  { %v1122_v6 = vmax.f32 %v1096_v1, 0.0 }
 0x185   :  { %1131 = vst [vmem:[%s2487_s3] sm:$0xff] %v1122_v6  ;;  %v1054_v8 = vpop.f32.mrf.mxu2 }
 0x186   :  { %v1055_v11 = vadd.f32 %v1054_v8, %v1011_v7 }
 0x187   :  { %v969_v54 = vpop.f32.mrf.mxu0 }
 0x188   :  { %v970_v26 = vadd.f32 %v969_v54, %v2430_v12  ;;  %v1098_v53 = vpop.f32.mrf.mxu3 }
 0x189   :  { %v1099_v13 = vadd.f32 %v1098_v53, %v1055_v11  ;;  %v1013_v14 = vpop.f32.mrf.mxu1 }
 0x18a   :  { %v1014_v18 = vadd.f32 %v1013_v14, %v970_v26 }
 0x18b   :  { %v1123_v15 = vmax.f32 %v1099_v13, 0.0 }
 0x18d   :  { %1132 = vst [vmem:[%s2487_s3 + $0x8] sm:$0xff] %v1123_v15  ;;  %v1057_v35 = vpop.f32.mrf.mxu2 }
 0x18e   :  { %v1058_v30 = vadd.f32 %v1057_v35, %v1014_v18 }
 0x18f   :  { %v972_v20 = vpop.f32.mrf.mxu0 }
 0x190   :  { %v973_v21 = vadd.f32 %v972_v20, %v2433_v19  ;;  %v1101_v22 = vpop.f32.mrf.mxu3 }
 0x191   :  { %v1102_v23 = vadd.f32 %v1101_v22, %v1058_v30  ;;  %v1016_v43 = vpop.f32.mrf.mxu1 }
 0x192   :  { %v1017_v10 = vadd.f32 %v1016_v43, %v973_v21 }
 0x193   :  { %v1124_v42 = vmax.f32 %v1102_v23, 0.0 }
 0x195   :  { %1133 = vst [vmem:[%s2487_s3 + $0x10] sm:$0xff] %v1124_v42  ;;  %v1060_v12 = vpop.f32.mrf.mxu2 }
 0x196   :  { %v1061_v25 = vadd.f32 %v1060_v12, %v1017_v10 }
 0x197   :  { %v975_v27 = vpop.f32.mrf.mxu0 }
 0x198   :  { %v976_v31 = vadd.f32 %v975_v27, %v2436_v24  ;;  %v1104_v32 = vpop.f32.mrf.mxu3 }
 0x199   :  { %v1105_v33 = vadd.f32 %v1104_v32, %v1061_v25  ;;  %v1019_v55 = vpop.f32.mrf.mxu1 }
 0x19a   :  { %v1020_v37 = vadd.f32 %v1019_v55, %v976_v31 }
 0x19b   :  { %v1125_v34 = vmax.f32 %v1105_v33, 0.0 }
 0x19d   :  { %1134 = vst [vmem:[%s2487_s3 + $0x18] sm:$0xff] %v1125_v34  ;;  %v1063_v19 = vpop.f32.mrf.mxu2 }
 0x19e   :  { %v1064_v56 = vadd.f32 %v1063_v19, %v1020_v37 }
 0x19f   :  { %v978_v28 = vpop.f32.mrf.mxu0 }
 0x1a0   :  { %v979_v38 = vadd.f32 %v978_v28, %v2439_v36  ;;  %v1107_v39 = vpop.f32.mrf.mxu3 }
 0x1a1   :  { %v1108_v2 = vadd.f32 %v1107_v39, %v1064_v56  ;;  %v1022_v40 = vpop.f32.mrf.mxu1 }
 0x1a2   :  { %v1023_v46 = vadd.f32 %v1022_v40, %v979_v38 }
 0x1a3   :  { %v1126_v45 = vmax.f32 %v1108_v2, 0.0 }
 0x1a5   :  { %1135 = vst [vmem:[%s2487_s3 + $0x20] sm:$0xff] %v1126_v45  ;;  %v1066_v24 = vpop.f32.mrf.mxu2 }
 0x1a6   :  { %v1067_v47 = vadd.f32 %v1066_v24, %v1023_v46 }
 0x1a7   :  { %v981_v48 = vpop.f32.mrf.mxu0 }
 0x1a8   :  { %v982_v50 = vadd.f32 %v981_v48, %v2442_v44  ;;  %v1110_v16 = vpop.f32.mrf.mxu3 }
 0x1a9   :  { %v1111_v49 = vadd.f32 %v1110_v16, %v1067_v47  ;;  %v1025_v9 = vpop.f32.mrf.mxu1 }
 0x1aa   :  { %v1026_v52 = vadd.f32 %v1025_v9, %v982_v50 }
 0x1ab   :  { %v1127_v51 = vmax.f32 %v1111_v49, 0.0 }
 0x1ad   :  { %1136 = vst [vmem:[%s2487_s3 + $0x28] sm:$0xff] %v1127_v51  ;;  %v1069_v36 = vpop.f32.mrf.mxu2 }
 0x1ae   :  { %v1070_v57 = vadd.f32 %v1069_v36, %v1026_v52 }
 0x1af   :  { %v984_v58 = vpop.f32.mrf.mxu0 }
 0x1b0   :  { %v985_v59 = vadd.f32 %v984_v58, %v2445_v3  ;;  %v1113_v29 = vpop.f32.mrf.mxu3 }
 0x1b1   :  { %v1114_v61 = vadd.f32 %v1113_v29, %v1070_v57  ;;  %v1028_v62 = vpop.f32.mrf.mxu1 }
 0x1b2   :  { %v1029_v4 = vadd.f32 %v1028_v62, %v985_v59 }
 0x1b3   :  { %v1128_v17 = vmax.f32 %v1114_v61, 0.0 }
 0x1b5   :  { %1137 = vst [vmem:[%s2487_s3 + $0x30] sm:$0xff] %v1128_v17  ;;  %v1072_v44 = vpop.f32.mrf.mxu2 }
 0x1b6   :  { %v1073_v63 = vadd.f32 %v1072_v44, %v1029_v4 }
 0x1b7   :  { %v987_v0 = vpop.f32.mrf.mxu0 }
 0x1b8   :  { %v988_v41 = vadd.f32 %v987_v0, %v2448_v60  ;;  %v1116_v1 = vpop.f32.mrf.mxu3 }
 0x1b9   :  { %v1117_v5 = vadd.f32 %v1116_v1, %v1073_v63  ;;  %v1031_v6 = vpop.f32.mrf.mxu1 }
 0x1ba   :  { %v1032_v8 = vadd.f32 %v1031_v6, %v988_v41 }
 0x1bb   :  { %v1129_v7 = vmax.f32 %v1117_v5, 0.0 }
 0x1bd   :  { %1138 = vst [vmem:[%s2487_s3 + $0x38] sm:$0xff] %v1129_v7  ;;  %v1075_v3 = vpop.f32.mrf.mxu2 }
 0x1be   :  { %v1076_v11 = vadd.f32 %v1075_v3, %v1032_v8 }
 0x1c0   :  { %v1119_v54 = vpop.f32.mrf.mxu3 }
 0x1c1   :  { %v1120_v26 = vadd.f32 %v1119_v54, %v1076_v11 }
 0x1c3   :  { %v1130_v53 = vmax.f32 %v1120_v26, 0.0 }
 0x1c5   :  { %1139 = vst [vmem:[%s2487_s3 + $0x40] sm:$0xff] %v1130_v53 }

// kernel: nature_cnn_forward.5
= control target key start
LH: loop header
LB: loop body
LE: loop exit
PB: predicated region body
PF: predicated region fallthrough
CT: control target
= control target key end

     0   :  { %vm71_vm0 = vcmask 1046528   ;;  %vm67_vm1 = vcmask 187392   ;;  %vm1700_vm2 = vcmask 523264   ;;  %s4457_s4 = inlined_call_operand.vmem [shape: f32[23,512], index: 4, kind: input, shape index: {}]   ;;  %s4458_s1 = inlined_call_operand.vmem [shape: f32[8,23], index: 1, kind: input, shape index: {}]   ;;  %s4459_s6 = inlined_call_operand.vmem [shape: f32[512,512], index: 6, kind: input, shape index: {}]   ;;  %s4460_s5 = inlined_call_operand.vmem [shape: f32[1,512], index: 5, kind: input, shape index: {}]   ;;  %s4461_s2 = inlined_call_operand.vmem [shape: f32[1152,64], index: 2, kind: input, shape index: {}]   ;;  %s4462_s0 = inlined_call_operand.vmem [shape: f32[8,1152], index: 0, kind: input, shape index: {}]   ;;  %s4463_s9 = inlined_call_operand.vmem [shape: f32[512,512], index: 9, kind: input, shape index: {}]   ;;  %s4464_s3 = inlined_call_operand.vmem [shape: f32[1,64], index: 3, kind: input, shape index: {}]   ;;  %s4465_s7 = inlined_call_operand.vmem [shape: f32[1,512], index: 7, kind: input, shape index: {}]   ;;  %s4466_s8 = inlined_call_operand.vmem [shape: f32[64,512], index: 8, kind: input, shape index: {}]   ;;  %s4467_s12 = inlined_call_operand.vmem [shape: f32[1,128], index: 12, kind: input, shape index: {}]   ;;  %s4468_s11 = inlined_call_operand.vmem [shape: f32[512,128], index: 11, kind: input, shape index: {}]   ;;  %s4469_s10 = inlined_call_operand.vmem [shape: f32[1,512], index: 10, kind: input, shape index: {}]   ;;  %s4470_s13 = inlined_call_operand.vmem [shape: f32[8,128], index: 13, kind: output, shape index: {}]  }
   0x1   :  { %v53_v0 = vld [vmem:[%s4457_s4 + $0x40] sm:$0x7f]  ;;  %v54_v1 = vld [vmem:[%s4457_s4 + $0x48] sm:$0x7f]  ;;  %v55_v7 = vld [vmem:[%s4457_s4 + $0x50] sm:$0x7f] }
   0x2   :  { %v49_v2 = vld [vmem:[%s4457_s4 + $0x20] sm:$0xff]  ;;  %1955 = vmatpush.msk.msra.mxu2 %vm71_vm0, %v53_v0  ;;  %1957 = vmatpush.msk.msra.mxu3 %vm71_vm0, %v54_v1  ;;  %v50_v3 = vld [vmem:[%s4457_s4 + $0x28] sm:$0xff]  ;;  %v56_v8 = vld [vmem:[%s4457_s4 + $0x58] sm:$0x7f] }
   0x3   :  { %v45_v4 = vld [vmem:[%s4457_s4] sm:$0xff]  ;;  %v46_v5 = vld [vmem:[%s4457_s4 + $0x8] sm:$0xff]  ;;  %v51_v11 = vld [vmem:[%s4457_s4 + $0x30] sm:$0xff] }
   0x4   :  { %98 = vmatpush.msra.mxu2 %v49_v2  ;;  %118 = vmatpush.msra.mxu3 %v50_v3  ;;  %v44_v6 = vld [vmem:[%s4458_s1] sm:$0xff]  ;;  %v52_v12 = vld [vmem:[%s4457_s4 + $0x38] sm:$0xff]  ;;  %v47_v15 = vld [vmem:[%s4457_s4 + $0x10] sm:$0xff] }
   0x5   :  { %v228_v9 = vld [vmem:[%s4459_s6 + $0x1e0] sm:$0xff]  ;;  %v48_v16 = vld [vmem:[%s4457_s4 + $0x18] sm:$0xff] }
   0x6   :  { %99 = vmatpush.msra.mxu2 %v45_v4  ;;  %119 = vmatpush.msra.mxu3 %v46_v5  ;;  %v292_v10 = vld [vmem:[%s4459_s6 + $0x3e0] sm:$0xff] }
   0x7   :  { %1956 = vmatmul.msk.f32.vlgmr.msra.gmra.mxu2 %vm67_vm1, %v44_v6  ;;  %1958 = vmatmul.msk.f32.vlgmr.msra.gmra.mxu3 %vm67_vm1, %v44_v6  ;;  %v224_v13 = vld [vmem:[%s4459_s6 + $0x1c0] sm:$0xff] }
   0x8   :  { %1959 = vmatpush.msk.msrb.mxu2 %vm71_vm0, %v55_v7  ;;  %1961 = vmatpush.msk.msrb.mxu3 %vm71_vm0, %v56_v8  ;;  %v288_v14 = vld [vmem:[%s4459_s6 + $0x3c0] sm:$0xff]  ;;  %v229_v7 = vld [vmem:[%s4459_s6 + $0x1e8] sm:$0xff] }
   0x9   :  { %434 = vmatpush.msra.mxu0 %v228_v9  ;;  %454 = vmatpush.msra.mxu1 %v292_v10  ;;  %v220_v17 = vld [vmem:[%s4459_s6 + $0x1a0] sm:$0xff]  ;;  %v293_v8 = vld [vmem:[%s4459_s6 + $0x3e8] sm:$0xff] }
   0xa   :  { %138 = vmatpush.msrb.mxu2 %v51_v11  ;;  %158 = vmatpush.msrb.mxu3 %v52_v12  ;;  %v284_v18 = vld [vmem:[%s4459_s6 + $0x3a0] sm:$0xff]  ;;  %v225_v11 = vld [vmem:[%s4459_s6 + $0x1c8] sm:$0xff] }
   0xb   :  { %435 = vmatpush.msra.mxu0 %v224_v13  ;;  %455 = vmatpush.msra.mxu1 %v288_v14  ;;  %v356_v19 = vld [vmem:[%s4459_s6 + $0x5e0] sm:$0xff]  ;;  %v289_v12 = vld [vmem:[%s4459_s6 + $0x3c8] sm:$0xff] }
   0xc   :  { %v420_v20 = vld [vmem:[%s4459_s6 + $0x7e0] sm:$0xff]  ;;  %139 = vmatpush.msrb.mxu2 %v47_v15  ;;  %159 = vmatpush.msrb.mxu3 %v48_v16  ;;  %v221_v15 = vld [vmem:[%s4459_s6 + $0x1a8] sm:$0xff] }
   0xd   :  { %436 = vmatpush.msra.mxu0 %v220_v17  ;;  %456 = vmatpush.msra.mxu1 %v284_v18  ;;  %v216_v21 = vld [vmem:[%s4459_s6 + $0x180] sm:$0xff]  ;;  %v285_v16 = vld [vmem:[%s4459_s6 + $0x3a8] sm:$0xff] }
   0xe   :  { %v280_v22 = vld [vmem:[%s4459_s6 + $0x380] sm:$0xff]  ;;  %474 = vmatpush.msra.mxu2 %v356_v19  ;;  %494 = vmatpush.msra.mxu3 %v420_v20  ;;  %v217_v19 = vld [vmem:[%s4459_s6 + $0x188] sm:$0xff] }
   0xf   :  { %v352_v23 = vld [vmem:[%s4459_s6 + $0x5c0] sm:$0xff]  ;;  %1960 = vmatmul.msk.f32.vlgmr.msrb.gmra.mxu2 %vm67_vm1, %v44_v6  ;;  %1962 = vmatmul.msk.f32.vlgmr.msrb.gmra.mxu3 %vm67_vm1, %v44_v6  ;;  %v281_v20 = vld [vmem:[%s4459_s6 + $0x388] sm:$0xff] }
  0x10   :  { %v416_v24 = vld [vmem:[%s4459_s6 + $0x7c0] sm:$0xff]  ;;  %437 = vmatpush.msra.mxu0 %v216_v21  ;;  %457 = vmatpush.msra.mxu1 %v280_v22  ;;  %v357_v21 = vld [vmem:[%s4459_s6 + $0x5e8] sm:$0xff] }
  0x11   :  { %v212_v25 = vld [vmem:[%s4459_s6 + $0x160] sm:$0xff]  ;;  %475 = vmatpush.msra.mxu2 %v352_v23  ;;  %495 = vmatpush.msra.mxu3 %v416_v24  ;;  %v421_v22 = vld [vmem:[%s4459_s6 + $0x7e8] sm:$0xff] }
  0x12   :  { %v276_v26 = vld [vmem:[%s4459_s6 + $0x360] sm:$0xff]  ;;  %438 = vmatpush.msra.mxu0 %v212_v25  ;;  %v213_v23 = vld [vmem:[%s4459_s6 + $0x168] sm:$0xff] }
  0x13   :  { %v348_v27 = vld [vmem:[%s4459_s6 + $0x5a0] sm:$0xff]  ;;  %458 = vmatpush.msra.mxu1 %v276_v26  ;;  %v277_v24 = vld [vmem:[%s4459_s6 + $0x368] sm:$0xff] }
  0x14   :  { %v412_v28 = vld [vmem:[%s4459_s6 + $0x7a0] sm:$0xff]  ;;  %476 = vmatpush.msra.mxu2 %v348_v27  ;;  %v353_v25 = vld [vmem:[%s4459_s6 + $0x5c8] sm:$0xff] }
  0x15   :  { %v208_v29 = vld [vmem:[%s4459_s6 + $0x140] sm:$0xff]  ;;  %496 = vmatpush.msra.mxu3 %v412_v28  ;;  %v417_v26 = vld [vmem:[%s4459_s6 + $0x7c8] sm:$0xff] }
  0x16   :  { %v272_v30 = vld [vmem:[%s4459_s6 + $0x340] sm:$0xff]  ;;  %439 = vmatpush.msra.mxu0 %v208_v29  ;;  %v209_v27 = vld [vmem:[%s4459_s6 + $0x148] sm:$0xff] }
  0x17   :  { %v344_v31 = vld [vmem:[%s4459_s6 + $0x580] sm:$0xff]  ;;  %459 = vmatpush.msra.mxu1 %v272_v30  ;;  %v273_v28 = vld [vmem:[%s4459_s6 + $0x348] sm:$0xff] }
  0x18   :  { %v408_v32 = vld [vmem:[%s4459_s6 + $0x780] sm:$0xff]  ;;  %477 = vmatpush.msra.mxu2 %v344_v31  ;;  %v349_v29 = vld [vmem:[%s4459_s6 + $0x5a8] sm:$0xff] }
  0x19   :  { %v204_v33 = vld [vmem:[%s4459_s6 + $0x120] sm:$0xff]  ;;  %497 = vmatpush.msra.mxu3 %v408_v32  ;;  %v413_v30 = vld [vmem:[%s4459_s6 + $0x7a8] sm:$0xff] }
  0x1a   :  { %v268_v34 = vld [vmem:[%s4459_s6 + $0x320] sm:$0xff]  ;;  %440 = vmatpush.msra.mxu0 %v204_v33  ;;  %v205_v31 = vld [vmem:[%s4459_s6 + $0x128] sm:$0xff] }
  0x1b   :  { %v340_v35 = vld [vmem:[%s4459_s6 + $0x560] sm:$0xff]  ;;  %460 = vmatpush.msra.mxu1 %v268_v34  ;;  %v269_v32 = vld [vmem:[%s4459_s6 + $0x328] sm:$0xff] }
  0x1c   :  { %v404_v36 = vld [vmem:[%s4459_s6 + $0x760] sm:$0xff]  ;;  %478 = vmatpush.msra.mxu2 %v340_v35  ;;  %v345_v33 = vld [vmem:[%s4459_s6 + $0x588] sm:$0xff] }
  0x1d   :  { %v200_v37 = vld [vmem:[%s4459_s6 + $0x100] sm:$0xff]  ;;  %498 = vmatpush.msra.mxu3 %v404_v36  ;;  %v409_v34 = vld [vmem:[%s4459_s6 + $0x788] sm:$0xff] }
  0x1e   :  { %v264_v38 = vld [vmem:[%s4459_s6 + $0x300] sm:$0xff]  ;;  %441 = vmatpush.msra.mxu0 %v200_v37  ;;  %v201_v35 = vld [vmem:[%s4459_s6 + $0x108] sm:$0xff] }
  0x1f   :  { %v336_v39 = vld [vmem:[%s4459_s6 + $0x540] sm:$0xff]  ;;  %461 = vmatpush.msra.mxu1 %v264_v38  ;;  %v265_v36 = vld [vmem:[%s4459_s6 + $0x308] sm:$0xff] }
  0x20   :  { %v400_v40 = vld [vmem:[%s4459_s6 + $0x740] sm:$0xff]  ;;  %479 = vmatpush.msra.mxu2 %v336_v39  ;;  %v341_v37 = vld [vmem:[%s4459_s6 + $0x568] sm:$0xff] }
  0x21   :  { %v196_v41 = vld [vmem:[%s4459_s6 + $0xe0] sm:$0xff]  ;;  %499 = vmatpush.msra.mxu3 %v400_v40  ;;  %v405_v38 = vld [vmem:[%s4459_s6 + $0x768] sm:$0xff] }
  0x22   :  { %v260_v42 = vld [vmem:[%s4459_s6 + $0x2e0] sm:$0xff]  ;;  %442 = vmatpush.msra.mxu0 %v196_v41  ;;  %v197_v39 = vld [vmem:[%s4459_s6 + $0xe8] sm:$0xff] }
  0x23   :  { %v332_v43 = vld [vmem:[%s4459_s6 + $0x520] sm:$0xff]  ;;  %462 = vmatpush.msra.mxu1 %v260_v42  ;;  %v261_v40 = vld [vmem:[%s4459_s6 + $0x2e8] sm:$0xff] }
  0x24   :  { %v396_v44 = vld [vmem:[%s4459_s6 + $0x720] sm:$0xff]  ;;  %480 = vmatpush.msra.mxu2 %v332_v43  ;;  %v337_v41 = vld [vmem:[%s4459_s6 + $0x548] sm:$0xff] }
  0x25   :  { %v192_v45 = vld [vmem:[%s4459_s6 + $0xc0] sm:$0xff]  ;;  %500 = vmatpush.msra.mxu3 %v396_v44  ;;  %v401_v42 = vld [vmem:[%s4459_s6 + $0x748] sm:$0xff] }
  0x26   :  { %v256_v46 = vld [vmem:[%s4459_s6 + $0x2c0] sm:$0xff]  ;;  %443 = vmatpush.msra.mxu0 %v192_v45  ;;  %v193_v43 = vld [vmem:[%s4459_s6 + $0xc8] sm:$0xff] }
  0x27   :  { %v328_v47 = vld [vmem:[%s4459_s6 + $0x500] sm:$0xff]  ;;  %463 = vmatpush.msra.mxu1 %v256_v46  ;;  %v257_v44 = vld [vmem:[%s4459_s6 + $0x2c8] sm:$0xff] }
  0x28   :  { %v392_v48 = vld [vmem:[%s4459_s6 + $0x700] sm:$0xff]  ;;  %481 = vmatpush.msra.mxu2 %v328_v47  ;;  %v333_v45 = vld [vmem:[%s4459_s6 + $0x528] sm:$0xff] }
  0x29   :  { %v188_v49 = vld [vmem:[%s4459_s6 + $0xa0] sm:$0xff]  ;;  %501 = vmatpush.msra.mxu3 %v392_v48  ;;  %v397_v46 = vld [vmem:[%s4459_s6 + $0x728] sm:$0xff] }
  0x2a   :  { %v252_v50 = vld [vmem:[%s4459_s6 + $0x2a0] sm:$0xff]  ;;  %444 = vmatpush.msra.mxu0 %v188_v49  ;;  %v189_v47 = vld [vmem:[%s4459_s6 + $0xa8] sm:$0xff] }
  0x2b   :  { %v324_v51 = vld [vmem:[%s4459_s6 + $0x4e0] sm:$0xff]  ;;  %464 = vmatpush.msra.mxu1 %v252_v50  ;;  %v253_v48 = vld [vmem:[%s4459_s6 + $0x2a8] sm:$0xff] }
  0x2c   :  { %v388_v52 = vld [vmem:[%s4459_s6 + $0x6e0] sm:$0xff]  ;;  %482 = vmatpush.msra.mxu2 %v324_v51  ;;  %v329_v49 = vld [vmem:[%s4459_s6 + $0x508] sm:$0xff] }
  0x2d   :  { %v184_v53 = vld [vmem:[%s4459_s6 + $0x80] sm:$0xff]  ;;  %502 = vmatpush.msra.mxu3 %v388_v52  ;;  %v393_v50 = vld [vmem:[%s4459_s6 + $0x708] sm:$0xff] }
  0x2e   :  { %v248_v54 = vld [vmem:[%s4459_s6 + $0x280] sm:$0xff]  ;;  %445 = vmatpush.msra.mxu0 %v184_v53  ;;  %v185_v51 = vld [vmem:[%s4459_s6 + $0x88] sm:$0xff] }
  0x2f   :  { %v320_v55 = vld [vmem:[%s4459_s6 + $0x4c0] sm:$0xff]  ;;  %465 = vmatpush.msra.mxu1 %v248_v54  ;;  %v249_v52 = vld [vmem:[%s4459_s6 + $0x288] sm:$0xff] }
  0x30   :  { %v384_v56 = vld [vmem:[%s4459_s6 + $0x6c0] sm:$0xff]  ;;  %483 = vmatpush.msra.mxu2 %v320_v55  ;;  %v325_v53 = vld [vmem:[%s4459_s6 + $0x4e8] sm:$0xff] }
  0x31   :  { %v180_v57 = vld [vmem:[%s4459_s6 + $0x60] sm:$0xff]  ;;  %503 = vmatpush.msra.mxu3 %v384_v56  ;;  %v389_v54 = vld [vmem:[%s4459_s6 + $0x6e8] sm:$0xff] }
  0x32   :  { %v244_v58 = vld [vmem:[%s4459_s6 + $0x260] sm:$0xff]  ;;  %446 = vmatpush.msra.mxu0 %v180_v57  ;;  %v181_v55 = vld [vmem:[%s4459_s6 + $0x68] sm:$0xff] }
  0x33   :  { %v316_v59 = vld [vmem:[%s4459_s6 + $0x4a0] sm:$0xff]  ;;  %466 = vmatpush.msra.mxu1 %v244_v58  ;;  %v245_v56 = vld [vmem:[%s4459_s6 + $0x268] sm:$0xff] }
  0x34   :  { %v380_v60 = vld [vmem:[%s4459_s6 + $0x6a0] sm:$0xff]  ;;  %484 = vmatpush.msra.mxu2 %v316_v59  ;;  %v177_v57 = vld [vmem:[%s4459_s6 + $0x48] sm:$0xff] }
  0x35   :  { %v176_v61 = vld [vmem:[%s4459_s6 + $0x40] sm:$0xff]  ;;  %504 = vmatpush.msra.mxu3 %v380_v60  ;;  %v241_v58 = vld [vmem:[%s4459_s6 + $0x248] sm:$0xff] }
  0x36   :  { %v240_v62 = vld [vmem:[%s4459_s6 + $0x240] sm:$0xff]  ;;  %447 = vmatpush.msra.mxu0 %v176_v61  ;;  %v321_v59 = vld [vmem:[%s4459_s6 + $0x4c8] sm:$0xff] }
  0x37   :  { %v312_v63 = vld [vmem:[%s4459_s6 + $0x480] sm:$0xff]  ;;  %467 = vmatpush.msra.mxu1 %v240_v62  ;;  %v385_v60 = vld [vmem:[%s4459_s6 + $0x6c8] sm:$0xff] }
  0x38   :  { %v376_v0 = vld [vmem:[%s4459_s6 + $0x680] sm:$0xff]  ;;  %485 = vmatpush.msra.mxu2 %v312_v63  ;;  %v173_v61 = vld [vmem:[%s4459_s6 + $0x28] sm:$0xff] }
  0x39   :  { %v172_v1 = vld [vmem:[%s4459_s6 + $0x20] sm:$0xff]  ;;  %505 = vmatpush.msra.mxu3 %v376_v0  ;;  %v237_v62 = vld [vmem:[%s4459_s6 + $0x228] sm:$0xff] }
  0x3a   :  { %v236_v2 = vld [vmem:[%s4459_s6 + $0x220] sm:$0xff]  ;;  %448 = vmatpush.msra.mxu0 %v172_v1  ;;  %v317_v63 = vld [vmem:[%s4459_s6 + $0x4a8] sm:$0xff] }
  0x3b   :  { %v308_v3 = vld [vmem:[%s4459_s6 + $0x460] sm:$0xff]  ;;  %468 = vmatpush.msra.mxu1 %v236_v2  ;;  %v381_v0 = vld [vmem:[%s4459_s6 + $0x6a8] sm:$0xff] }
  0x3c   :  { %v372_v4 = vld [vmem:[%s4459_s6 + $0x660] sm:$0xff]  ;;  %486 = vmatpush.msra.mxu2 %v308_v3  ;;  %v169_v1 = vld [vmem:[%s4459_s6 + $0x8] sm:$0xff] }
  0x3d   :  { %v168_v5 = vld [vmem:[%s4459_s6] sm:$0xff]  ;;  %506 = vmatpush.msra.mxu3 %v372_v4  ;;  %v233_v2 = vld [vmem:[%s4459_s6 + $0x208] sm:$0xff] }
  0x3e   :  { %v232_v6 = vld [vmem:[%s4459_s6 + $0x200] sm:$0xff]  ;;  %449 = vmatpush.msra.mxu0 %v168_v5  ;;  %v313_v3 = vld [vmem:[%s4459_s6 + $0x488] sm:$0xff] }
  0x3f   :  { %v304_v9 = vld [vmem:[%s4459_s6 + $0x440] sm:$0xff]  ;;  %469 = vmatpush.msra.mxu1 %v232_v6  ;;  %v377_v4 = vld [vmem:[%s4459_s6 + $0x688] sm:$0xff] }
  0x40   :  { %v368_v10 = vld [vmem:[%s4459_s6 + $0x640] sm:$0xff]  ;;  %514 = vmatpush.msrb.mxu0 %v229_v7  ;;  %487 = vmatpush.msra.mxu2 %v304_v9  ;;  %v309_v5 = vld [vmem:[%s4459_s6 + $0x468] sm:$0xff] }
  0x41   :  { %534 = vmatpush.msrb.mxu1 %v293_v8  ;;  %v300_v13 = vld [vmem:[%s4459_s6 + $0x420] sm:$0xff]  ;;  %507 = vmatpush.msra.mxu3 %v368_v10  ;;  %v373_v6 = vld [vmem:[%s4459_s6 + $0x668] sm:$0xff] }
  0x42   :  { %v364_v14 = vld [vmem:[%s4459_s6 + $0x620] sm:$0xff]  ;;  %515 = vmatpush.msrb.mxu0 %v225_v11  ;;  %488 = vmatpush.msra.mxu2 %v300_v13  ;;  %v305_v7 = vld [vmem:[%s4459_s6 + $0x448] sm:$0xff] }
  0x43   :  { %535 = vmatpush.msrb.mxu1 %v289_v12  ;;  %v296_v17 = vld [vmem:[%s4459_s6 + $0x400] sm:$0xff]  ;;  %508 = vmatpush.msra.mxu3 %v364_v14  ;;  %v369_v8 = vld [vmem:[%s4459_s6 + $0x648] sm:$0xff] }
  0x44   :  { %v360_v18 = vld [vmem:[%s4459_s6 + $0x600] sm:$0xff]  ;;  %516 = vmatpush.msrb.mxu0 %v221_v15  ;;  %489 = vmatpush.msra.mxu2 %v296_v17  ;;  %v301_v9 = vld [vmem:[%s4459_s6 + $0x428] sm:$0xff] }
  0x45   :  { %536 = vmatpush.msrb.mxu1 %v285_v16  ;;  %509 = vmatpush.msra.mxu3 %v360_v18  ;;  %v365_v10 = vld [vmem:[%s4459_s6 + $0x628] sm:$0xff]  ;;  %v57_v13 = vld [vmem:[%s4460_s5] sm:$0xf] }
  0x46   :  { %517 = vmatpush.msrb.mxu0 %v217_v19  ;;  %554 = vmatpush.msrb.mxu2 %v357_v21  ;;  %v297_v11 = vld [vmem:[%s4459_s6 + $0x408] sm:$0xff]  ;;  %v59_v14 = vperm.slane %v57_v13, 0  ;;  %v60_v15 = vperm.slane %v57_v13, 1 }
  0x47   :  { %537 = vmatpush.msrb.mxu1 %v281_v20  ;;  %574 = vmatpush.msrb.mxu3 %v421_v22  ;;  %v361_v12 = vld [vmem:[%s4459_s6 + $0x608] sm:$0xff]  ;;  %v230_v22 = vld [vmem:[%s4459_s6 + $0x1f0] sm:$0xff] }
  0x48   :  { %518 = vmatpush.msrb.mxu0 %v213_v23  ;;  %555 = vmatpush.msrb.mxu2 %v353_v25  ;;  %v294_v23 = vld [vmem:[%s4459_s6 + $0x3f0] sm:$0xff] }
  0x49   :  { %538 = vmatpush.msrb.mxu1 %v277_v24  ;;  %575 = vmatpush.msrb.mxu3 %v417_v26  ;;  %v226_v24 = vld [vmem:[%s4459_s6 + $0x1d0] sm:$0xff]  ;;  %v61_v26 = vperm.slane %v57_v13, 2 }
  0x4a   :  { %519 = vmatpush.msrb.mxu0 %v209_v27  ;;  %556 = vmatpush.msrb.mxu2 %v349_v29  ;;  %v290_v25 = vld [vmem:[%s4459_s6 + $0x3d0] sm:$0xff]  ;;  %v62_v27 = vperm.slane %v57_v13, 3 }
  0x4b   :  { %539 = vmatpush.msrb.mxu1 %v273_v28  ;;  %576 = vmatpush.msrb.mxu3 %v413_v30  ;;  %v222_v28 = vld [vmem:[%s4459_s6 + $0x1b0] sm:$0xff] }
  0x4c   :  { %520 = vmatpush.msrb.mxu0 %v205_v31  ;;  %557 = vmatpush.msrb.mxu2 %v345_v33  ;;  %v286_v29 = vld [vmem:[%s4459_s6 + $0x3b0] sm:$0xff] }
  0x4d   :  { %540 = vmatpush.msrb.mxu1 %v269_v32  ;;  %577 = vmatpush.msrb.mxu3 %v409_v34  ;;  %v218_v34 = vld [vmem:[%s4459_s6 + $0x190] sm:$0xff] }
  0x4e   :  { %521 = vmatpush.msrb.mxu0 %v201_v35  ;;  %558 = vmatpush.msrb.mxu2 %v341_v37  ;;  %v282_v35 = vld [vmem:[%s4459_s6 + $0x390] sm:$0xff] }
  0x4f   :  { %541 = vmatpush.msrb.mxu1 %v265_v36  ;;  %578 = vmatpush.msrb.mxu3 %v405_v38  ;;  %v278_v38 = vld [vmem:[%s4459_s6 + $0x370] sm:$0xff] }
  0x50   :  { %522 = vmatpush.msrb.mxu0 %v197_v39  ;;  %559 = vmatpush.msrb.mxu2 %v337_v41  ;;  %v214_v39 = vld [vmem:[%s4459_s6 + $0x170] sm:$0xff] }
  0x51   :  { %542 = vmatpush.msrb.mxu1 %v261_v40  ;;  %579 = vmatpush.msrb.mxu3 %v401_v42  ;;  %v358_v40 = vld [vmem:[%s4459_s6 + $0x5f0] sm:$0xff] }
  0x52   :  { %523 = vmatpush.msrb.mxu0 %v193_v43  ;;  %560 = vmatpush.msrb.mxu2 %v333_v45  ;;  %v422_v41 = vld [vmem:[%s4459_s6 + $0x7f0] sm:$0xff] }
  0x53   :  { %543 = vmatpush.msrb.mxu1 %v257_v44  ;;  %580 = vmatpush.msrb.mxu3 %v397_v46  ;;  %v210_v42 = vld [vmem:[%s4459_s6 + $0x150] sm:$0xff] }
  0x54   :  { %524 = vmatpush.msrb.mxu0 %v189_v47  ;;  %561 = vmatpush.msrb.mxu2 %v329_v49  ;;  %v274_v43 = vld [vmem:[%s4459_s6 + $0x350] sm:$0xff] }
  0x55   :  { %544 = vmatpush.msrb.mxu1 %v253_v48  ;;  %581 = vmatpush.msrb.mxu3 %v393_v50  ;;  %v354_v44 = vld [vmem:[%s4459_s6 + $0x5d0] sm:$0xff] }
  0x56   :  { %525 = vmatpush.msrb.mxu0 %v185_v51  ;;  %562 = vmatpush.msrb.mxu2 %v325_v53  ;;  %v418_v45 = vld [vmem:[%s4459_s6 + $0x7d0] sm:$0xff] }
  0x57   :  { %545 = vmatpush.msrb.mxu1 %v249_v52  ;;  %582 = vmatpush.msrb.mxu3 %v389_v54  ;;  %v206_v46 = vld [vmem:[%s4459_s6 + $0x130] sm:$0xff] }
  0x58   :  { %526 = vmatpush.msrb.mxu0 %v181_v55  ;;  %563 = vmatpush.msrb.mxu2 %v321_v59  ;;  %v270_v47 = vld [vmem:[%s4459_s6 + $0x330] sm:$0xff] }
  0x59   :  { %546 = vmatpush.msrb.mxu1 %v245_v56  ;;  %583 = vmatpush.msrb.mxu3 %v385_v60  ;;  %v350_v48 = vld [vmem:[%s4459_s6 + $0x5b0] sm:$0xff] }
  0x5a   :  { %527 = vmatpush.msrb.mxu0 %v177_v57  ;;  %564 = vmatpush.msrb.mxu2 %v317_v63  ;;  %v414_v49 = vld [vmem:[%s4459_s6 + $0x7b0] sm:$0xff] }
  0x5b   :  { %547 = vmatpush.msrb.mxu1 %v241_v58  ;;  %584 = vmatpush.msrb.mxu3 %v381_v0  ;;  %v202_v50 = vld [vmem:[%s4459_s6 + $0x110] sm:$0xff] }
  0x5c   :  { %528 = vmatpush.msrb.mxu0 %v173_v61  ;;  %565 = vmatpush.msrb.mxu2 %v313_v3  ;;  %v266_v51 = vld [vmem:[%s4459_s6 + $0x310] sm:$0xff] }
  0x5d   :  { %548 = vmatpush.msrb.mxu1 %v237_v62  ;;  %585 = vmatpush.msrb.mxu3 %v377_v4  ;;  %v346_v52 = vld [vmem:[%s4459_s6 + $0x590] sm:$0xff] }
  0x5e   :  { %529 = vmatpush.msrb.mxu0 %v169_v1  ;;  %566 = vmatpush.msrb.mxu2 %v309_v5  ;;  %v410_v53 = vld [vmem:[%s4459_s6 + $0x790] sm:$0xff] }
  0x5f   :  { %549 = vmatpush.msrb.mxu1 %v233_v2  ;;  %586 = vmatpush.msrb.mxu3 %v373_v6  ;;  %v198_v54 = vld [vmem:[%s4459_s6 + $0xf0] sm:$0xff] }
  0x60   :  { %567 = vmatpush.msrb.mxu2 %v305_v7  ;;  %v262_v55 = vld [vmem:[%s4459_s6 + $0x2f0] sm:$0xff] }
  0x61   :  { %587 = vmatpush.msrb.mxu3 %v369_v8  ;;  %v342_v56 = vld [vmem:[%s4459_s6 + $0x570] sm:$0xff] }
  0x62   :  { %568 = vmatpush.msrb.mxu2 %v301_v9  ;;  %v406_v57 = vld [vmem:[%s4459_s6 + $0x770] sm:$0xff] }
  0x63   :  { %588 = vmatpush.msrb.mxu3 %v365_v10  ;;  %v194_v58 = vld [vmem:[%s4459_s6 + $0xd0] sm:$0xff] }
  0x64   :  { %569 = vmatpush.msrb.mxu2 %v297_v11  ;;  %v258_v59 = vld [vmem:[%s4459_s6 + $0x2d0] sm:$0xff] }
  0x65   :  { %589 = vmatpush.msrb.mxu3 %v361_v12  ;;  %v338_v60 = vld [vmem:[%s4459_s6 + $0x550] sm:$0xff] }
  0x66   :  { %v402_v61 = vld [vmem:[%s4459_s6 + $0x750] sm:$0xff] }
  0x67   :  { %v190_v62 = vld [vmem:[%s4459_s6 + $0xb0] sm:$0xff] }
  0x68   :  { %v254_v63 = vld [vmem:[%s4459_s6 + $0x2b0] sm:$0xff] }
  0x69   :  { %v334_v0 = vld [vmem:[%s4459_s6 + $0x530] sm:$0xff] }
  0x6a   :  { %v398_v1 = vld [vmem:[%s4459_s6 + $0x730] sm:$0xff] }
  0x6b   :  { %v186_v2 = vld [vmem:[%s4459_s6 + $0x90] sm:$0xff] }
  0x6c   :  { %v250_v3 = vld [vmem:[%s4459_s6 + $0x290] sm:$0xff] }
  0x6d   :  { %v330_v4 = vld [vmem:[%s4459_s6 + $0x510] sm:$0xff] }
  0x6e   :  { %v394_v5 = vld [vmem:[%s4459_s6 + $0x710] sm:$0xff] }
  0x6f   :  { %v182_v6 = vld [vmem:[%s4459_s6 + $0x70] sm:$0xff] }
  0x70   :  { %v246_v7 = vld [vmem:[%s4459_s6 + $0x270] sm:$0xff] }
  0x71   :  { %v326_v8 = vld [vmem:[%s4459_s6 + $0x4f0] sm:$0xff] }
  0x72   :  { %v390_v9 = vld [vmem:[%s4459_s6 + $0x6f0] sm:$0xff] }
  0x73   :  { %v178_v10 = vld [vmem:[%s4459_s6 + $0x50] sm:$0xff] }
  0x74   :  { %v242_v11 = vld [vmem:[%s4459_s6 + $0x250] sm:$0xff] }
  0x75   :  { %v322_v12 = vld [vmem:[%s4459_s6 + $0x4d0] sm:$0xff] }
  0x76   :  { %v386_v13 = vld [vmem:[%s4459_s6 + $0x6d0] sm:$0xff] }
  0x8a   :  { %v101_v16 = vpop.f32.mrf.mxu2  ;;  %v121_v17 = vpop.f32.mrf.mxu3 }
  0x8b   :  { %v102_v18 = vadd.f32 %v101_v16, %v59_v14  ;;  %v122_v19 = vadd.f32 %v121_v17, %v60_v15  ;;  %v174_v14 = vld [vmem:[%s4459_s6 + $0x30] sm:$0xff] }
  0x8c   :  { %v238_v15 = vld [vmem:[%s4459_s6 + $0x230] sm:$0xff] }
  0x8d   :  { %v2473_v20 = vmax.f32 %v102_v18, 0.0  ;;  %v2475_v21 = vmax.f32 %v122_v19, 0.0  ;;  %v318_v16 = vld [vmem:[%s4459_s6 + $0x4b0] sm:$0xff] }
  0x8e   :  { %v382_v17 = vld [vmem:[%s4459_s6 + $0x6b0] sm:$0xff] }
  0x8f   :  { %450 = vmatmul.f32.vlgmr.msra.gmra.mxu0 %v2473_v20  ;;  %470 = vmatmul.f32.vlgmr.msra.gmra.mxu1 %v2475_v21  ;;  %v170_v18 = vld [vmem:[%s4459_s6 + $0x10] sm:$0xff] }
  0x90   :  { %594 = vmatpush.msra.mxu0 %v230_v22  ;;  %614 = vmatpush.msra.mxu1 %v294_v23  ;;  %v234_v19 = vld [vmem:[%s4459_s6 + $0x210] sm:$0xff] }
  0x91   :  { %v314_v22 = vld [vmem:[%s4459_s6 + $0x490] sm:$0xff] }
  0x92   :  { %595 = vmatpush.msra.mxu0 %v226_v24  ;;  %615 = vmatpush.msra.mxu1 %v290_v25  ;;  %v141_v30 = vpop.f32.mrf.mxu2  ;;  %v161_v31 = vpop.f32.mrf.mxu3  ;;  %v378_v23 = vld [vmem:[%s4459_s6 + $0x690] sm:$0xff]  ;;  %v231_v24 = vld [vmem:[%s4459_s6 + $0x1f8] sm:$0xff] }
  0x93   :  { %v142_v32 = vadd.f32 %v141_v30, %v61_v26  ;;  %v162_v33 = vadd.f32 %v161_v31, %v62_v27  ;;  %v295_v25 = vld [vmem:[%s4459_s6 + $0x3f8] sm:$0xff]  ;;  %v310_v26 = vld [vmem:[%s4459_s6 + $0x470] sm:$0xff] }
  0x94   :  { %596 = vmatpush.msra.mxu0 %v222_v28  ;;  %616 = vmatpush.msra.mxu1 %v286_v29  ;;  %v374_v27 = vld [vmem:[%s4459_s6 + $0x670] sm:$0xff]  ;;  %v227_v28 = vld [vmem:[%s4459_s6 + $0x1d8] sm:$0xff] }
  0x95   :  { %v2503_v36 = vmax.f32 %v142_v32, 0.0  ;;  %v2505_v37 = vmax.f32 %v162_v33, 0.0  ;;  %v291_v29 = vld [vmem:[%s4459_s6 + $0x3d8] sm:$0xff]  ;;  %v306_v30 = vld [vmem:[%s4459_s6 + $0x450] sm:$0xff] }
  0x96   :  { %597 = vmatpush.msra.mxu0 %v218_v34  ;;  %617 = vmatpush.msra.mxu1 %v282_v35  ;;  %v370_v31 = vld [vmem:[%s4459_s6 + $0x650] sm:$0xff]  ;;  %v223_v32 = vld [vmem:[%s4459_s6 + $0x1b8] sm:$0xff] }
  0x97   :  { %490 = vmatmul.f32.vlgmr.msra.gmra.mxu2 %v2503_v36  ;;  %510 = vmatmul.f32.vlgmr.msra.gmra.mxu3 %v2505_v37  ;;  %v287_v33 = vld [vmem:[%s4459_s6 + $0x3b8] sm:$0xff]  ;;  %v302_v34 = vld [vmem:[%s4459_s6 + $0x430] sm:$0xff] }
  0x98   :  { %530 = vmatmul.f32.vlgmr.msrb.gmra.mxu0 %v2473_v20  ;;  %618 = vmatpush.msra.mxu1 %v278_v38  ;;  %v366_v35 = vld [vmem:[%s4459_s6 + $0x630] sm:$0xff]  ;;  %v219_v38 = vld [vmem:[%s4459_s6 + $0x198] sm:$0xff] }
  0x99   :  { %598 = vmatpush.msra.mxu0 %v214_v39  ;;  %634 = vmatpush.msra.mxu2 %v358_v40  ;;  %v283_v39 = vld [vmem:[%s4459_s6 + $0x398] sm:$0xff]  ;;  %v298_v40 = vld [vmem:[%s4459_s6 + $0x410] sm:$0xff] }
  0x9a   :  { %654 = vmatpush.msra.mxu3 %v422_v41  ;;  %550 = vmatmul.f32.vlgmr.msrb.gmra.mxu1 %v2475_v21  ;;  %v362_v41 = vld [vmem:[%s4459_s6 + $0x610] sm:$0xff] }
  0x9b   :  { %599 = vmatpush.msra.mxu0 %v210_v42  ;;  %619 = vmatpush.msra.mxu1 %v274_v43  ;;  %v215_v42 = vld [vmem:[%s4459_s6 + $0x178] sm:$0xff] }
  0x9c   :  { %635 = vmatpush.msra.mxu2 %v354_v44  ;;  %655 = vmatpush.msra.mxu3 %v418_v45  ;;  %v279_v43 = vld [vmem:[%s4459_s6 + $0x378] sm:$0xff] }
  0x9d   :  { %600 = vmatpush.msra.mxu0 %v206_v46  ;;  %620 = vmatpush.msra.mxu1 %v270_v47  ;;  %v359_v44 = vld [vmem:[%s4459_s6 + $0x5f8] sm:$0xff] }
  0x9e   :  { %636 = vmatpush.msra.mxu2 %v350_v48  ;;  %656 = vmatpush.msra.mxu3 %v414_v49  ;;  %v423_v45 = vld [vmem:[%s4459_s6 + $0x7f8] sm:$0xff] }
  0x9f   :  { %601 = vmatpush.msra.mxu0 %v202_v50  ;;  %621 = vmatpush.msra.mxu1 %v266_v51  ;;  %v211_v46 = vld [vmem:[%s4459_s6 + $0x158] sm:$0xff] }
  0xa0   :  { %637 = vmatpush.msra.mxu2 %v346_v52  ;;  %657 = vmatpush.msra.mxu3 %v410_v53  ;;  %v275_v47 = vld [vmem:[%s4459_s6 + $0x358] sm:$0xff] }
  0xa1   :  { %570 = vmatmul.f32.vlgmr.msrb.gmra.mxu2 %v2503_v36  ;;  %602 = vmatpush.msra.mxu0 %v198_v54  ;;  %v355_v48 = vld [vmem:[%s4459_s6 + $0x5d8] sm:$0xff] }
  0xa2   :  { %622 = vmatpush.msra.mxu1 %v262_v55  ;;  %638 = vmatpush.msra.mxu2 %v342_v56  ;;  %v419_v49 = vld [vmem:[%s4459_s6 + $0x7d8] sm:$0xff] }
  0xa3   :  { %658 = vmatpush.msra.mxu3 %v406_v57  ;;  %603 = vmatpush.msra.mxu0 %v194_v58  ;;  %v207_v50 = vld [vmem:[%s4459_s6 + $0x138] sm:$0xff] }
  0xa4   :  { %590 = vmatmul.f32.vlgmr.msrb.gmra.mxu3 %v2505_v37  ;;  %623 = vmatpush.msra.mxu1 %v258_v59  ;;  %v271_v51 = vld [vmem:[%s4459_s6 + $0x338] sm:$0xff] }
  0xa5   :  { %639 = vmatpush.msra.mxu2 %v338_v60  ;;  %659 = vmatpush.msra.mxu3 %v402_v61  ;;  %v351_v52 = vld [vmem:[%s4459_s6 + $0x5b8] sm:$0xff] }
  0xa6   :  { %604 = vmatpush.msra.mxu0 %v190_v62  ;;  %624 = vmatpush.msra.mxu1 %v254_v63  ;;  %v415_v53 = vld [vmem:[%s4459_s6 + $0x7b8] sm:$0xff] }
  0xa7   :  { %640 = vmatpush.msra.mxu2 %v334_v0  ;;  %660 = vmatpush.msra.mxu3 %v398_v1  ;;  %v203_v54 = vld [vmem:[%s4459_s6 + $0x118] sm:$0xff] }
  0xa8   :  { %605 = vmatpush.msra.mxu0 %v186_v2  ;;  %625 = vmatpush.msra.mxu1 %v250_v3  ;;  %v267_v55 = vld [vmem:[%s4459_s6 + $0x318] sm:$0xff] }
  0xa9   :  { %641 = vmatpush.msra.mxu2 %v330_v4  ;;  %661 = vmatpush.msra.mxu3 %v394_v5  ;;  %v347_v56 = vld [vmem:[%s4459_s6 + $0x598] sm:$0xff] }
  0xaa   :  { %606 = vmatpush.msra.mxu0 %v182_v6  ;;  %626 = vmatpush.msra.mxu1 %v246_v7  ;;  %v411_v57 = vld [vmem:[%s4459_s6 + $0x798] sm:$0xff] }
  0xab   :  { %642 = vmatpush.msra.mxu2 %v326_v8  ;;  %662 = vmatpush.msra.mxu3 %v390_v9  ;;  %v199_v58 = vld [vmem:[%s4459_s6 + $0xf8] sm:$0xff] }
  0xac   :  { %607 = vmatpush.msra.mxu0 %v178_v10  ;;  %627 = vmatpush.msra.mxu1 %v242_v11  ;;  %v263_v59 = vld [vmem:[%s4459_s6 + $0x2f8] sm:$0xff] }
  0xad   :  { %643 = vmatpush.msra.mxu2 %v322_v12  ;;  %663 = vmatpush.msra.mxu3 %v386_v13  ;;  %v343_v60 = vld [vmem:[%s4459_s6 + $0x578] sm:$0xff] }
  0xae   :  { %608 = vmatpush.msra.mxu0 %v174_v14  ;;  %628 = vmatpush.msra.mxu1 %v238_v15  ;;  %v407_v61 = vld [vmem:[%s4459_s6 + $0x778] sm:$0xff] }
  0xaf   :  { %644 = vmatpush.msra.mxu2 %v318_v16  ;;  %664 = vmatpush.msra.mxu3 %v382_v17  ;;  %v195_v62 = vld [vmem:[%s4459_s6 + $0xd8] sm:$0xff] }
  0xb0   :  { %609 = vmatpush.msra.mxu0 %v170_v18  ;;  %629 = vmatpush.msra.mxu1 %v234_v19  ;;  %v259_v63 = vld [vmem:[%s4459_s6 + $0x2d8] sm:$0xff] }
  0xb1   :  { %645 = vmatpush.msra.mxu2 %v314_v22  ;;  %665 = vmatpush.msra.mxu3 %v378_v23  ;;  %v339_v0 = vld [vmem:[%s4459_s6 + $0x558] sm:$0xff] }
  0xb2   :  { %610 = vmatmul.f32.vlgmr.msra.gmra.mxu0 %v2473_v20  ;;  %630 = vmatmul.f32.vlgmr.msra.gmra.mxu1 %v2475_v21  ;;  %v403_v1 = vld [vmem:[%s4459_s6 + $0x758] sm:$0xff] }
  0xb3   :  { %674 = vmatpush.msrb.mxu0 %v231_v24  ;;  %694 = vmatpush.msrb.mxu1 %v295_v25  ;;  %v191_v2 = vld [vmem:[%s4459_s6 + $0xb8] sm:$0xff] }
  0xb4   :  { %646 = vmatpush.msra.mxu2 %v310_v26  ;;  %666 = vmatpush.msra.mxu3 %v374_v27  ;;  %v255_v3 = vld [vmem:[%s4459_s6 + $0x2b8] sm:$0xff] }
  0xb5   :  { %675 = vmatpush.msrb.mxu0 %v227_v28  ;;  %695 = vmatpush.msrb.mxu1 %v291_v29  ;;  %v335_v4 = vld [vmem:[%s4459_s6 + $0x538] sm:$0xff] }
  0xb6   :  { %647 = vmatpush.msra.mxu2 %v306_v30  ;;  %667 = vmatpush.msra.mxu3 %v370_v31  ;;  %v399_v5 = vld [vmem:[%s4459_s6 + $0x738] sm:$0xff] }
  0xb7   :  { %676 = vmatpush.msrb.mxu0 %v223_v32  ;;  %696 = vmatpush.msrb.mxu1 %v287_v33  ;;  %v187_v6 = vld [vmem:[%s4459_s6 + $0x98] sm:$0xff]  ;;  %v777_v32 = vld [vmem:[%s4461_s2 + $0x70] sm:$0xff] }
  0xb8   :  { %648 = vmatpush.msra.mxu2 %v302_v34  ;;  %668 = vmatpush.msra.mxu3 %v366_v35  ;;  %v251_v7 = vld [vmem:[%s4459_s6 + $0x298] sm:$0xff]  ;;  %v793_v33 = vld [vmem:[%s4461_s2 + $0xf0] sm:$0xff]  ;;  %v792_v35 = vld [vmem:[%s4461_s2 + $0xe8] sm:$0xff] }
  0xb9   :  { %677 = vmatpush.msrb.mxu0 %v219_v38  ;;  %697 = vmatpush.msrb.mxu1 %v283_v39  ;;  %v331_v8 = vld [vmem:[%s4459_s6 + $0x518] sm:$0xff] }
  0xba   :  { %649 = vmatpush.msra.mxu2 %v298_v40  ;;  %669 = vmatpush.msra.mxu3 %v362_v41  ;;  %v395_v9 = vld [vmem:[%s4459_s6 + $0x718] sm:$0xff]  ;;  %v775_v40 = vld [vmem:[%s4461_s2 + $0x60] sm:$0xff] }
  0xbb   :  { %650 = vmatmul.f32.vlgmr.msra.gmra.mxu2 %v2503_v36  ;;  %670 = vmatmul.f32.vlgmr.msra.gmra.mxu3 %v2505_v37  ;;  %v183_v10 = vld [vmem:[%s4459_s6 + $0x78] sm:$0xff]  ;;  %v791_v41 = vld [vmem:[%s4461_s2 + $0xe0] sm:$0xff] }
  0xbc   :  { %678 = vmatpush.msrb.mxu0 %v215_v42  ;;  %698 = vmatpush.msrb.mxu1 %v279_v43  ;;  %v247_v11 = vld [vmem:[%s4459_s6 + $0x278] sm:$0xff] }
  0xbd   :  { %714 = vmatpush.msrb.mxu2 %v359_v44  ;;  %734 = vmatpush.msrb.mxu3 %v423_v45  ;;  %v327_v12 = vld [vmem:[%s4459_s6 + $0x4f8] sm:$0xff] }
  0xbe   :  { %679 = vmatpush.msrb.mxu0 %v211_v46  ;;  %699 = vmatpush.msrb.mxu1 %v275_v47  ;;  %v391_v13 = vld [vmem:[%s4459_s6 + $0x6f8] sm:$0xff] }
  0xbf   :  { %715 = vmatpush.msrb.mxu2 %v355_v48  ;;  %735 = vmatpush.msrb.mxu3 %v419_v49  ;;  %v179_v14 = vld [vmem:[%s4459_s6 + $0x58] sm:$0xff]  ;;  %v773_v48 = vld [vmem:[%s4461_s2 + $0x50] sm:$0xff] }
  0xc0   :  { %680 = vmatpush.msrb.mxu0 %v207_v50  ;;  %700 = vmatpush.msrb.mxu1 %v271_v51  ;;  %v243_v15 = vld [vmem:[%s4459_s6 + $0x258] sm:$0xff]  ;;  %v789_v49 = vld [vmem:[%s4461_s2 + $0xd0] sm:$0xff]  ;;  %v788_v51 = vld [vmem:[%s4461_s2 + $0xc8] sm:$0xff] }
  0xc1   :  { %716 = vmatpush.msrb.mxu2 %v351_v52  ;;  %736 = vmatpush.msrb.mxu3 %v415_v53  ;;  %v323_v16 = vld [vmem:[%s4459_s6 + $0x4d8] sm:$0xff]  ;;  %v809_v50 = vld [vmem:[%s4461_s2 + $0x170] sm:$0xff]  ;;  %v808_v52 = vld [vmem:[%s4461_s2 + $0x168] sm:$0xff] }
  0xc2   :  { %681 = vmatpush.msrb.mxu0 %v203_v54  ;;  %701 = vmatpush.msrb.mxu1 %v267_v55  ;;  %v387_v17 = vld [vmem:[%s4459_s6 + $0x6d8] sm:$0xff]  ;;  %v824_v53 = vld [vmem:[%s4461_s2 + $0x1e8] sm:$0xff]  ;;  %v771_v54 = vld [vmem:[%s4461_s2 + $0x40] sm:$0xff] }
  0xc3   :  { %717 = vmatpush.msrb.mxu2 %v347_v56  ;;  %737 = vmatpush.msrb.mxu3 %v411_v57  ;;  %v175_v18 = vld [vmem:[%s4459_s6 + $0x38] sm:$0xff]  ;;  %v787_v55 = vld [vmem:[%s4461_s2 + $0xc0] sm:$0xff] }
  0xc4   :  { %682 = vmatpush.msrb.mxu0 %v199_v58  ;;  %702 = vmatpush.msrb.mxu1 %v263_v59  ;;  %v239_v19 = vld [vmem:[%s4459_s6 + $0x238] sm:$0xff]  ;;  %v807_v56 = vld [vmem:[%s4461_s2 + $0x160] sm:$0xff] }
  0xc5   :  { %718 = vmatpush.msrb.mxu2 %v343_v60  ;;  %738 = vmatpush.msrb.mxu3 %v407_v61  ;;  %v319_v22 = vld [vmem:[%s4459_s6 + $0x4b8] sm:$0xff]  ;;  %v823_v57 = vld [vmem:[%s4461_s2 + $0x1e0] sm:$0xff] }
  0xc6   :  { %683 = vmatpush.msrb.mxu0 %v195_v62  ;;  %703 = vmatpush.msrb.mxu1 %v259_v63  ;;  %v383_v23 = vld [vmem:[%s4459_s6 + $0x6b8] sm:$0xff]  ;;  %v769_v62 = vld [vmem:[%s4461_s2 + $0x30] sm:$0xff] }
  0xc7   :  { %719 = vmatpush.msrb.mxu2 %v339_v0  ;;  %739 = vmatpush.msrb.mxu3 %v403_v1  ;;  %v171_v24 = vld [vmem:[%s4459_s6 + $0x18] sm:$0xff]  ;;  %v785_v63 = vld [vmem:[%s4461_s2 + $0xb0] sm:$0xff] }
  0xc8   :  { %684 = vmatpush.msrb.mxu0 %v191_v2  ;;  %704 = vmatpush.msrb.mxu1 %v255_v3  ;;  %v235_v25 = vld [vmem:[%s4459_s6 + $0x218] sm:$0xff]  ;;  %v805_v0 = vld [vmem:[%s4461_s2 + $0x150] sm:$0xff]  ;;  %v768_v2 = vld [vmem:[%s4461_s2 + $0x28] sm:$0xff] }
  0xc9   :  { %720 = vmatpush.msrb.mxu2 %v335_v4  ;;  %740 = vmatpush.msrb.mxu3 %v399_v5  ;;  %v315_v26 = vld [vmem:[%s4459_s6 + $0x498] sm:$0xff]  ;;  %v821_v1 = vld [vmem:[%s4461_s2 + $0x1d0] sm:$0xff]  ;;  %v784_v3 = vld [vmem:[%s4461_s2 + $0xa8] sm:$0xff] }
  0xca   :  { %685 = vmatpush.msrb.mxu0 %v187_v6  ;;  %705 = vmatpush.msrb.mxu1 %v251_v7  ;;  %v379_v27 = vld [vmem:[%s4459_s6 + $0x698] sm:$0xff]  ;;  %v804_v4 = vld [vmem:[%s4461_s2 + $0x148] sm:$0xff]  ;;  %v767_v6 = vld [vmem:[%s4461_s2 + $0x20] sm:$0xff] }
  0xcb   :  { %721 = vmatpush.msrb.mxu2 %v331_v8  ;;  %741 = vmatpush.msrb.mxu3 %v395_v9  ;;  %v778_v28 = vld [vmem:[%s4461_s2 + $0x78] sm:$0xff]  ;;  %v820_v5 = vld [vmem:[%s4461_s2 + $0x1c8] sm:$0xff]  ;;  %v783_v7 = vld [vmem:[%s4461_s2 + $0xa0] sm:$0xff] }
  0xcc   :  { %686 = vmatpush.msrb.mxu0 %v183_v10  ;;  %706 = vmatpush.msrb.mxu1 %v247_v11  ;;  %v794_v29 = vld [vmem:[%s4461_s2 + $0xf8] sm:$0xff]  ;;  %v803_v8 = vld [vmem:[%s4461_s2 + $0x140] sm:$0xff] }
  0xcd   :  { %722 = vmatpush.msrb.mxu2 %v327_v12  ;;  %742 = vmatpush.msrb.mxu3 %v391_v13  ;;  %v311_v30 = vld [vmem:[%s4459_s6 + $0x478] sm:$0xff]  ;;  %v819_v9 = vld [vmem:[%s4461_s2 + $0x1c0] sm:$0xff] }
  0xce   :  { %687 = vmatpush.msrb.mxu0 %v179_v14  ;;  %707 = vmatpush.msrb.mxu1 %v243_v15  ;;  %v375_v31 = vld [vmem:[%s4459_s6 + $0x678] sm:$0xff]  ;;  %v765_v14 = vld [vmem:[%s4461_s2 + $0x10] sm:$0xff] }
  0xcf   :  { %723 = vmatpush.msrb.mxu2 %v323_v16  ;;  %743 = vmatpush.msrb.mxu3 %v387_v17  ;;  %v307_v34 = vld [vmem:[%s4459_s6 + $0x458] sm:$0xff]  ;;  %v781_v15 = vld [vmem:[%s4461_s2 + $0x90] sm:$0xff] }
  0xd0   :  { %688 = vmatpush.msrb.mxu0 %v175_v18  ;;  %708 = vmatpush.msrb.mxu1 %v239_v19  ;;  %v303_v38 = vld [vmem:[%s4459_s6 + $0x438] sm:$0xff]  ;;  %v801_v16 = vld [vmem:[%s4461_s2 + $0x130] sm:$0xff]  ;;  %v764_v18 = vld [vmem:[%s4461_s2 + $0x8] sm:$0xff] }
  0xd1   :  { %724 = vmatpush.msrb.mxu2 %v319_v22  ;;  %744 = vmatpush.msrb.mxu3 %v383_v23  ;;  %v367_v39 = vld [vmem:[%s4459_s6 + $0x638] sm:$0xff]  ;;  %v817_v17 = vld [vmem:[%s4461_s2 + $0x1b0] sm:$0xff]  ;;  %v780_v19 = vld [vmem:[%s4461_s2 + $0x88] sm:$0xff] }
  0xd2   :  { %689 = vmatpush.msrb.mxu0 %v171_v24  ;;  %709 = vmatpush.msrb.mxu1 %v235_v25  ;;  %v299_v42 = vld [vmem:[%s4459_s6 + $0x418] sm:$0xff]  ;;  %v800_v22 = vld [vmem:[%s4461_s2 + $0x128] sm:$0xff]  ;;  %v763_v24 = vld [vmem:[%s4461_s2] sm:$0xff] }
  0xd3   :  { %725 = vmatpush.msrb.mxu2 %v315_v26  ;;  %745 = vmatpush.msrb.mxu3 %v379_v27  ;;  %v363_v43 = vld [vmem:[%s4459_s6 + $0x618] sm:$0xff]  ;;  %v816_v23 = vld [vmem:[%s4461_s2 + $0x1a8] sm:$0xff]  ;;  %v779_v25 = vld [vmem:[%s4461_s2 + $0x80] sm:$0xff] }
  0xd4   :  { %690 = vmatmul.f32.vlgmr.msrb.gmra.mxu0 %v2473_v20  ;;  %710 = vmatmul.f32.vlgmr.msrb.gmra.mxu1 %v2475_v21  ;;  %v371_v20 = vld [vmem:[%s4459_s6 + $0x658] sm:$0xff]  ;;  %v776_v21 = vld [vmem:[%s4461_s2 + $0x68] sm:$0xff]  ;;  %v799_v26 = vld [vmem:[%s4461_s2 + $0x120] sm:$0xff] }
  0xd5   :  { %911 = vmatpush.msra.mxu0 %v778_v28  ;;  %931 = vmatpush.msra.mxu1 %v794_v29  ;;  %v774_v44 = vld [vmem:[%s4461_s2 + $0x58] sm:$0xff]  ;;  %v815_v27 = vld [vmem:[%s4461_s2 + $0x1a0] sm:$0xff] }
  0xd6   :  { %726 = vmatpush.msrb.mxu2 %v311_v30  ;;  %746 = vmatpush.msrb.mxu3 %v375_v31  ;;  %v790_v45 = vld [vmem:[%s4461_s2 + $0xd8] sm:$0xff] }
  0xd7   :  { %912 = vmatpush.msra.mxu0 %v777_v32  ;;  %932 = vmatpush.msra.mxu1 %v793_v33  ;;  %v810_v46 = vld [vmem:[%s4461_s2 + $0x178] sm:$0xff]  ;;  %v841_v32 = vld [vmem:[%s4461_s2 + $0x270] sm:$0xff] }
  0xd8   :  { %727 = vmatpush.msrb.mxu2 %v307_v34  ;;  %747 = vmatpush.msrb.mxu3 %v371_v20  ;;  %v826_v47 = vld [vmem:[%s4461_s2 + $0x1f8] sm:$0xff]  ;;  %v857_v33 = vld [vmem:[%s4461_s2 + $0x2f0] sm:$0xff] }
  0xd9   :  { %913 = vmatpush.msra.mxu0 %v776_v21  ;;  %933 = vmatpush.msra.mxu1 %v792_v35  ;;  %v770_v58 = vld [vmem:[%s4461_s2 + $0x38] sm:$0xff]  ;;  %v797_v34 = vld [vmem:[%s4461_s2 + $0x110] sm:$0xff]  ;;  %v840_v21 = vld [vmem:[%s4461_s2 + $0x268] sm:$0xff] }
  0xda   :  { %728 = vmatpush.msrb.mxu2 %v303_v38  ;;  %748 = vmatpush.msrb.mxu3 %v367_v39  ;;  %v786_v59 = vld [vmem:[%s4461_s2 + $0xb8] sm:$0xff]  ;;  %v813_v20 = vld [vmem:[%s4461_s2 + $0x190] sm:$0xff]  ;;  %v856_v35 = vld [vmem:[%s4461_s2 + $0x2e8] sm:$0xff] }
  0xdb   :  { %914 = vmatpush.msra.mxu0 %v775_v40  ;;  %934 = vmatpush.msra.mxu1 %v791_v41  ;;  %v806_v60 = vld [vmem:[%s4461_s2 + $0x158] sm:$0xff]  ;;  %v796_v38 = vld [vmem:[%s4461_s2 + $0x108] sm:$0xff]  ;;  %v839_v40 = vld [vmem:[%s4461_s2 + $0x260] sm:$0xff] }
  0xdc   :  { %729 = vmatpush.msrb.mxu2 %v299_v42  ;;  %749 = vmatpush.msrb.mxu3 %v363_v43  ;;  %v822_v61 = vld [vmem:[%s4461_s2 + $0x1d8] sm:$0xff]  ;;  %v812_v39 = vld [vmem:[%s4461_s2 + $0x188] sm:$0xff]  ;;  %v855_v41 = vld [vmem:[%s4461_s2 + $0x2e0] sm:$0xff] }
  0xdd   :  { %730 = vmatmul.f32.vlgmr.msrb.gmra.mxu2 %v2503_v36  ;;  %750 = vmatmul.f32.vlgmr.msrb.gmra.mxu3 %v2505_v37  ;;  %v825_v36 = vld [vmem:[%s4461_s2 + $0x1f0] sm:$0xff]  ;;  %v772_v37 = vld [vmem:[%s4461_s2 + $0x48] sm:$0xff]  ;;  %v766_v10 = vld [vmem:[%s4461_s2 + $0x18] sm:$0xff] }
  0xde   :  { %915 = vmatpush.msra.mxu0 %v774_v44  ;;  %935 = vmatpush.msra.mxu1 %v790_v45  ;;  %v782_v11 = vld [vmem:[%s4461_s2 + $0x98] sm:$0xff]  ;;  %v795_v42 = vld [vmem:[%s4461_s2 + $0x100] sm:$0xff] }
  0xdf   :  { %951 = vmatpush.msra.mxu2 %v810_v46  ;;  %971 = vmatpush.msra.mxu3 %v826_v47  ;;  %v802_v12 = vld [vmem:[%s4461_s2 + $0x138] sm:$0xff]  ;;  %v811_v43 = vld [vmem:[%s4461_s2 + $0x180] sm:$0xff] }
  0xe0   :  { %916 = vmatpush.msra.mxu0 %v773_v48  ;;  %936 = vmatpush.msra.mxu1 %v789_v49  ;;  %v818_v13 = vld [vmem:[%s4461_s2 + $0x1b8] sm:$0xff]  ;;  %v837_v48 = vld [vmem:[%s4461_s2 + $0x250] sm:$0xff] }
  0xe1   :  { %952 = vmatpush.msra.mxu2 %v809_v50  ;;  %972 = vmatpush.msra.mxu3 %v825_v36  ;;  %v842_v28 = vld [vmem:[%s4461_s2 + $0x278] sm:$0xff]  ;;  %v853_v49 = vld [vmem:[%s4461_s2 + $0x2d0] sm:$0xff] }
  0xe2   :  { %917 = vmatpush.msra.mxu0 %v772_v37  ;;  %937 = vmatpush.msra.mxu1 %v788_v51  ;;  %v858_v29 = vld [vmem:[%s4461_s2 + $0x2f8] sm:$0xff]  ;;  %v873_v50 = vld [vmem:[%s4461_s2 + $0x370] sm:$0xff]  ;;  %v836_v37 = vld [vmem:[%s4461_s2 + $0x248] sm:$0xff] }
  0xe3   :  { %953 = vmatpush.msra.mxu2 %v808_v52  ;;  %973 = vmatpush.msra.mxu3 %v824_v53  ;;  %v798_v30 = vld [vmem:[%s4461_s2 + $0x118] sm:$0xff]  ;;  %v889_v36 = vld [vmem:[%s4461_s2 + $0x3f0] sm:$0xff]  ;;  %v852_v51 = vld [vmem:[%s4461_s2 + $0x2c8] sm:$0xff] }
  0xe4   :  { %918 = vmatpush.msra.mxu0 %v771_v54  ;;  %938 = vmatpush.msra.mxu1 %v787_v55  ;;  %v814_v31 = vld [vmem:[%s4461_s2 + $0x198] sm:$0xff]  ;;  %v872_v52 = vld [vmem:[%s4461_s2 + $0x368] sm:$0xff]  ;;  %v835_v54 = vld [vmem:[%s4461_s2 + $0x240] sm:$0xff] }
  0xe5   :  { %954 = vmatpush.msra.mxu2 %v807_v56  ;;  %974 = vmatpush.msra.mxu3 %v823_v57  ;;  %v838_v44 = vld [vmem:[%s4461_s2 + $0x258] sm:$0xff]  ;;  %v888_v53 = vld [vmem:[%s4461_s2 + $0x3e8] sm:$0xff]  ;;  %v851_v55 = vld [vmem:[%s4461_s2 + $0x2c0] sm:$0xff] }
  0xe6   :  { %919 = vmatpush.msra.mxu0 %v770_v58  ;;  %939 = vmatpush.msra.mxu1 %v786_v59  ;;  %v854_v45 = vld [vmem:[%s4461_s2 + $0x2d8] sm:$0xff]  ;;  %v871_v56 = vld [vmem:[%s4461_s2 + $0x360] sm:$0xff] }
  0xe7   :  { %955 = vmatpush.msra.mxu2 %v806_v60  ;;  %975 = vmatpush.msra.mxu3 %v822_v61  ;;  %v874_v46 = vld [vmem:[%s4461_s2 + $0x378] sm:$0xff]  ;;  %v887_v57 = vld [vmem:[%s4461_s2 + $0x3e0] sm:$0xff] }
  0xe8   :  { %920 = vmatpush.msra.mxu0 %v769_v62  ;;  %940 = vmatpush.msra.mxu1 %v785_v63  ;;  %v890_v47 = vld [vmem:[%s4461_s2 + $0x3f8] sm:$0xff]  ;;  %v833_v62 = vld [vmem:[%s4461_s2 + $0x230] sm:$0xff] }
  0xe9   :  { %956 = vmatpush.msra.mxu2 %v805_v0  ;;  %976 = vmatpush.msra.mxu3 %v821_v1  ;;  %v834_v58 = vld [vmem:[%s4461_s2 + $0x238] sm:$0xff]  ;;  %v849_v63 = vld [vmem:[%s4461_s2 + $0x2b0] sm:$0xff] }
  0xea   :  { %921 = vmatpush.msra.mxu0 %v768_v2  ;;  %941 = vmatpush.msra.mxu1 %v784_v3  ;;  %v850_v59 = vld [vmem:[%s4461_s2 + $0x2b8] sm:$0xff]  ;;  %v869_v0 = vld [vmem:[%s4461_s2 + $0x350] sm:$0xff]  ;;  %v832_v2 = vld [vmem:[%s4461_s2 + $0x228] sm:$0xff] }
  0xeb   :  { %957 = vmatpush.msra.mxu2 %v804_v4  ;;  %977 = vmatpush.msra.mxu3 %v820_v5  ;;  %v870_v60 = vld [vmem:[%s4461_s2 + $0x358] sm:$0xff]  ;;  %v885_v1 = vld [vmem:[%s4461_s2 + $0x3d0] sm:$0xff]  ;;  %v848_v3 = vld [vmem:[%s4461_s2 + $0x2a8] sm:$0xff] }
  0xec   :  { %922 = vmatpush.msra.mxu0 %v767_v6  ;;  %942 = vmatpush.msra.mxu1 %v783_v7  ;;  %v886_v61 = vld [vmem:[%s4461_s2 + $0x3d8] sm:$0xff]  ;;  %v868_v4 = vld [vmem:[%s4461_s2 + $0x348] sm:$0xff]  ;;  %v831_v6 = vld [vmem:[%s4461_s2 + $0x220] sm:$0xff] }
  0xed   :  { %958 = vmatpush.msra.mxu2 %v803_v8  ;;  %978 = vmatpush.msra.mxu3 %v819_v9  ;;  %v884_v5 = vld [vmem:[%s4461_s2 + $0x3c8] sm:$0xff]  ;;  %v847_v7 = vld [vmem:[%s4461_s2 + $0x2a0] sm:$0xff] }
  0xee   :  { %923 = vmatpush.msra.mxu0 %v766_v10  ;;  %943 = vmatpush.msra.mxu1 %v782_v11  ;;  %v867_v8 = vld [vmem:[%s4461_s2 + $0x340] sm:$0xff]  ;;  %v830_v10 = vld [vmem:[%s4461_s2 + $0x218] sm:$0xff] }
  0xef   :  { %959 = vmatpush.msra.mxu2 %v802_v12  ;;  %979 = vmatpush.msra.mxu3 %v818_v13  ;;  %v883_v9 = vld [vmem:[%s4461_s2 + $0x3c0] sm:$0xff]  ;;  %v846_v11 = vld [vmem:[%s4461_s2 + $0x298] sm:$0xff] }
  0xf0   :  { %924 = vmatpush.msra.mxu0 %v765_v14  ;;  %944 = vmatpush.msra.mxu1 %v781_v15  ;;  %v866_v12 = vld [vmem:[%s4461_s2 + $0x338] sm:$0xff]  ;;  %v829_v14 = vld [vmem:[%s4461_s2 + $0x210] sm:$0xff] }
  0xf1   :  { %960 = vmatpush.msra.mxu2 %v801_v16  ;;  %980 = vmatpush.msra.mxu3 %v817_v17  ;;  %v882_v13 = vld [vmem:[%s4461_s2 + $0x3b8] sm:$0xff]  ;;  %v845_v15 = vld [vmem:[%s4461_s2 + $0x290] sm:$0xff] }
  0xf2   :  { %925 = vmatpush.msra.mxu0 %v764_v18  ;;  %945 = vmatpush.msra.mxu1 %v780_v19  ;;  %v865_v16 = vld [vmem:[%s4461_s2 + $0x330] sm:$0xff]  ;;  %v828_v18 = vld [vmem:[%s4461_s2 + $0x208] sm:$0xff] }
  0xf3   :  { %961 = vmatpush.msra.mxu2 %v800_v22  ;;  %981 = vmatpush.msra.mxu3 %v816_v23  ;;  %v881_v17 = vld [vmem:[%s4461_s2 + $0x3b0] sm:$0xff]  ;;  %v844_v19 = vld [vmem:[%s4461_s2 + $0x288] sm:$0xff] }
  0xf4   :  { %926 = vmatpush.msra.mxu0 %v763_v24  ;;  %946 = vmatpush.msra.mxu1 %v779_v25  ;;  %v864_v22 = vld [vmem:[%s4461_s2 + $0x328] sm:$0xff]  ;;  %v756_v24 = vld [vmem:[%s4462_s0 + $0x10] sm:$0xff]  ;;  %v827_v25 = vld [vmem:[%s4461_s2 + $0x200] sm:$0xff] }
  0xf5   :  { %962 = vmatpush.msra.mxu2 %v799_v26  ;;  %982 = vmatpush.msra.mxu3 %v815_v27  ;;  %v880_v23 = vld [vmem:[%s4461_s2 + $0x3a8] sm:$0xff]  ;;  %v843_v26 = vld [vmem:[%s4461_s2 + $0x280] sm:$0xff] }
  0xf6   :  { %991 = vmatpush.msrb.mxu0 %v842_v28  ;;  %1011 = vmatpush.msrb.mxu1 %v858_v29  ;;  %v863_v27 = vld [vmem:[%s4461_s2 + $0x320] sm:$0xff] }
  0xf7   :  { %963 = vmatpush.msra.mxu2 %v798_v30  ;;  %983 = vmatpush.msra.mxu3 %v814_v31  ;;  %v879_v28 = vld [vmem:[%s4461_s2 + $0x3a0] sm:$0xff]  ;;  %v755_v30 = vld [vmem:[%s4462_s0 + $0x8] sm:$0xff]  ;;  %v757_v31 = vld [vmem:[%s4462_s0 + $0x18] sm:$0xff] }
  0xf8   :  { %992 = vmatpush.msrb.mxu0 %v841_v32  ;;  %1012 = vmatpush.msrb.mxu1 %v857_v33  ;;  %v754_v29 = vld [vmem:[%s4462_s0] sm:$0xff]  ;;  %v906_v32 = vld [vmem:[%s4461_s2 + $0x478] sm:$0xff] }
  0xf9   :  { %964 = vmatpush.msra.mxu2 %v797_v34  ;;  %984 = vmatpush.msra.mxu3 %v813_v20  ;;  %v1184_v33 = vld [vmem:[%s4463_s9 + $0x1e0] sm:$0xff]  ;;  %v862_v34 = vld [vmem:[%s4461_s2 + $0x318] sm:$0xff] }
  0xfa   :  { %993 = vmatpush.msrb.mxu0 %v840_v21  ;;  %1013 = vmatpush.msrb.mxu1 %v856_v35  ;;  %v878_v20 = vld [vmem:[%s4461_s2 + $0x398] sm:$0xff]  ;;  %v905_v21 = vld [vmem:[%s4461_s2 + $0x470] sm:$0xff]  ;;  %v1180_v35 = vld [vmem:[%s4463_s9 + $0x1c0] sm:$0xff] }
  0xfb   :  { %965 = vmatpush.msra.mxu2 %v796_v38  ;;  %985 = vmatpush.msra.mxu3 %v812_v39  ;;  %v861_v38 = vld [vmem:[%s4461_s2 + $0x310] sm:$0xff] }
  0xfc   :  { %994 = vmatpush.msrb.mxu0 %v839_v40  ;;  %1014 = vmatpush.msrb.mxu1 %v855_v41  ;;  %v877_v39 = vld [vmem:[%s4461_s2 + $0x390] sm:$0xff]  ;;  %v904_v40 = vld [vmem:[%s4461_s2 + $0x468] sm:$0xff]  ;;  %v1176_v41 = vld [vmem:[%s4463_s9 + $0x1a0] sm:$0xff] }
  0xfd   :  { %966 = vmatpush.msra.mxu2 %v795_v42  ;;  %986 = vmatpush.msra.mxu3 %v811_v43  ;;  %v860_v42 = vld [vmem:[%s4461_s2 + $0x308] sm:$0xff] }
  0xfe   :  { %995 = vmatpush.msrb.mxu0 %v838_v44  ;;  %1015 = vmatpush.msrb.mxu1 %v854_v45  ;;  %v876_v43 = vld [vmem:[%s4461_s2 + $0x388] sm:$0xff]  ;;  %v903_v44 = vld [vmem:[%s4461_s2 + $0x460] sm:$0xff] }
  0xff   :  { %1031 = vmatpush.msrb.mxu2 %v874_v46  ;;  %1051 = vmatpush.msrb.mxu3 %v890_v47  ;;  %v1172_v45 = vld [vmem:[%s4463_s9 + $0x180] sm:$0xff] }
 0x100   :  { %996 = vmatpush.msrb.mxu0 %v837_v48  ;;  %1016 = vmatpush.msrb.mxu1 %v853_v49  ;;  %v859_v46 = vld [vmem:[%s4461_s2 + $0x300] sm:$0xff]  ;;  %v760_v49 = vld [vmem:[%s4462_s0 + $0x30] sm:$0xff] }
 0x101   :  { %1032 = vmatpush.msrb.mxu2 %v873_v50  ;;  %1052 = vmatpush.msrb.mxu3 %v889_v36  ;;  %v875_v47 = vld [vmem:[%s4461_s2 + $0x380] sm:$0xff]  ;;  %v902_v50 = vld [vmem:[%s4461_s2 + $0x458] sm:$0xff] }
 0x102   :  { %997 = vmatpush.msrb.mxu0 %v836_v37  ;;  %1017 = vmatpush.msrb.mxu1 %v852_v51  ;;  %v758_v48 = vld [vmem:[%s4462_s0 + $0x20] sm:$0xff] }
 0x103   :  { %1033 = vmatpush.msrb.mxu2 %v872_v52  ;;  %1053 = vmatpush.msrb.mxu3 %v888_v53  ;;  %v1168_v36 = vld [vmem:[%s4463_s9 + $0x160] sm:$0xff]  ;;  %v759_v52 = vld [vmem:[%s4462_s0 + $0x28] sm:$0xff]  ;;  %v761_v53 = vld [vmem:[%s4462_s0 + $0x38] sm:$0xff] }
 0x104   :  { %998 = vmatpush.msrb.mxu0 %v835_v54  ;;  %1018 = vmatpush.msrb.mxu1 %v851_v55  ;;  %v1248_v37 = vld [vmem:[%s4463_s9 + $0x3e0] sm:$0xff]  ;;  %v901_v54 = vld [vmem:[%s4461_s2 + $0x450] sm:$0xff] }
 0x105   :  { %1034 = vmatpush.msrb.mxu2 %v871_v56  ;;  %1054 = vmatpush.msrb.mxu3 %v887_v57  ;;  %v1312_v51 = vld [vmem:[%s4463_s9 + $0x5e0] sm:$0xff] }
 0x106   :  { %999 = vmatpush.msrb.mxu0 %v834_v58  ;;  %1019 = vmatpush.msrb.mxu1 %v850_v59  ;;  %v1164_v55 = vld [vmem:[%s4463_s9 + $0x140] sm:$0xff]  ;;  %v900_v58 = vld [vmem:[%s4461_s2 + $0x448] sm:$0xff] }
 0x107   :  { %1035 = vmatpush.msrb.mxu2 %v870_v60  ;;  %1055 = vmatpush.msrb.mxu3 %v886_v61  ;;  %v1244_v56 = vld [vmem:[%s4463_s9 + $0x3c0] sm:$0xff] }
 0x108   :  { %1000 = vmatpush.msrb.mxu0 %v833_v62  ;;  %1020 = vmatpush.msrb.mxu1 %v849_v63  ;;  %v1308_v57 = vld [vmem:[%s4463_s9 + $0x5c0] sm:$0xff] }
 0x109   :  { %1036 = vmatpush.msrb.mxu2 %v869_v0  ;;  %1056 = vmatpush.msrb.mxu3 %v885_v1  ;;  %v1160_v59 = vld [vmem:[%s4463_s9 + $0x120] sm:$0xff] }
 0x10a   :  { %1001 = vmatpush.msrb.mxu0 %v832_v2  ;;  %1021 = vmatpush.msrb.mxu1 %v848_v3  ;;  %v1240_v60 = vld [vmem:[%s4463_s9 + $0x3a0] sm:$0xff]  ;;  %v898_v3 = vld [vmem:[%s4461_s2 + $0x438] sm:$0xff] }
 0x10b   :  { %1037 = vmatpush.msrb.mxu2 %v868_v4  ;;  %1057 = vmatpush.msrb.mxu3 %v884_v5  ;;  %v1304_v61 = vld [vmem:[%s4463_s9 + $0x5a0] sm:$0xff] }
 0x10c   :  { %1002 = vmatpush.msrb.mxu0 %v831_v6  ;;  %1022 = vmatpush.msrb.mxu1 %v847_v7  ;;  %v899_v62 = vld [vmem:[%s4461_s2 + $0x440] sm:$0xff]  ;;  %v897_v7 = vld [vmem:[%s4461_s2 + $0x430] sm:$0xff] }
 0x10d   :  { %1038 = vmatpush.msrb.mxu2 %v867_v8  ;;  %1058 = vmatpush.msrb.mxu3 %v883_v9  ;;  %v1156_v63 = vld [vmem:[%s4463_s9 + $0x100] sm:$0xff] }
 0x10e   :  { %1003 = vmatpush.msrb.mxu0 %v830_v10  ;;  %1023 = vmatpush.msrb.mxu1 %v846_v11  ;;  %v1236_v0 = vld [vmem:[%s4463_s9 + $0x380] sm:$0xff]  ;;  %v451_v10 = vpop.f32.mrf.mxu0 }
 0x10f   :  { %1039 = vmatpush.msrb.mxu2 %v866_v12  ;;  %1059 = vmatpush.msrb.mxu3 %v882_v13  ;;  %v1300_v1 = vld [vmem:[%s4463_s9 + $0x580] sm:$0xff]  ;;  %v896_v13 = vld [vmem:[%s4461_s2 + $0x428] sm:$0xff] }
 0x110   :  { %1004 = vmatpush.msrb.mxu0 %v829_v14  ;;  %1024 = vmatpush.msrb.mxu1 %v845_v15  ;;  %v3364_v2 = vld [vmem:[%s4465_s7] sm:$0xf] }
 0x111   :  { %1040 = vmatpush.msrb.mxu2 %v865_v16  ;;  %1060 = vmatpush.msrb.mxu3 %v881_v17  ;;  %v1152_v4 = vld [vmem:[%s4463_s9 + $0xe0] sm:$0xff]  ;;  %v426_v9 = vperm.slane %v3364_v2, 0 }
 0x112   :  { %1005 = vmatpush.msrb.mxu0 %v828_v18  ;;  %1025 = vmatpush.msrb.mxu1 %v844_v19  ;;  %v1232_v5 = vld [vmem:[%s4463_s9 + $0x360] sm:$0xff] }
 0x113   :  { %1041 = vmatpush.msrb.mxu2 %v864_v22  ;;  %1061 = vmatpush.msrb.mxu3 %v880_v23  ;;  %v1296_v6 = vld [vmem:[%s4463_s9 + $0x560] sm:$0xff]  ;;  %v452_v19 = vadd.f32 %v451_v10, %v426_v9  ;;  %v471_v22 = vpop.f32.mrf.mxu1  ;;  %v1169_v10 = vld [vmem:[%s4463_s9 + $0x168] sm:$0xff] }
 0x114   :  { %967 = vmatmul.f32.vlgmr.msra.gmra.mxu2 %v756_v24  ;;  %1006 = vmatpush.msrb.mxu0 %v827_v25  ;;  %v1148_v8 = vld [vmem:[%s4463_s9 + $0xc0] sm:$0xff]  ;;  %v894_v25 = vld [vmem:[%s4461_s2 + $0x418] sm:$0xff] }
 0x115   :  { %1026 = vmatpush.msrb.mxu1 %v843_v26  ;;  %1042 = vmatpush.msrb.mxu2 %v863_v27  ;;  %v1228_v11 = vld [vmem:[%s4463_s9 + $0x340] sm:$0xff] }
 0x116   :  { %1062 = vmatpush.msrb.mxu3 %v879_v28  ;;  %927 = vmatmul.f32.vlgmr.msra.gmra.mxu0 %v754_v29  ;;  %v1292_v12 = vld [vmem:[%s4463_s9 + $0x540] sm:$0xff] }
 0x117   :  { %947 = vmatmul.f32.vlgmr.msra.gmra.mxu1 %v755_v30  ;;  %987 = vmatmul.f32.vlgmr.msra.gmra.mxu3 %v757_v31  ;;  %v1144_v14 = vld [vmem:[%s4463_s9 + $0xa0] sm:$0xff]  ;;  %v893_v30 = vld [vmem:[%s4461_s2 + $0x410] sm:$0xff] }
 0x118   :  { %1071 = vmatpush.msra.mxu0 %v906_v32  ;;  %1380 = vmatpush.msra.mxu1 %v1184_v33  ;;  %v1224_v15 = vld [vmem:[%s4463_s9 + $0x320] sm:$0xff]  ;;  %v472_v32 = vadd.f32 %v471_v22, %v452_v19  ;;  %v1161_v22 = vld [vmem:[%s4463_s9 + $0x128] sm:$0xff] }
 0x119   :  { %1043 = vmatpush.msrb.mxu2 %v862_v34  ;;  %1063 = vmatpush.msrb.mxu3 %v878_v20  ;;  %v1288_v16 = vld [vmem:[%s4463_s9 + $0x520] sm:$0xff]  ;;  %v427_v20 = vperm.slane %v3364_v2, 1 }
 0x11a   :  { %1072 = vmatpush.msra.mxu0 %v905_v21  ;;  %1381 = vmatpush.msra.mxu1 %v1180_v35  ;;  %v895_v17 = vld [vmem:[%s4461_s2 + $0x420] sm:$0xff]  ;;  %v491_v27 = vpop.f32.mrf.mxu2  ;;  %v892_v21 = vld [vmem:[%s4461_s2 + $0x408] sm:$0xff] }
 0x11b   :  { %1044 = vmatpush.msrb.mxu2 %v861_v38  ;;  %1064 = vmatpush.msrb.mxu3 %v877_v39  ;;  %v1140_v18 = vld [vmem:[%s4463_s9 + $0x80] sm:$0xff]  ;;  %v531_v38 = vpop.f32.mrf.mxu0  ;;  %v492_v39 = vadd.f32 %v491_v27, %v472_v32 }
 0x11c   :  { %1073 = vmatpush.msra.mxu0 %v904_v40  ;;  %1382 = vmatpush.msra.mxu1 %v1176_v41  ;;  %v1220_v23 = vld [vmem:[%s4463_s9 + $0x300] sm:$0xff]  ;;  %v511_v40 = vpop.f32.mrf.mxu3 }
 0x11d   :  { %1045 = vmatpush.msrb.mxu2 %v860_v42  ;;  %1065 = vmatpush.msrb.mxu3 %v876_v43  ;;  %v1284_v24 = vld [vmem:[%s4463_s9 + $0x500] sm:$0xff] }
 0x11e   :  { %1074 = vmatpush.msra.mxu0 %v903_v44  ;;  %1383 = vmatpush.msra.mxu1 %v1172_v45  ;;  %v1136_v26 = vld [vmem:[%s4463_s9 + $0x60] sm:$0xff] }
 0x11f   :  { %1046 = vmatpush.msrb.mxu2 %v859_v46  ;;  %1066 = vmatpush.msrb.mxu3 %v875_v47  ;;  %v1216_v28 = vld [vmem:[%s4463_s9 + $0x2e0] sm:$0xff]  ;;  %v532_v47 = vadd.f32 %v531_v38, %v427_v20  ;;  %v1297_v20 = vld [vmem:[%s4463_s9 + $0x568] sm:$0xff] }
 0x120   :  { %1007 = vmatmul.f32.vlgmr.msrb.gmra.mxu0 %v758_v48  ;;  %1047 = vmatmul.f32.vlgmr.msrb.gmra.mxu2 %v760_v49  ;;  %v1280_v29 = vld [vmem:[%s4463_s9 + $0x4e0] sm:$0xff]  ;;  %v551_v49 = vpop.f32.mrf.mxu1  ;;  %v1149_v38 = vld [vmem:[%s4463_s9 + $0xc8] sm:$0xff] }
 0x121   :  { %1075 = vmatpush.msra.mxu0 %v902_v50  ;;  %1384 = vmatpush.msra.mxu1 %v1168_v36  ;;  %v1132_v31 = vld [vmem:[%s4463_s9 + $0x40] sm:$0xff]  ;;  %v3467_v50 = vadd.f32 %v511_v40, %v492_v39  ;;  %v1229_v39 = vld [vmem:[%s4463_s9 + $0x348] sm:$0xff] }
 0x122   :  { %1400 = vmatpush.msra.mxu2 %v1248_v37  ;;  %1420 = vmatpush.msra.mxu3 %v1312_v51  ;;  %v1212_v33 = vld [vmem:[%s4463_s9 + $0x2c0] sm:$0xff]  ;;  %v1185_v37 = vld [vmem:[%s4463_s9 + $0x1e8] sm:$0xff] }
 0x123   :  { %1027 = vmatmul.f32.vlgmr.msrb.gmra.mxu1 %v759_v52  ;;  %1067 = vmatmul.f32.vlgmr.msrb.gmra.mxu3 %v761_v53  ;;  %v1276_v34 = vld [vmem:[%s4463_s9 + $0x4c0] sm:$0xff] }
 0x124   :  { %1076 = vmatpush.msra.mxu0 %v901_v54  ;;  %1385 = vmatpush.msra.mxu1 %v1164_v55  ;;  %v1128_v35 = vld [vmem:[%s4463_s9 + $0x20] sm:$0xff]  ;;  %v571_v53 = vpop.f32.mrf.mxu2  ;;  %v1181_v55 = vld [vmem:[%s4463_s9 + $0x1c8] sm:$0xff] }
 0x125   :  { %1401 = vmatpush.msra.mxu2 %v1244_v56  ;;  %1421 = vmatpush.msra.mxu3 %v1308_v57  ;;  %v1208_v41 = vld [vmem:[%s4463_s9 + $0x2a0] sm:$0xff]  ;;  %v552_v56 = vadd.f32 %v551_v49, %v532_v47  ;;  %v1141_v47 = vld [vmem:[%s4463_s9 + $0x88] sm:$0xff] }
 0x126   :  { %1077 = vmatpush.msra.mxu0 %v900_v58  ;;  %1386 = vmatpush.msra.mxu1 %v1160_v59  ;;  %v1272_v42 = vld [vmem:[%s4463_s9 + $0x4a0] sm:$0xff]  ;;  %v1285_v49 = vld [vmem:[%s4463_s9 + $0x508] sm:$0xff] }
 0x127   :  { %1402 = vmatpush.msra.mxu2 %v1240_v60  ;;  %1422 = vmatpush.msra.mxu3 %v1304_v61  ;;  %v891_v43 = vld [vmem:[%s4461_s2 + $0x400] sm:$0xff]  ;;  %v1177_v60 = vld [vmem:[%s4463_s9 + $0x1a8] sm:$0xff]  ;;  %v572_v61 = vadd.f32 %v571_v53, %v552_v56 }
 0x128   :  { %1078 = vmatpush.msra.mxu0 %v899_v62  ;;  %1387 = vmatpush.msra.mxu1 %v1156_v63  ;;  %v1124_v44 = vld [vmem:[%s4463_s9] sm:$0xff]  ;;  %v1277_v56 = vld [vmem:[%s4463_s9 + $0x4c8] sm:$0xff] }
 0x129   :  { %1403 = vmatpush.msra.mxu2 %v1236_v0  ;;  %1423 = vmatpush.msra.mxu3 %v1300_v1  ;;  %v1204_v45 = vld [vmem:[%s4463_s9 + $0x280] sm:$0xff]  ;;  %v591_v0 = vpop.f32.mrf.mxu3  ;;  %v428_v1 = vperm.slane %v3364_v2, 2 }
 0x12a   :  { %1079 = vmatpush.msra.mxu0 %v898_v3  ;;  %1388 = vmatpush.msra.mxu1 %v1152_v4  ;;  %v1268_v46 = vld [vmem:[%s4463_s9 + $0x480] sm:$0xff]  ;;  %v1173_v4 = vld [vmem:[%s4463_s9 + $0x188] sm:$0xff]  ;;  %v3522_v9 = vadd.f32 %v591_v0, %v572_v61 }
 0x12b   :  { %1404 = vmatpush.msra.mxu2 %v1232_v5  ;;  %1424 = vmatpush.msra.mxu3 %v1296_v6  ;;  %v762_v48 = vld [vmem:[%s4462_s0 + $0x40] sm:$0xff]  ;;  %v1269_v0 = vld [vmem:[%s4463_s9 + $0x488] sm:$0xff] }
 0x12c   :  { %1080 = vmatpush.msra.mxu0 %v897_v7  ;;  %1389 = vmatpush.msra.mxu1 %v1148_v8  ;;  %v1376_v36 = vld [vmem:[%s4463_s9 + $0x7e0] sm:$0xff] }
 0x12d   :  { %1405 = vmatpush.msra.mxu2 %v1228_v11  ;;  %1425 = vmatpush.msra.mxu3 %v1292_v12  ;;  %v1200_v51 = vld [vmem:[%s4463_s9 + $0x260] sm:$0xff]  ;;  %v1249_v11 = vld [vmem:[%s4463_s9 + $0x3e8] sm:$0xff] }
 0x12e   :  { %1081 = vmatpush.msra.mxu0 %v896_v13  ;;  %1390 = vmatpush.msra.mxu1 %v1144_v14  ;;  %v1264_v52 = vld [vmem:[%s4463_s9 + $0x460] sm:$0xff]  ;;  %v1313_v13 = vld [vmem:[%s4463_s9 + $0x5e8] sm:$0xff] }
 0x12f   :  { %1406 = vmatpush.msra.mxu2 %v1224_v15  ;;  %1426 = vmatpush.msra.mxu3 %v1288_v16  ;;  %v1372_v54 = vld [vmem:[%s4463_s9 + $0x7c0] sm:$0xff]  ;;  %v611_v5 = vpop.f32.mrf.mxu0  ;;  %v1165_v15 = vld [vmem:[%s4463_s9 + $0x148] sm:$0xff]  ;;  %v631_v19 = vpop.f32.mrf.mxu1 }
 0x130   :  { %1082 = vmatpush.msra.mxu0 %v895_v17  ;;  %1391 = vmatpush.msra.mxu1 %v1140_v18  ;;  %v1196_v57 = vld [vmem:[%s4463_s9 + $0x240] sm:$0xff]  ;;  %v612_v12 = vadd.f32 %v611_v5, %v428_v1  ;;  %v1245_v16 = vld [vmem:[%s4463_s9 + $0x3c8] sm:$0xff] }
 0x131   :  { %1407 = vmatpush.msra.mxu2 %v1220_v23  ;;  %1427 = vmatpush.msra.mxu3 %v1284_v24  ;;  %v1260_v58 = vld [vmem:[%s4463_s9 + $0x440] sm:$0xff]  ;;  %v1309_v17 = vld [vmem:[%s4463_s9 + $0x5c8] sm:$0xff] }
 0x132   :  { %1083 = vmatpush.msra.mxu0 %v894_v25  ;;  %1392 = vmatpush.msra.mxu1 %v1136_v26  ;;  %v1368_v59 = vld [vmem:[%s4463_s9 + $0x7a0] sm:$0xff]  ;;  %v1241_v23 = vld [vmem:[%s4463_s9 + $0x3a8] sm:$0xff]  ;;  %v632_v25 = vadd.f32 %v631_v19, %v612_v12  ;;  %v1178_v12 = vld [vmem:[%s4463_s9 + $0x1b0] sm:$0xff] }
 0x133   :  { %1408 = vmatpush.msra.mxu2 %v1216_v28  ;;  %1428 = vmatpush.msra.mxu3 %v1280_v29  ;;  %v1192_v62 = vld [vmem:[%s4463_s9 + $0x220] sm:$0xff]  ;;  %v1305_v26 = vld [vmem:[%s4463_s9 + $0x5a8] sm:$0xff] }
 0x134   :  { %1084 = vmatpush.msra.mxu0 %v893_v30  ;;  %1393 = vmatpush.msra.mxu1 %v1132_v31  ;;  %v1256_v63 = vld [vmem:[%s4463_s9 + $0x420] sm:$0xff]  ;;  %v1157_v28 = vld [vmem:[%s4463_s9 + $0x108] sm:$0xff] }
 0x135   :  { %1409 = vmatpush.msra.mxu2 %v1212_v33  ;;  %1429 = vmatpush.msra.mxu3 %v1276_v34  ;;  %v1364_v3 = vld [vmem:[%s4463_s9 + $0x780] sm:$0xff]  ;;  %v1237_v29 = vld [vmem:[%s4463_s9 + $0x388] sm:$0xff] }
 0x136   :  { %1085 = vmatpush.msra.mxu0 %v892_v21  ;;  %1394 = vmatpush.msra.mxu1 %v1128_v35  ;;  %v1188_v6 = vld [vmem:[%s4463_s9 + $0x200] sm:$0xff]  ;;  %v1301_v30 = vld [vmem:[%s4463_s9 + $0x588] sm:$0xff] }
 0x137   :  { %1410 = vmatpush.msra.mxu2 %v1208_v41  ;;  %1430 = vmatpush.msra.mxu3 %v1272_v42  ;;  %v1252_v7 = vld [vmem:[%s4463_s9 + $0x400] sm:$0xff]  ;;  %v1153_v33 = vld [vmem:[%s4463_s9 + $0xe8] sm:$0xff] }
 0x138   :  { %1086 = vmatpush.msra.mxu0 %v891_v43  ;;  %1395 = vmatpush.msra.mxu1 %v1124_v44  ;;  %v1360_v8 = vld [vmem:[%s4463_s9 + $0x760] sm:$0xff]  ;;  %v1233_v34 = vld [vmem:[%s4463_s9 + $0x368] sm:$0xff] }
 0x139   :  { %1411 = vmatpush.msra.mxu2 %v1204_v45  ;;  %1431 = vmatpush.msra.mxu3 %v1268_v46  ;;  %v1356_v14 = vld [vmem:[%s4463_s9 + $0x740] sm:$0xff]  ;;  %v1293_v41 = vld [vmem:[%s4463_s9 + $0x548] sm:$0xff] }
 0x13a   :  { %1087 = vmatmul.f32.vlgmr.msra.gmra.mxu0 %v762_v48  ;;  %1396 = vmatmul.f32.vlgmr.msra.gmra.mxu1 %v3467_v50  ;;  %v1352_v18 = vld [vmem:[%s4463_s9 + $0x720] sm:$0xff]  ;;  %v1145_v43 = vld [vmem:[%s4463_s9 + $0xa8] sm:$0xff] }
 0x13b   :  { %1440 = vmatpush.msrb.mxu0 %v1376_v36  ;;  %1460 = vmatpush.msrb.mxu1 %v1185_v37  ;;  %v1348_v27 = vld [vmem:[%s4463_s9 + $0x700] sm:$0xff]  ;;  %v1225_v44 = vld [vmem:[%s4463_s9 + $0x328] sm:$0xff] }
 0x13c   :  { %1412 = vmatpush.msra.mxu2 %v1200_v51  ;;  %1432 = vmatpush.msra.mxu3 %v1264_v52  ;;  %v1344_v32 = vld [vmem:[%s4463_s9 + $0x6e0] sm:$0xff]  ;;  %v1289_v45 = vld [vmem:[%s4463_s9 + $0x528] sm:$0xff] }
 0x13d   :  { %1441 = vmatpush.msrb.mxu0 %v1372_v54  ;;  %1461 = vmatpush.msrb.mxu1 %v1181_v55  ;;  %v1340_v21 = vld [vmem:[%s4463_s9 + $0x6c0] sm:$0xff]  ;;  %v1221_v48 = vld [vmem:[%s4463_s9 + $0x308] sm:$0xff] }
 0x13e   :  { %1413 = vmatpush.msra.mxu2 %v1196_v57  ;;  %1433 = vmatpush.msra.mxu3 %v1260_v58  ;;  %v651_v24 = vpop.f32.mrf.mxu2  ;;  %v671_v35 = vpop.f32.mrf.mxu3  ;;  %v1336_v42 = vld [vmem:[%s4463_s9 + $0x6a0] sm:$0xff]  ;;  %v1137_v37 = vld [vmem:[%s4463_s9 + $0x68] sm:$0xff] }
 0x13f   :  { %1442 = vmatpush.msrb.mxu0 %v1368_v59  ;;  %1462 = vmatpush.msrb.mxu1 %v1177_v60  ;;  %v652_v31 = vadd.f32 %v651_v24, %v632_v25  ;;  %v1332_v46 = vld [vmem:[%s4463_s9 + $0x680] sm:$0xff]  ;;  %v1217_v51 = vld [vmem:[%s4463_s9 + $0x2e8] sm:$0xff]  ;;  %v1170_v24 = vld [vmem:[%s4463_s9 + $0x170] sm:$0xff] }
 0x140   :  { %1414 = vmatpush.msra.mxu2 %v1192_v62  ;;  %1434 = vmatpush.msra.mxu3 %v1256_v63  ;;  %v1328_v36 = vld [vmem:[%s4463_s9 + $0x660] sm:$0xff]  ;;  %v1281_v52 = vld [vmem:[%s4463_s9 + $0x4e8] sm:$0xff]  ;;  %v1250_v25 = vld [vmem:[%s4463_s9 + $0x3f0] sm:$0xff] }
 0x141   :  { %1443 = vmatpush.msrb.mxu0 %v1364_v3  ;;  %1463 = vmatpush.msrb.mxu1 %v1173_v4  ;;  %v3591_v40 = vadd.f32 %v671_v35, %v652_v31  ;;  %v1324_v53 = vld [vmem:[%s4463_s9 + $0x640] sm:$0xff]  ;;  %v1133_v54 = vld [vmem:[%s4463_s9 + $0x48] sm:$0xff]  ;;  %v1186_v3 = vld [vmem:[%s4463_s9 + $0x1f0] sm:$0xff] }
 0x142   :  { %1415 = vmatpush.msra.mxu2 %v1188_v6  ;;  %1435 = vmatpush.msra.mxu3 %v1252_v7  ;;  %v1213_v55 = vld [vmem:[%s4463_s9 + $0x2c8] sm:$0xff]  ;;  %v1320_v57 = vld [vmem:[%s4463_s9 + $0x620] sm:$0xff]  ;;  %v1182_v7 = vld [vmem:[%s4463_s9 + $0x1d0] sm:$0xff] }
 0x143   :  { %1416 = vmatmul.f32.vlgmr.msra.gmra.mxu2 %v3522_v9  ;;  %1444 = vmatpush.msrb.mxu0 %v1360_v8  ;;  %v1129_v58 = vld [vmem:[%s4463_s9 + $0x28] sm:$0xff]  ;;  %v1316_v61 = vld [vmem:[%s4463_s9 + $0x600] sm:$0xff]  ;;  %v1310_v31 = vld [vmem:[%s4463_s9 + $0x5d0] sm:$0xff] }
 0x144   :  { %1464 = vmatpush.msrb.mxu1 %v1169_v10  ;;  %1480 = vmatpush.msrb.mxu2 %v1249_v11  ;;  %v1209_v59 = vld [vmem:[%s4463_s9 + $0x2a8] sm:$0xff]  ;;  %v1306_v35 = vld [vmem:[%s4463_s9 + $0x5b0] sm:$0xff] }
 0x145   :  { %1500 = vmatpush.msrb.mxu3 %v1313_v13  ;;  %1445 = vmatpush.msrb.mxu0 %v1356_v14  ;;  %v1273_v60 = vld [vmem:[%s4463_s9 + $0x4a8] sm:$0xff]  ;;  %v429_v14 = vperm.slane %v3364_v2, 3 }
 0x146   :  { %1465 = vmatpush.msrb.mxu1 %v1165_v15  ;;  %1481 = vmatpush.msrb.mxu2 %v1245_v16  ;;  %v1125_v62 = vld [vmem:[%s4463_s9 + $0x8] sm:$0xff] }
 0x147   :  { %1501 = vmatpush.msrb.mxu3 %v1309_v17  ;;  %1446 = vmatpush.msrb.mxu0 %v1352_v18  ;;  %v1205_v63 = vld [vmem:[%s4463_s9 + $0x288] sm:$0xff]  ;;  %v1174_v18 = vld [vmem:[%s4463_s9 + $0x190] sm:$0xff] }
 0x148   :  { %1466 = vmatpush.msrb.mxu1 %v1161_v22  ;;  %1482 = vmatpush.msrb.mxu2 %v1241_v23  ;;  %v1377_v1 = vld [vmem:[%s4463_s9 + $0x7e8] sm:$0xff] }
 0x149   :  { %1502 = vmatpush.msrb.mxu3 %v1305_v26  ;;  %1447 = vmatpush.msrb.mxu0 %v1348_v27  ;;  %v1201_v4 = vld [vmem:[%s4463_s9 + $0x268] sm:$0xff]  ;;  %v1314_v26 = vld [vmem:[%s4463_s9 + $0x5f0] sm:$0xff] }
 0x14a   :  { %1467 = vmatpush.msrb.mxu1 %v1157_v28  ;;  %1483 = vmatpush.msrb.mxu2 %v1237_v29  ;;  %v1265_v5 = vld [vmem:[%s4463_s9 + $0x468] sm:$0xff]  ;;  %v1166_v28 = vld [vmem:[%s4463_s9 + $0x150] sm:$0xff] }
 0x14b   :  { %1503 = vmatpush.msrb.mxu3 %v1301_v30  ;;  %1448 = vmatpush.msrb.mxu0 %v1344_v32  ;;  %v1373_v6 = vld [vmem:[%s4463_s9 + $0x7c8] sm:$0xff]  ;;  %v1246_v29 = vld [vmem:[%s4463_s9 + $0x3d0] sm:$0xff] }
 0x14c   :  { %1468 = vmatpush.msrb.mxu1 %v1153_v33  ;;  %1484 = vmatpush.msrb.mxu2 %v1233_v34  ;;  %v1197_v8 = vld [vmem:[%s4463_s9 + $0x248] sm:$0xff] }
 0x14d   :  { %1504 = vmatpush.msrb.mxu3 %v1297_v20  ;;  %1449 = vmatpush.msrb.mxu0 %v1340_v21  ;;  %v1261_v10 = vld [vmem:[%s4463_s9 + $0x448] sm:$0xff]  ;;  %v1162_v20 = vld [vmem:[%s4463_s9 + $0x130] sm:$0xff] }
 0x14e   :  { %1469 = vmatpush.msrb.mxu1 %v1149_v38  ;;  %1485 = vmatpush.msrb.mxu2 %v1229_v39  ;;  %v1369_v11 = vld [vmem:[%s4463_s9 + $0x7a8] sm:$0xff]  ;;  %v1242_v21 = vld [vmem:[%s4463_s9 + $0x3b0] sm:$0xff] }
 0x14f   :  { %1505 = vmatpush.msrb.mxu3 %v1293_v41  ;;  %1450 = vmatpush.msrb.mxu0 %v1336_v42  ;;  %v1193_v13 = vld [vmem:[%s4463_s9 + $0x228] sm:$0xff]  ;;  %v1158_v39 = vld [vmem:[%s4463_s9 + $0x110] sm:$0xff] }
 0x150   :  { %1436 = vmatmul.f32.vlgmr.msra.gmra.mxu3 %v3591_v40  ;;  %1470 = vmatpush.msrb.mxu1 %v1145_v43  ;;  %v1257_v15 = vld [vmem:[%s4463_s9 + $0x428] sm:$0xff]  ;;  %v1238_v41 = vld [vmem:[%s4463_s9 + $0x390] sm:$0xff] }
 0x151   :  { %1486 = vmatpush.msrb.mxu2 %v1225_v44  ;;  %1506 = vmatpush.msrb.mxu3 %v1289_v45  ;;  %v1365_v16 = vld [vmem:[%s4463_s9 + $0x788] sm:$0xff]  ;;  %v691_v17 = vpop.f32.mrf.mxu0  ;;  %v711_v30 = vpop.f32.mrf.mxu1  ;;  %v1302_v43 = vld [vmem:[%s4463_s9 + $0x590] sm:$0xff] }
 0x152   :  { %1451 = vmatpush.msrb.mxu0 %v1332_v46  ;;  %1471 = vmatpush.msrb.mxu1 %v1141_v47  ;;  %v1189_v2 = vld [vmem:[%s4463_s9 + $0x208] sm:$0xff]  ;;  %v692_v23 = vadd.f32 %v691_v17, %v429_v14  ;;  %v1154_v45 = vld [vmem:[%s4463_s9 + $0xf0] sm:$0xff] }
 0x153   :  { %1487 = vmatpush.msrb.mxu2 %v1221_v48  ;;  %1507 = vmatpush.msrb.mxu3 %v1285_v49  ;;  %v1253_v19 = vld [vmem:[%s4463_s9 + $0x408] sm:$0xff]  ;;  %v1234_v46 = vld [vmem:[%s4463_s9 + $0x370] sm:$0xff] }
 0x154   :  { %1452 = vmatpush.msrb.mxu0 %v1328_v36  ;;  %1472 = vmatpush.msrb.mxu1 %v1137_v37  ;;  %v1361_v22 = vld [vmem:[%s4463_s9 + $0x768] sm:$0xff]  ;;  %v712_v34 = vadd.f32 %v711_v30, %v692_v23  ;;  %v1298_v48 = vld [vmem:[%s4463_s9 + $0x570] sm:$0xff] }
 0x155   :  { %1488 = vmatpush.msrb.mxu2 %v1217_v51  ;;  %1508 = vmatpush.msrb.mxu3 %v1281_v52  ;;  %v1357_v27 = vld [vmem:[%s4463_s9 + $0x748] sm:$0xff]  ;;  %v1150_v37 = vld [vmem:[%s4463_s9 + $0xd0] sm:$0xff] }
 0x156   :  { %1453 = vmatpush.msrb.mxu0 %v1324_v53  ;;  %1473 = vmatpush.msrb.mxu1 %v1133_v54  ;;  %v1353_v32 = vld [vmem:[%s4463_s9 + $0x728] sm:$0xff]  ;;  %v1230_v51 = vld [vmem:[%s4463_s9 + $0x350] sm:$0xff] }
 0x157   :  { %1489 = vmatpush.msrb.mxu2 %v1213_v55  ;;  %1509 = vmatpush.msrb.mxu3 %v1277_v56  ;;  %v1349_v38 = vld [vmem:[%s4463_s9 + $0x708] sm:$0xff]  ;;  %v1294_v52 = vld [vmem:[%s4463_s9 + $0x550] sm:$0xff] }
 0x158   :  { %1454 = vmatpush.msrb.mxu0 %v1320_v57  ;;  %1474 = vmatpush.msrb.mxu1 %v1129_v58  ;;  %v1345_v44 = vld [vmem:[%s4463_s9 + $0x6e8] sm:$0xff]  ;;  %v1146_v54 = vld [vmem:[%s4463_s9 + $0xb0] sm:$0xff] }
 0x159   :  { %1490 = vmatpush.msrb.mxu2 %v1209_v59  ;;  %1510 = vmatpush.msrb.mxu3 %v1273_v60  ;;  %v1341_v49 = vld [vmem:[%s4463_s9 + $0x6c8] sm:$0xff]  ;;  %v1226_v55 = vld [vmem:[%s4463_s9 + $0x330] sm:$0xff] }
 0x15a   :  { %1455 = vmatpush.msrb.mxu0 %v1316_v61  ;;  %1475 = vmatpush.msrb.mxu1 %v1125_v62  ;;  %v1337_v53 = vld [vmem:[%s4463_s9 + $0x6a8] sm:$0xff]  ;;  %v1290_v56 = vld [vmem:[%s4463_s9 + $0x530] sm:$0xff] }
 0x15b   :  { %1491 = vmatpush.msrb.mxu2 %v1205_v63  ;;  %1511 = vmatpush.msrb.mxu3 %v1269_v0  ;;  %v1333_v57 = vld [vmem:[%s4463_s9 + $0x688] sm:$0xff]  ;;  %v1142_v58 = vld [vmem:[%s4463_s9 + $0x90] sm:$0xff] }
 0x15c   :  { %1476 = vmatmul.f32.vlgmr.msrb.gmra.mxu1 %v3467_v50  ;;  %1520 = vmatpush.msra.mxu0 %v1377_v1  ;;  %v1222_v59 = vld [vmem:[%s4463_s9 + $0x310] sm:$0xff]  ;;  %v1329_v61 = vld [vmem:[%s4463_s9 + $0x668] sm:$0xff] }
 0x15d   :  { %1540 = vmatpush.msra.mxu1 %v1186_v3  ;;  %1492 = vmatpush.msrb.mxu2 %v1201_v4  ;;  %v1286_v60 = vld [vmem:[%s4463_s9 + $0x510] sm:$0xff]  ;;  %v1325_v1 = vld [vmem:[%s4463_s9 + $0x648] sm:$0xff] }
 0x15e   :  { %1512 = vmatpush.msrb.mxu3 %v1265_v5  ;;  %1521 = vmatpush.msra.mxu0 %v1373_v6  ;;  %v1138_v62 = vld [vmem:[%s4463_s9 + $0x70] sm:$0xff]  ;;  %v1321_v6 = vld [vmem:[%s4463_s9 + $0x628] sm:$0xff] }
 0x15f   :  { %1541 = vmatpush.msra.mxu1 %v1182_v7  ;;  %1493 = vmatpush.msrb.mxu2 %v1197_v8  ;;  %v1218_v63 = vld [vmem:[%s4463_s9 + $0x2f0] sm:$0xff] }
 0x160   :  { %1513 = vmatpush.msrb.mxu3 %v1261_v10  ;;  %1522 = vmatpush.msra.mxu0 %v1369_v11  ;;  %v731_v33 = vpop.f32.mrf.mxu2  ;;  %v751_v47 = vpop.f32.mrf.mxu3  ;;  %v1282_v0 = vld [vmem:[%s4463_s9 + $0x4f0] sm:$0xff]  ;;  %v1317_v11 = vld [vmem:[%s4463_s9 + $0x608] sm:$0xff] }
 0x161   :  { %1542 = vmatpush.msra.mxu1 %v1178_v12  ;;  %1494 = vmatpush.msrb.mxu2 %v1193_v13  ;;  %v732_v42 = vadd.f32 %v731_v33, %v712_v34  ;;  %v1134_v3 = vld [vmem:[%s4463_s9 + $0x50] sm:$0xff]  ;;  %v1171_v33 = vld [vmem:[%s4463_s9 + $0x178] sm:$0xff] }
 0x162   :  { %1514 = vmatpush.msrb.mxu3 %v1257_v15  ;;  %1523 = vmatpush.msra.mxu0 %v1365_v16  ;;  %v1214_v4 = vld [vmem:[%s4463_s9 + $0x2d0] sm:$0xff]  ;;  %v1187_v16 = vld [vmem:[%s4463_s9 + $0x1f8] sm:$0xff] }
 0x163   :  { %1543 = vmatpush.msra.mxu1 %v1174_v18  ;;  %1495 = vmatpush.msrb.mxu2 %v1189_v2  ;;  %v3784_v36 = vadd.f32 %v751_v47, %v732_v42  ;;  %v1278_v5 = vld [vmem:[%s4463_s9 + $0x4d0] sm:$0xff]  ;;  %v1251_v34 = vld [vmem:[%s4463_s9 + $0x3f8] sm:$0xff] }
 0x164   :  { %1515 = vmatpush.msrb.mxu3 %v1253_v19  ;;  %1496 = vmatmul.f32.vlgmr.msrb.gmra.mxu2 %v3522_v9  ;;  %v1130_v7 = vld [vmem:[%s4463_s9 + $0x30] sm:$0xff]  ;;  %v1183_v19 = vld [vmem:[%s4463_s9 + $0x1d8] sm:$0xff] }
 0x165   :  { %1516 = vmatmul.f32.vlgmr.msrb.gmra.mxu3 %v3591_v40  ;;  %1524 = vmatpush.msra.mxu0 %v1361_v22  ;;  %v1210_v8 = vld [vmem:[%s4463_s9 + $0x2b0] sm:$0xff]  ;;  %v1163_v42 = vld [vmem:[%s4463_s9 + $0x138] sm:$0xff] }
 0x166   :  { %1544 = vmatpush.msra.mxu1 %v1170_v24  ;;  %1560 = vmatpush.msra.mxu2 %v1250_v25  ;;  %v1274_v10 = vld [vmem:[%s4463_s9 + $0x4b0] sm:$0xff]  ;;  %v1179_v25 = vld [vmem:[%s4463_s9 + $0x1b8] sm:$0xff] }
 0x167   :  { %1580 = vmatpush.msra.mxu3 %v1314_v26  ;;  %1525 = vmatpush.msra.mxu0 %v1357_v27  ;;  %v1126_v12 = vld [vmem:[%s4463_s9 + $0x10] sm:$0xff]  ;;  %v1239_v47 = vld [vmem:[%s4463_s9 + $0x398] sm:$0xff] }
 0x168   :  { %1545 = vmatpush.msra.mxu1 %v1166_v28  ;;  %1561 = vmatpush.msra.mxu2 %v1246_v29  ;;  %v1206_v13 = vld [vmem:[%s4463_s9 + $0x290] sm:$0xff]  ;;  %v1175_v29 = vld [vmem:[%s4463_s9 + $0x198] sm:$0xff] }
 0x169   :  { %1581 = vmatpush.msra.mxu3 %v1310_v31  ;;  %1526 = vmatpush.msra.mxu0 %v1353_v32  ;;  %v1270_v14 = vld [vmem:[%s4463_s9 + $0x490] sm:$0xff] }
 0x16a   :  { %1546 = vmatpush.msra.mxu1 %v1162_v20  ;;  %1562 = vmatpush.msra.mxu2 %v1242_v21  ;;  %v1378_v15 = vld [vmem:[%s4463_s9 + $0x7f0] sm:$0xff]  ;;  %v1315_v20 = vld [vmem:[%s4463_s9 + $0x5f8] sm:$0xff] }
 0x16b   :  { %1582 = vmatpush.msra.mxu3 %v1306_v35  ;;  %1527 = vmatpush.msra.mxu0 %v1349_v38  ;;  %v1202_v17 = vld [vmem:[%s4463_s9 + $0x270] sm:$0xff]  ;;  %v1167_v35 = vld [vmem:[%s4463_s9 + $0x158] sm:$0xff] }
 0x16c   :  { %1547 = vmatpush.msra.mxu1 %v1158_v39  ;;  %1563 = vmatpush.msra.mxu2 %v1238_v41  ;;  %v1266_v18 = vld [vmem:[%s4463_s9 + $0x470] sm:$0xff]  ;;  %v1247_v38 = vld [vmem:[%s4463_s9 + $0x3d8] sm:$0xff] }
 0x16d   :  { %1583 = vmatpush.msra.mxu3 %v1302_v43  ;;  %1528 = vmatpush.msra.mxu0 %v1345_v44  ;;  %v1374_v2 = vld [vmem:[%s4463_s9 + $0x7d0] sm:$0xff]  ;;  %v1311_v39 = vld [vmem:[%s4463_s9 + $0x5d8] sm:$0xff] }
 0x16e   :  { %1548 = vmatpush.msra.mxu1 %v1154_v45  ;;  %1564 = vmatpush.msra.mxu2 %v1234_v46  ;;  %v1198_v22 = vld [vmem:[%s4463_s9 + $0x250] sm:$0xff]  ;;  %v1243_v43 = vld [vmem:[%s4463_s9 + $0x3b8] sm:$0xff] }
 0x16f   :  { %1584 = vmatpush.msra.mxu3 %v1298_v48  ;;  %1529 = vmatpush.msra.mxu0 %v1341_v49  ;;  %v1262_v23 = vld [vmem:[%s4463_s9 + $0x450] sm:$0xff]  ;;  %v1307_v44 = vld [vmem:[%s4463_s9 + $0x5b8] sm:$0xff] }
 0x170   :  { %1549 = vmatpush.msra.mxu1 %v1150_v37  ;;  %1565 = vmatpush.msra.mxu2 %v1230_v51  ;;  %v1370_v24 = vld [vmem:[%s4463_s9 + $0x7b0] sm:$0xff]  ;;  %v1159_v46 = vld [vmem:[%s4463_s9 + $0x118] sm:$0xff] }
 0x171   :  { %1585 = vmatpush.msra.mxu3 %v1294_v52  ;;  %1456 = vmatmul.f32.vlgmr.msrb.gmra.mxu0 %v3784_v36  ;;  %v1194_v26 = vld [vmem:[%s4463_s9 + $0x230] sm:$0xff]  ;;  %v1303_v48 = vld [vmem:[%s4463_s9 + $0x598] sm:$0xff] }
 0x172   :  { %1530 = vmatpush.msra.mxu0 %v1337_v53  ;;  %1550 = vmatpush.msra.mxu1 %v1146_v54  ;;  %v1258_v27 = vld [vmem:[%s4463_s9 + $0x430] sm:$0xff]  ;;  %v1155_v37 = vld [vmem:[%s4463_s9 + $0xf8] sm:$0xff] }
 0x173   :  { %1566 = vmatpush.msra.mxu2 %v1226_v55  ;;  %1586 = vmatpush.msra.mxu3 %v1290_v56  ;;  %v1366_v28 = vld [vmem:[%s4463_s9 + $0x790] sm:$0xff]  ;;  %v1235_v51 = vld [vmem:[%s4463_s9 + $0x378] sm:$0xff] }
 0x174   :  { %1531 = vmatpush.msra.mxu0 %v1333_v57  ;;  %1551 = vmatpush.msra.mxu1 %v1142_v58  ;;  %v1190_v30 = vld [vmem:[%s4463_s9 + $0x210] sm:$0xff]  ;;  %v1299_v52 = vld [vmem:[%s4463_s9 + $0x578] sm:$0xff] }
 0x175   :  { %1567 = vmatpush.msra.mxu2 %v1222_v59  ;;  %1587 = vmatpush.msra.mxu3 %v1286_v60  ;;  %v1254_v31 = vld [vmem:[%s4463_s9 + $0x410] sm:$0xff]  ;;  %v1151_v54 = vld [vmem:[%s4463_s9 + $0xd8] sm:$0xff] }
 0x176   :  { %1532 = vmatpush.msra.mxu0 %v1329_v61  ;;  %1552 = vmatpush.msra.mxu1 %v1138_v62  ;;  %v1362_v32 = vld [vmem:[%s4463_s9 + $0x770] sm:$0xff]  ;;  %v1231_v55 = vld [vmem:[%s4463_s9 + $0x358] sm:$0xff] }
 0x177   :  { %1568 = vmatpush.msra.mxu2 %v1218_v63  ;;  %1588 = vmatpush.msra.mxu3 %v1282_v0  ;;  %v1358_v21 = vld [vmem:[%s4463_s9 + $0x750] sm:$0xff]  ;;  %v1295_v56 = vld [vmem:[%s4463_s9 + $0x558] sm:$0xff] }
 0x178   :  { %1533 = vmatpush.msra.mxu0 %v1325_v1  ;;  %1553 = vmatpush.msra.mxu1 %v1134_v3  ;;  %v1354_v41 = vld [vmem:[%s4463_s9 + $0x730] sm:$0xff]  ;;  %v1147_v58 = vld [vmem:[%s4463_s9 + $0xb8] sm:$0xff] }
 0x179   :  { %1569 = vmatpush.msra.mxu2 %v1214_v4  ;;  %1589 = vmatpush.msra.mxu3 %v1278_v5  ;;  %v1350_v45 = vld [vmem:[%s4463_s9 + $0x710] sm:$0xff]  ;;  %v1227_v59 = vld [vmem:[%s4463_s9 + $0x338] sm:$0xff] }
 0x17a   :  { %1534 = vmatpush.msra.mxu0 %v1321_v6  ;;  %1554 = vmatpush.msra.mxu1 %v1130_v7  ;;  %v1346_v49 = vld [vmem:[%s4463_s9 + $0x6f0] sm:$0xff]  ;;  %v1291_v60 = vld [vmem:[%s4463_s9 + $0x538] sm:$0xff] }
 0x17b   :  { %1570 = vmatpush.msra.mxu2 %v1210_v8  ;;  %1590 = vmatpush.msra.mxu3 %v1274_v10  ;;  %v1342_v53 = vld [vmem:[%s4463_s9 + $0x6d0] sm:$0xff]  ;;  %v1143_v62 = vld [vmem:[%s4463_s9 + $0x98] sm:$0xff] }
 0x17c   :  { %1535 = vmatpush.msra.mxu0 %v1317_v11  ;;  %1555 = vmatpush.msra.mxu1 %v1126_v12  ;;  %v1338_v57 = vld [vmem:[%s4463_s9 + $0x6b0] sm:$0xff]  ;;  %v1223_v63 = vld [vmem:[%s4463_s9 + $0x318] sm:$0xff]  ;;  %v1967_v11 = vld [vmem:[%s4464_s3] ss:$0 sm:$0xff] }
 0x17d   :  { %1571 = vmatpush.msra.mxu2 %v1206_v13  ;;  %1591 = vmatpush.msra.mxu3 %v1270_v14  ;;  %v1334_v61 = vld [vmem:[%s4463_s9 + $0x690] sm:$0xff]  ;;  %v1287_v0 = vld [vmem:[%s4463_s9 + $0x518] sm:$0xff] }
 0x17e   :  { %1536 = vmatmul.f32.vlgmr.msra.gmra.mxu0 %v3784_v36  ;;  %1556 = vmatmul.f32.vlgmr.msra.gmra.mxu1 %v3467_v50  ;;  %v1330_v1 = vld [vmem:[%s4463_s9 + $0x670] sm:$0xff]  ;;  %v1139_v3 = vld [vmem:[%s4463_s9 + $0x78] sm:$0xff] }
 0x17f   :  { %1600 = vmatpush.msrb.mxu0 %v1378_v15  ;;  %1620 = vmatpush.msrb.mxu1 %v1187_v16  ;;  %v1219_v4 = vld [vmem:[%s4463_s9 + $0x2f8] sm:$0xff]  ;;  %v1326_v6 = vld [vmem:[%s4463_s9 + $0x650] sm:$0xff] }
 0x180   :  { %1572 = vmatpush.msra.mxu2 %v1202_v17  ;;  %1592 = vmatpush.msra.mxu3 %v1266_v18  ;;  %v1283_v5 = vld [vmem:[%s4463_s9 + $0x4f8] sm:$0xff]  ;;  %v1322_v12 = vld [vmem:[%s4463_s9 + $0x630] sm:$0xff] }
 0x181   :  { %1601 = vmatpush.msrb.mxu0 %v1374_v2  ;;  %1621 = vmatpush.msrb.mxu1 %v1183_v19  ;;  %v1135_v7 = vld [vmem:[%s4463_s9 + $0x58] sm:$0xff]  ;;  %v1318_v17 = vld [vmem:[%s4463_s9 + $0x610] sm:$0xff] }
 0x182   :  { %1573 = vmatpush.msra.mxu2 %v1198_v22  ;;  %1593 = vmatpush.msra.mxu3 %v1262_v23  ;;  %v1215_v8 = vld [vmem:[%s4463_s9 + $0x2d8] sm:$0xff] }
 0x183   :  { %1602 = vmatpush.msrb.mxu0 %v1370_v24  ;;  %1622 = vmatpush.msrb.mxu1 %v1179_v25  ;;  %v1279_v10 = vld [vmem:[%s4463_s9 + $0x4d8] sm:$0xff] }
 0x184   :  { %1574 = vmatpush.msra.mxu2 %v1194_v26  ;;  %1594 = vmatpush.msra.mxu3 %v1258_v27  ;;  %v1131_v13 = vld [vmem:[%s4463_s9 + $0x38] sm:$0xff]  ;;  %v1120_v27 = vld [vmem:[%s4466_s8 + $0xe0] sm:$0xff] }
 0x185   :  { %1603 = vmatpush.msrb.mxu0 %v1366_v28  ;;  %1623 = vmatpush.msrb.mxu1 %v1175_v29  ;;  %v1211_v15 = vld [vmem:[%s4463_s9 + $0x2b8] sm:$0xff] }
 0x186   :  { %1575 = vmatpush.msra.mxu2 %v1190_v30  ;;  %1595 = vmatpush.msra.mxu3 %v1254_v31  ;;  %v1275_v16 = vld [vmem:[%s4463_s9 + $0x4b8] sm:$0xff] }
 0x187   :  { %1576 = vmatmul.f32.vlgmr.msra.gmra.mxu2 %v3522_v9  ;;  %1596 = vmatmul.f32.vlgmr.msra.gmra.mxu3 %v3591_v40  ;;  %v1127_v18 = vld [vmem:[%s4463_s9 + $0x18] sm:$0xff] }
 0x188   :  { %1604 = vmatpush.msrb.mxu0 %v1362_v32  ;;  %1624 = vmatpush.msrb.mxu1 %v1171_v33  ;;  %v1207_v2 = vld [vmem:[%s4463_s9 + $0x298] sm:$0xff] }
 0x189   :  { %1640 = vmatpush.msrb.mxu2 %v1251_v34  ;;  %1660 = vmatpush.msrb.mxu3 %v1315_v20  ;;  %v1271_v19 = vld [vmem:[%s4463_s9 + $0x498] sm:$0xff] }
 0x18a   :  { %1605 = vmatpush.msrb.mxu0 %v1358_v21  ;;  %1625 = vmatpush.msrb.mxu1 %v1167_v35  ;;  %v1379_v24 = vld [vmem:[%s4463_s9 + $0x7f8] sm:$0xff]  ;;  %v1112_v21 = vld [vmem:[%s4466_s8 + $0xa0] sm:$0xff] }
 0x18b   :  { %1641 = vmatpush.msrb.mxu2 %v1247_v38  ;;  %1661 = vmatpush.msrb.mxu3 %v1311_v39  ;;  %v1203_v25 = vld [vmem:[%s4463_s9 + $0x278] sm:$0xff] }
 0x18c   :  { %1606 = vmatpush.msrb.mxu0 %v1354_v41  ;;  %1626 = vmatpush.msrb.mxu1 %v1163_v42  ;;  %v1267_v26 = vld [vmem:[%s4463_s9 + $0x478] sm:$0xff] }
 0x18d   :  { %1642 = vmatpush.msrb.mxu2 %v1243_v43  ;;  %1662 = vmatpush.msrb.mxu3 %v1307_v44  ;;  %v1375_v28 = vld [vmem:[%s4463_s9 + $0x7d8] sm:$0xff]  ;;  %v1108_v44 = vld [vmem:[%s4466_s8 + $0x80] sm:$0xff] }
 0x18e   :  { %1607 = vmatpush.msrb.mxu0 %v1350_v45  ;;  %1627 = vmatpush.msrb.mxu1 %v1159_v46  ;;  %v1199_v30 = vld [vmem:[%s4463_s9 + $0x258] sm:$0xff]  ;;  %v1121_v45 = vld [vmem:[%s4466_s8 + $0xe8] sm:$0xff] }
 0x18f   :  { %1643 = vmatpush.msrb.mxu2 %v1239_v47  ;;  %1663 = vmatpush.msrb.mxu3 %v1303_v48  ;;  %v1263_v31 = vld [vmem:[%s4463_s9 + $0x458] sm:$0xff]  ;;  %v1122_v48 = vld [vmem:[%s4466_s8 + $0xf0] sm:$0xff] }
 0x190   :  { %1608 = vmatpush.msrb.mxu0 %v1346_v49  ;;  %1628 = vmatpush.msrb.mxu1 %v1155_v37  ;;  %v1371_v33 = vld [vmem:[%s4463_s9 + $0x7b8] sm:$0xff]  ;;  %v1104_v37 = vld [vmem:[%s4466_s8 + $0x60] sm:$0xff] }
 0x191   :  { %1644 = vmatpush.msrb.mxu2 %v1235_v51  ;;  %1664 = vmatpush.msrb.mxu3 %v1299_v52  ;;  %v1195_v34 = vld [vmem:[%s4463_s9 + $0x238] sm:$0xff]  ;;  %v1100_v52 = vld [vmem:[%s4466_s8 + $0x40] sm:$0xff] }
 0x192   :  { %1609 = vmatpush.msrb.mxu0 %v1342_v53  ;;  %1629 = vmatpush.msrb.mxu1 %v1151_v54  ;;  %v1259_v20 = vld [vmem:[%s4463_s9 + $0x438] sm:$0xff]  ;;  %v1113_v53 = vld [vmem:[%s4466_s8 + $0xa8] sm:$0xff] }
 0x193   :  { %1645 = vmatpush.msrb.mxu2 %v1231_v55  ;;  %1665 = vmatpush.msrb.mxu3 %v1295_v56  ;;  %v928_v14 = vpop.f32.mrf.mxu0  ;;  %v1367_v38 = vld [vmem:[%s4463_s9 + $0x798] sm:$0xff]  ;;  %v1114_v56 = vld [vmem:[%s4466_s8 + $0xb0] sm:$0xff] }
 0x194   :  { %1610 = vmatpush.msrb.mxu0 %v1338_v57  ;;  %1630 = vmatpush.msrb.mxu1 %v1147_v58  ;;  %v929_v22 = vadd.f32 %v1967_v11, %v928_v14  ;;  %v948_v23 = vpop.f32.mrf.mxu1  ;;  %v1191_v39 = vld [vmem:[%s4463_s9 + $0x218] sm:$0xff]  ;;  %v1096_v58 = vld [vmem:[%s4466_s8 + $0x20] sm:$0xff] }
 0x195   :  { %1646 = vmatpush.msrb.mxu2 %v1227_v59  ;;  %1666 = vmatpush.msrb.mxu3 %v1291_v60  ;;  %v1255_v42 = vld [vmem:[%s4463_s9 + $0x418] sm:$0xff]  ;;  %v1109_v59 = vld [vmem:[%s4466_s8 + $0x88] sm:$0xff] }
 0x196   :  { %1611 = vmatpush.msrb.mxu0 %v1334_v61  ;;  %1631 = vmatpush.msrb.mxu1 %v1143_v62  ;;  %v949_v29 = vadd.f32 %v948_v23, %v929_v22  ;;  %v1363_v43 = vld [vmem:[%s4463_s9 + $0x778] sm:$0xff]  ;;  %v1110_v61 = vld [vmem:[%s4466_s8 + $0x90] sm:$0xff] }
 0x197   :  { %1647 = vmatpush.msrb.mxu2 %v1223_v63  ;;  %1667 = vmatpush.msrb.mxu3 %v1287_v0  ;;  %v968_v32 = vpop.f32.mrf.mxu2  ;;  %v1359_v47 = vld [vmem:[%s4463_s9 + $0x758] sm:$0xff]  ;;  %v1092_v63 = vld [vmem:[%s4466_s8] sm:$0xff]  ;;  %v1105_v0 = vld [vmem:[%s4466_s8 + $0x68] sm:$0xff] }
 0x198   :  { %1612 = vmatpush.msrb.mxu0 %v1330_v1  ;;  %1632 = vmatpush.msrb.mxu1 %v1139_v3  ;;  %v969_v35 = vadd.f32 %v968_v32, %v949_v29  ;;  %v1355_v51 = vld [vmem:[%s4463_s9 + $0x738] sm:$0xff] }
 0x199   :  { %1648 = vmatpush.msrb.mxu2 %v1219_v4  ;;  %1668 = vmatpush.msrb.mxu3 %v1283_v5  ;;  %v1351_v55 = vld [vmem:[%s4463_s9 + $0x718] sm:$0xff]  ;;  %v1106_v4 = vld [vmem:[%s4466_s8 + $0x70] sm:$0xff] }
 0x19a   :  { %1613 = vmatpush.msrb.mxu0 %v1326_v6  ;;  %1633 = vmatpush.msrb.mxu1 %v1135_v7  ;;  %v988_v41 = vpop.f32.mrf.mxu3  ;;  %v1347_v60 = vld [vmem:[%s4463_s9 + $0x6f8] sm:$0xff]  ;;  %v1101_v6 = vld [vmem:[%s4466_s8 + $0x48] sm:$0xff] }
 0x19b   :  { %1649 = vmatpush.msrb.mxu2 %v1215_v8  ;;  %1669 = vmatpush.msrb.mxu3 %v1279_v10  ;;  %v989_v46 = vadd.f32 %v988_v41, %v969_v35  ;;  %v1343_v3 = vld [vmem:[%s4463_s9 + $0x6d8] sm:$0xff]  ;;  %v1102_v10 = vld [vmem:[%s4466_s8 + $0x50] sm:$0xff] }
 0x19c   :  { %1614 = vmatpush.msrb.mxu0 %v1322_v12  ;;  %1634 = vmatpush.msrb.mxu1 %v1131_v13  ;;  %v1123_v5 = vld [vmem:[%s4466_s8 + $0xf8] sm:$0xff]  ;;  %v1097_v13 = vld [vmem:[%s4466_s8 + $0x28] sm:$0xff]  ;;  %v1832_v35 = vld [vmem:[%s4468_s11 + $0xf0] sm:$0xff] }
 0x19d   :  { %1650 = vmatpush.msrb.mxu2 %v1211_v15  ;;  %1670 = vmatpush.msrb.mxu3 %v1275_v16  ;;  %v1008_v49 = vpop.f32.mrf.mxu0  ;;  %v1339_v8 = vld [vmem:[%s4463_s9 + $0x6b8] sm:$0xff]  ;;  %v1098_v15 = vld [vmem:[%s4466_s8 + $0x30] sm:$0xff] }
 0x19e   :  { %1615 = vmatpush.msrb.mxu0 %v1318_v17  ;;  %1635 = vmatpush.msrb.mxu1 %v1127_v18  ;;  %v1009_v54 = vadd.f32 %v1008_v49, %v989_v46  ;;  %v1119_v12 = vld [vmem:[%s4466_s8 + $0xd8] sm:$0xff]  ;;  %v1093_v17 = vld [vmem:[%s4466_s8 + $0x8] sm:$0xff]  ;;  %v1830_v46 = vld [vmem:[%s4468_s11 + $0xe0] sm:$0xff] }
 0x19f   :  { %1651 = vmatpush.msrb.mxu2 %v1207_v2  ;;  %1671 = vmatpush.msrb.mxu3 %v1271_v19  ;;  %v1335_v14 = vld [vmem:[%s4463_s9 + $0x698] sm:$0xff]  ;;  %v1094_v19 = vld [vmem:[%s4466_s8 + $0x10] sm:$0xff]  ;;  %v1811_v49 = vld [vmem:[%s4468_s11 + $0x48] sm:$0xff] }
 0x1a0   :  { %1616 = vmatmul.f32.vlgmr.msrb.gmra.mxu0 %v3784_v36  ;;  %1636 = vmatmul.f32.vlgmr.msrb.gmra.mxu1 %v3467_v50  ;;  %v1116_v50 = vld [vmem:[%s4466_s8 + $0xc0] sm:$0xff]  ;;  %v1028_v57 = vpop.f32.mrf.mxu1  ;;  %v1115_v16 = vld [vmem:[%s4466_s8 + $0xb8] sm:$0xff] }
 0x1a1   :  { %1680 = vmatpush.msra.mxu0 %v1379_v24  ;;  %1652 = vmatpush.msrb.mxu2 %v1203_v25  ;;  %v1029_v1 = vadd.f32 %v1028_v57, %v1009_v54  ;;  %v1331_v2 = vld [vmem:[%s4463_s9 + $0x678] sm:$0xff]  ;;  %v1808_v57 = vld [vmem:[%s4468_s11 + $0x30] sm:$0xff] }
 0x1a2   :  { %1672 = vmatpush.msrb.mxu3 %v1267_v26  ;;  %1712 = vmatpush.msra.mxu1 %v1120_v27  ;;  %v1111_v23 = vld [vmem:[%s4466_s8 + $0x98] sm:$0xff] }
 0x1a3   :  { %1681 = vmatpush.msra.mxu0 %v1375_v28  ;;  %1653 = vmatpush.msrb.mxu2 %v1199_v30  ;;  %v1048_v62 = vpop.f32.mrf.mxu2  ;;  %v1327_v24 = vld [vmem:[%s4463_s9 + $0x658] sm:$0xff] }
 0x1a4   :  { %1673 = vmatpush.msrb.mxu3 %v1263_v31  ;;  %1713 = vmatpush.msra.mxu1 %v1116_v50  ;;  %v1049_v7 = vadd.f32 %v1048_v62, %v1029_v1  ;;  %v1323_v26 = vld [vmem:[%s4463_s9 + $0x638] sm:$0xff]  ;;  %v1826_v62 = vld [vmem:[%s4468_s11 + $0xc0] sm:$0xff]  ;;  %v1859_v1 = vld [vmem:[%s4468_s11 + $0x1c8] sm:$0xff] }
 0x1a5   :  { %1682 = vmatpush.msra.mxu0 %v1371_v33  ;;  %1654 = vmatpush.msrb.mxu2 %v1195_v34  ;;  %v1107_v28 = vld [vmem:[%s4466_s8 + $0x78] sm:$0xff]  ;;  %v1816_v33 = vld [vmem:[%s4468_s11 + $0x70] sm:$0xff]  ;;  %v1814_v34 = vld [vmem:[%s4468_s11 + $0x60] sm:$0xff] }
 0x1a6   :  { %1674 = vmatpush.msrb.mxu3 %v1259_v20  ;;  %1714 = vmatpush.msra.mxu1 %v1112_v21  ;;  %v1068_v11 = vpop.f32.mrf.mxu3  ;;  %v1319_v29 = vld [vmem:[%s4463_s9 + $0x618] sm:$0xff] }
 0x1a7   :  { %1683 = vmatpush.msra.mxu0 %v1367_v38  ;;  %1655 = vmatpush.msrb.mxu2 %v1191_v39  ;;  %v1069_v18 = vadd.f32 %v1068_v11, %v1049_v7  ;;  %v1103_v30 = vld [vmem:[%s4466_s8 + $0x58] sm:$0xff]  ;;  %v1848_v39 = vld [vmem:[%s4468_s11 + $0x170] sm:$0xff]  ;;  %v1858_v7 = vld [vmem:[%s4468_s11 + $0x1c0] sm:$0xff] }
 0x1a8   :  { %1675 = vmatpush.msrb.mxu3 %v1255_v42  ;;  %1656 = vmatmul.f32.vlgmr.msrb.gmra.mxu2 %v3522_v9  ;;  %v1117_v9 = vld [vmem:[%s4466_s8 + $0xc8] sm:$0xff]  ;;  %v1099_v31 = vld [vmem:[%s4466_s8 + $0x38] sm:$0xff]  ;;  %v1824_v11 = vld [vmem:[%s4468_s11 + $0xb0] sm:$0xff] }
 0x1a9   :  { %1676 = vmatmul.f32.vlgmr.msrb.gmra.mxu3 %v3591_v40  ;;  %1684 = vmatpush.msra.mxu0 %v1363_v43  ;;  %v1118_v40 = vld [vmem:[%s4466_s8 + $0xd0] sm:$0xff]  ;;  %v1095_v32 = vld [vmem:[%s4466_s8 + $0x18] sm:$0xff]  ;;  %v1831_v42 = vld [vmem:[%s4468_s11 + $0xe8] sm:$0xff] }
 0x1aa   :  { %1715 = vmatpush.msra.mxu1 %v1108_v44  ;;  %1732 = vmatpush.msra.mxu2 %v1121_v45  ;;  %v1817_v50 = vld [vmem:[%s4468_s11 + $0x78] sm:$0xff]  ;;  %v1847_v43 = vld [vmem:[%s4468_s11 + $0x168] sm:$0xff]  ;;  %v1864_v44 = vld [vmem:[%s4468_s11 + $0x1f0] sm:$0xff] }
 0x1ab   :  { %1685 = vmatpush.msra.mxu0 %v1359_v47  ;;  %1752 = vmatpush.msra.mxu3 %v1122_v48  ;;  %v1833_v20 = vld [vmem:[%s4468_s11 + $0xf8] sm:$0xff]  ;;  %v1812_v45 = vld [vmem:[%s4468_s11 + $0x50] sm:$0xff]  ;;  %v1846_v47 = vld [vmem:[%s4468_s11 + $0x160] sm:$0xff] }
 0x1ac   :  { %1716 = vmatpush.msra.mxu1 %v1104_v37  ;;  %1733 = vmatpush.msra.mxu2 %v1117_v9  ;;  %v1849_v21 = vld [vmem:[%s4468_s11 + $0x178] sm:$0xff]  ;;  %v1863_v48 = vld [vmem:[%s4468_s11 + $0x1e8] sm:$0xff] }
 0x1ad   :  { %1686 = vmatpush.msra.mxu0 %v1355_v51  ;;  %1753 = vmatpush.msra.mxu3 %v1118_v40  ;;  %v1813_v38 = vld [vmem:[%s4468_s11 + $0x58] sm:$0xff]  ;;  %v1862_v51 = vld [vmem:[%s4468_s11 + $0x1e0] sm:$0xff] }
 0x1ae   :  { %1717 = vmatpush.msra.mxu1 %v1100_v52  ;;  %1734 = vmatpush.msra.mxu2 %v1113_v53  ;;  %v1865_v41 = vld [vmem:[%s4468_s11 + $0x1f8] sm:$0xff]  ;;  %v1810_v40 = vld [vmem:[%s4468_s11 + $0x40] sm:$0xff]  ;;  %v1828_v52 = vld [vmem:[%s4468_s11 + $0xd0] sm:$0xff] }
 0x1af   :  { %1687 = vmatpush.msra.mxu0 %v1351_v55  ;;  %1754 = vmatpush.msra.mxu3 %v1114_v56  ;;  %v1829_v37 = vld [vmem:[%s4468_s11 + $0xd8] sm:$0xff]  ;;  %v1844_v53 = vld [vmem:[%s4468_s11 + $0x150] sm:$0xff] }
 0x1b0   :  { %1718 = vmatpush.msra.mxu1 %v1096_v58  ;;  %1735 = vmatpush.msra.mxu2 %v1109_v59  ;;  %v1845_v9 = vld [vmem:[%s4468_s11 + $0x158] sm:$0xff]  ;;  %v1827_v58 = vld [vmem:[%s4468_s11 + $0xc8] sm:$0xff] }
 0x1b1   :  { %1688 = vmatpush.msra.mxu0 %v1347_v60  ;;  %1755 = vmatpush.msra.mxu3 %v1110_v61  ;;  %v1861_v54 = vld [vmem:[%s4468_s11 + $0x1d8] sm:$0xff]  ;;  %v1843_v59 = vld [vmem:[%s4468_s11 + $0x148] sm:$0xff]  ;;  %v1860_v60 = vld [vmem:[%s4468_s11 + $0x1d0] sm:$0xff] }
 0x1b2   :  { %1719 = vmatpush.msra.mxu1 %v1092_v63  ;;  %1736 = vmatpush.msra.mxu2 %v1105_v0  ;;  %v1809_v55 = vld [vmem:[%s4468_s11 + $0x38] sm:$0xff]  ;;  %v1807_v61 = vld [vmem:[%s4468_s11 + $0x28] sm:$0xff]  ;;  %v1842_v63 = vld [vmem:[%s4468_s11 + $0x140] sm:$0xff] }
 0x1b3   :  { %1689 = vmatpush.msra.mxu0 %v1343_v3  ;;  %1756 = vmatpush.msra.mxu3 %v1106_v4  ;;  %v1806_v3 = vld [vmem:[%s4468_s11 + $0x20] sm:$0xff]  ;;  %v1825_v4 = vld [vmem:[%s4468_s11 + $0xb8] sm:$0xff] }
 0x1b4   :  { %1772 = vmatpush.msrb.mxu1 %v1123_v5  ;;  %1737 = vmatpush.msra.mxu2 %v1101_v6  ;;  %v1841_v6 = vld [vmem:[%s4468_s11 + $0x138] sm:$0xff] }
 0x1b5   :  { %1690 = vmatpush.msra.mxu0 %v1339_v8  ;;  %1757 = vmatpush.msra.mxu3 %v1102_v10  ;;  %v1805_v10 = vld [vmem:[%s4468_s11 + $0x18] sm:$0xff] }
 0x1b6   :  { %1773 = vmatpush.msrb.mxu1 %v1119_v12  ;;  %1738 = vmatpush.msra.mxu2 %v1097_v13  ;;  %v1840_v12 = vld [vmem:[%s4468_s11 + $0x130] sm:$0xff]  ;;  %v1857_v13 = vld [vmem:[%s4468_s11 + $0x1b8] sm:$0xff] }
 0x1b7   :  { %1691 = vmatpush.msra.mxu0 %v1335_v14  ;;  %v1088_v22 = vpop.f32.mrf.mxu0  ;;  %1758 = vmatpush.msra.mxu3 %v1098_v15  ;;  %v4322_v56 = vpop.f32.mrf.mxu1  ;;  %v1804_v14 = vld [vmem:[%s4468_s11 + $0x10] sm:$0xff]  ;;  %v1823_v15 = vld [vmem:[%s4468_s11 + $0xa8] sm:$0xff] }
 0x1b8   :  { %v1089_v25 = vadd.f32 %v1088_v22, %v1069_v18  ;;  %1774 = vmatpush.msrb.mxu1 %v1115_v16  ;;  %1739 = vmatpush.msra.mxu2 %v1093_v17  ;;  %v1839_v16 = vld [vmem:[%s4468_s11 + $0x128] sm:$0xff]  ;;  %v1856_v17 = vld [vmem:[%s4468_s11 + $0x1b0] sm:$0xff] }
 0x1b9   :  { %1692 = vmatpush.msra.mxu0 %v1331_v2  ;;  %1759 = vmatpush.msra.mxu3 %v1094_v19  ;;  %v1803_v18 = vld [vmem:[%s4468_s11 + $0x8] sm:$0xff]  ;;  %v1822_v2 = vld [vmem:[%s4468_s11 + $0xa0] sm:$0xff] }
 0x1ba   :  { %v1091_v27 = vmax.f32 %v1089_v25, 0.0  ;;  %1775 = vmatpush.msrb.mxu1 %v1111_v23  ;;  %1870 = vmatpush.msrb.mxu2 %v1817_v50  ;;  %v1838_v19 = vld [vmem:[%s4468_s11 + $0x120] sm:$0xff]  ;;  %v1855_v22 = vld [vmem:[%s4468_s11 + $0x1a8] sm:$0xff]  ;;  %v1821_v25 = vld [vmem:[%s4468_s11 + $0x98] sm:$0xff] }
 0x1bb   :  { %1693 = vmatpush.msra.mxu0 %v1327_v24  ;;  %1890 = vmatpush.msrb.mxu3 %v1833_v20  ;;  %v1802_v24 = vld [vmem:[%s4468_s11] sm:$0xff]  ;;  %v1853_v50 = vld [vmem:[%s4468_s11 + $0x198] sm:$0xff] }
 0x1bc   :  { %1963 = vmatmul.msk.f32.vlgmr.msra.gmra.mxu1 %vm1700_vm2, %v1091_v27  ;;  %1964 = vmatmul.msk.f32.vlgmr.msra.gmra.mxu2 %vm1700_vm2, %v1091_v27  ;;  %v1818_v20 = vld [vmem:[%s4468_s11 + $0x80] sm:$0xff] }
 0x1bd   :  { %1694 = vmatpush.msra.mxu0 %v1323_v26  ;;  %1965 = vmatmul.msk.f32.vlgmr.msra.gmra.mxu3 %vm1700_vm2, %v1091_v27 }
 0x1be   :  { %1776 = vmatpush.msrb.mxu1 %v1107_v28  ;;  %1871 = vmatpush.msrb.mxu2 %v1816_v33  ;;  %v1854_v28 = vld [vmem:[%s4468_s11 + $0x1a0] sm:$0xff]  ;;  %v1819_v33 = vld [vmem:[%s4468_s11 + $0x88] sm:$0xff] }
 0x1bf   :  { %1695 = vmatpush.msra.mxu0 %v1319_v29  ;;  %1891 = vmatpush.msrb.mxu3 %v1832_v35  ;;  %v1851_v35 = vld [vmem:[%s4468_s11 + $0x188] sm:$0xff] }
 0x1c0   :  { %1696 = vmatmul.f32.vlgmr.msra.gmra.mxu0 %v3784_v36  ;;  %1777 = vmatpush.msrb.mxu1 %v1103_v30  ;;  %v1815_v36 = vld [vmem:[%s4468_s11 + $0x68] sm:$0xff]  ;;  %v1820_v30 = vld [vmem:[%s4468_s11 + $0x90] sm:$0xff] }
 0x1c1   :  { %1872 = vmatpush.msrb.mxu2 %v1815_v36  ;;  %1910 = vmatpush.msrb.mxu0 %v1849_v21  ;;  %v1835_v36 = vld [vmem:[%s4468_s11 + $0x108] sm:$0xff]  ;;  %v1834_v21 = vld [vmem:[%s4468_s11 + $0x100] sm:$0xff] }
 0x1c2   :  { %1778 = vmatpush.msrb.mxu1 %v1099_v31  ;;  %1892 = vmatpush.msrb.mxu3 %v1831_v42 }
 0x1c3   :  { %1873 = vmatpush.msrb.mxu2 %v1814_v34  ;;  %1911 = vmatpush.msrb.mxu0 %v1848_v39  ;;  %v1852_v34 = vld [vmem:[%s4468_s11 + $0x190] sm:$0xff] }
 0x1c4   :  { %1779 = vmatpush.msrb.mxu1 %v1095_v32  ;;  %1893 = vmatpush.msrb.mxu3 %v1830_v46  ;;  %v1836_v32 = vld [vmem:[%s4468_s11 + $0x110] sm:$0xff] }
 0x1c5   :  { %1966 = vmatmul.msk.f32.vlgmr.msrb.gmra.mxu1 %vm1700_vm2, %v1091_v27  ;;  %1874 = vmatpush.msrb.mxu2 %v1813_v38  ;;  %v1837_v27 = vld [vmem:[%s4468_s11 + $0x118] sm:$0xff] }
 0x1c6   :  { %1930 = vmatpush.msra.mxu1 %v1865_v41  ;;  %1912 = vmatpush.msrb.mxu0 %v1847_v43  ;;  %v4345_v0 = vpop.f32.mrf.mxu2  ;;  %v1850_v41 = vld [vmem:[%s4468_s11 + $0x180] sm:$0xff] }
 0x1c7   :  { %1875 = vmatpush.msrb.mxu2 %v1812_v45  ;;  %1894 = vmatpush.msrb.mxu3 %v1829_v37  ;;  %v1784_v45 = vld [vmem:[%s4469_s10] sm:$0xf] }
 0x1c8   :  { %1931 = vmatpush.msra.mxu1 %v1864_v44  ;;  %1913 = vmatpush.msrb.mxu0 %v1846_v47  ;;  %v1418_v44 = vadd.f32 %v4345_v0, %v4322_v56 }
 0x1c9   :  { %1876 = vmatpush.msrb.mxu2 %v1811_v49  ;;  %1895 = vmatpush.msrb.mxu3 %v1828_v52 }
 0x1ca   :  { %1932 = vmatpush.msra.mxu1 %v1863_v48  ;;  %1914 = vmatpush.msrb.mxu0 %v1845_v9 }
 0x1cb   :  { %1877 = vmatpush.msrb.mxu2 %v1810_v40  ;;  %1896 = vmatpush.msrb.mxu3 %v1827_v58 }
 0x1cc   :  { %1933 = vmatpush.msra.mxu1 %v1862_v51  ;;  %1915 = vmatpush.msrb.mxu0 %v1844_v53  ;;  %v1786_v51 = vperm.slane %v1784_v45, 0 }
 0x1cd   :  { %1878 = vmatpush.msrb.mxu2 %v1809_v55  ;;  %1897 = vmatpush.msrb.mxu3 %v1826_v62 }
 0x1ce   :  { %1934 = vmatpush.msra.mxu1 %v1861_v54  ;;  %1916 = vmatpush.msrb.mxu0 %v1843_v59 }
 0x1cf   :  { %1879 = vmatpush.msrb.mxu2 %v1808_v57  ;;  %1898 = vmatpush.msrb.mxu3 %v1825_v4 }
 0x1d0   :  { %1935 = vmatpush.msra.mxu1 %v1860_v60  ;;  %1917 = vmatpush.msrb.mxu0 %v1842_v63 }
 0x1d1   :  { %1880 = vmatpush.msrb.mxu2 %v1807_v61  ;;  %1899 = vmatpush.msrb.mxu3 %v1824_v11  ;;  %v1787_v61 = vperm.slane %v1784_v45, 1 }
 0x1d2   :  { %1936 = vmatpush.msra.mxu1 %v1859_v1  ;;  %1918 = vmatpush.msrb.mxu0 %v1841_v6  ;;  %v1788_v1 = vperm.slane %v1784_v45, 2 }
 0x1d3   :  { %v4356_v5 = vpop.f32.mrf.mxu3  ;;  %1881 = vmatpush.msrb.mxu2 %v1806_v3  ;;  %1900 = vmatpush.msrb.mxu3 %v1823_v15 }
 0x1d4   :  { %1937 = vmatpush.msra.mxu1 %v1858_v7  ;;  %1919 = vmatpush.msrb.mxu0 %v1840_v12  ;;  %v1438_v46 = vadd.f32 %v4356_v5, %v1418_v44  ;;  %v1789_v7 = vperm.slane %v1784_v45, 3 }
 0x1d5   :  { %1882 = vmatpush.msrb.mxu2 %v1805_v10  ;;  %1901 = vmatpush.msrb.mxu3 %v1822_v2 }
 0x1d6   :  { %1938 = vmatpush.msra.mxu1 %v1857_v13  ;;  %1920 = vmatpush.msrb.mxu0 %v1839_v16 }
 0x1d7   :  { %1883 = vmatpush.msrb.mxu2 %v1804_v14  ;;  %1902 = vmatpush.msrb.mxu3 %v1821_v25 }
 0x1d8   :  { %1939 = vmatpush.msra.mxu1 %v1856_v17  ;;  %1921 = vmatpush.msrb.mxu0 %v1838_v19  ;;  %v1968_v17 = vld [vmem:[%s4467_s12] ss:$0 sm:$0xff] }
 0x1d9   :  { %v4364_v8 = vpop.f32.mrf.mxu1  ;;  %1884 = vmatpush.msrb.mxu2 %v1803_v18  ;;  %1903 = vmatpush.msrb.mxu3 %v1820_v30 }
 0x1da   :  { %1940 = vmatpush.msra.mxu1 %v1855_v22  ;;  %1922 = vmatpush.msrb.mxu0 %v1837_v27 }
 0x1db   :  { %1885 = vmatpush.msrb.mxu2 %v1802_v24  ;;  %1904 = vmatpush.msrb.mxu3 %v1819_v33 }
 0x1dc   :  { %1941 = vmatpush.msra.mxu1 %v1854_v28  ;;  %1923 = vmatpush.msrb.mxu0 %v1836_v32 }
 0x1dd   :  { %1905 = vmatpush.msrb.mxu3 %v1818_v20 }
 0x1de   :  { %1942 = vmatpush.msra.mxu1 %v1853_v50  ;;  %1924 = vmatpush.msrb.mxu0 %v1835_v36 }
 0x1e0   :  { %1943 = vmatpush.msra.mxu1 %v1852_v34  ;;  %1925 = vmatpush.msrb.mxu0 %v1834_v21 }
 0x1e2   :  { %1944 = vmatpush.msra.mxu1 %v1851_v35 }
 0x1e4   :  { %1945 = vmatpush.msra.mxu1 %v1850_v41 }
 0x1e7   :  { %v1497_v26 = vpop.f32.mrf.mxu2 }
 0x1e8   :  { %v1517_v29 = vpop.f32.mrf.mxu3  ;;  %v1498_v49 = vadd.f32 %v1497_v26, %v4364_v8 }
 0x1ea   :  { %v1518_v55 = vadd.f32 %v1517_v29, %v1498_v49 }
 0x1ee   :  { %v1457_v23 = vpop.f32.mrf.mxu0 }
 0x1ef   :  { %v1458_v37 = vadd.f32 %v1457_v23, %v1438_v46 }
 0x1fb   :  { %v1557_v31 = vpop.f32.mrf.mxu1  ;;  %v1537_v38 = vpop.f32.mrf.mxu0 }
 0x1fc   :  { %v1538_v58 = vadd.f32 %v1537_v38, %v1518_v55 }
 0x20a   :  { %v1577_v39 = vpop.f32.mrf.mxu2  ;;  %v1597_v42 = vpop.f32.mrf.mxu3 }
 0x20b   :  { %v1578_v40 = vadd.f32 %v1577_v39, %v1557_v31 }
 0x20d   :  { %v1598_v56 = vadd.f32 %v1597_v42, %v1578_v40 }
 0x21d   :  { %v1637_v43 = vpop.f32.mrf.mxu1  ;;  %v1617_v47 = vpop.f32.mrf.mxu0 }
 0x21e   :  { %v1618_v62 = vadd.f32 %v1617_v47, %v1598_v56 }
 0x22b   :  { %v1657_v48 = vpop.f32.mrf.mxu2 }
 0x22c   :  { %v1677_v9 = vpop.f32.mrf.mxu3  ;;  %v1658_v54 = vadd.f32 %v1657_v48, %v1637_v43 }
 0x22e   :  { %v1678_v63 = vadd.f32 %v1677_v9, %v1658_v54 }
 0x239   :  { %v1721_v52 = vpop.f32.mrf.mxu1 }
 0x23a   :  { %v1722_v53 = vadd.f32 %v1721_v52, %v1458_v37 }
 0x23c   :  { %v1794_v57 = vadd.f32 %v1786_v51, %v1722_v53 }
 0x23d   :  { %v1697_v59 = vpop.f32.mrf.mxu0 }
 0x23e   :  { %v1798_v60 = vmax.f32 %v1794_v57, 0.0  ;;  %v1698_v5 = vadd.f32 %v1697_v59, %v1678_v63 }
 0x23f   :  { %v1741_v0 = vpop.f32.mrf.mxu2 }
 0x240   :  { %v1742_v3 = vadd.f32 %v1741_v0, %v1538_v58  ;;  %v1761_v4 = vpop.f32.mrf.mxu3  ;;  %1886 = vmatmul.f32.vlgmr.msrb.gmra.mxu2 %v1798_v60 }
 0x241   :  { %v1762_v6 = vadd.f32 %v1761_v4, %v1618_v62 }
 0x242   :  { %v1795_v8 = vadd.f32 %v1787_v61, %v1742_v3  ;;  %v1781_v10 = vpop.f32.mrf.mxu1 }
 0x243   :  { %v1796_v11 = vadd.f32 %v1788_v1, %v1762_v6  ;;  %v1782_v12 = vadd.f32 %v1781_v10, %v1698_v5 }
 0x244   :  { %v1799_v13 = vmax.f32 %v1795_v8, 0.0 }
 0x245   :  { %v1800_v14 = vmax.f32 %v1796_v11, 0.0  ;;  %v1797_v15 = vadd.f32 %v1789_v7, %v1782_v12 }
 0x246   :  { %1906 = vmatmul.f32.vlgmr.msrb.gmra.mxu3 %v1799_v13 }
 0x247   :  { %v1801_v16 = vmax.f32 %v1797_v15, 0.0  ;;  %1926 = vmatmul.f32.vlgmr.msrb.gmra.mxu0 %v1800_v14 }
 0x249   :  { %1946 = vmatmul.f32.vlgmr.msra.gmra.mxu1 %v1801_v16 }
 0x2c3   :  { %v1887_v18 = vpop.f32.mrf.mxu2 }
 0x2c4   :  { %v1888_v2 = vadd.f32 %v1968_v17, %v1887_v18  ;;  %v1927_v23 = vpop.f32.mrf.mxu0 }
 0x2c6   :  { %v1947_v25 = vpop.f32.mrf.mxu1 }
 0x2c9   :  { %v1907_v19 = vpop.f32.mrf.mxu3 }
 0x2ca   :  { %v1908_v22 = vadd.f32 %v1907_v19, %v1888_v2 }
 0x2cc   :  { %v1928_v24 = vadd.f32 %v1927_v23, %v1908_v22 }
 0x2ce   :  { %v1948_v26 = vadd.f32 %v1947_v25, %v1928_v24 }
 0x2d0   :  { %1950 = vst [vmem:[%s4470_s13] sm:$0xff] %v1948_v26 }

</bundles_post_ra>
